<compile_context>
chip_gen: v5e
topology: v5e:2x2
jax: 0.10.0
libtpu: 0.0.40
codegen_flags: <defaults>
</compile_context>

<pallas_src>
import jax
import jax.numpy as jnp
from jax.experimental import pallas as pl
from jax.experimental.pallas import tpu as pltpu


# ----------------------------------------------------------------------------
# Kernel
# ----------------------------------------------------------------------------
def _lstm_stack_kernel(x_ref, wih0_ref, whh_ref, wih_nxt_ref, bias_ref,
                       out_ref, h_out_ref, c_out_ref, gates_sc):
    """One (batch-block, sequence-chunk) grid step of the stacked LSTM.

    x_ref       : (Tc, Bblk, Din)  bf16   raw inputs for this chunk
    wih0_ref    : (Din, 4Hp)       bf16   layer-0 input weights (transposed)
    whh_ref     : (L, Hp, 4Hp)     bf16   recurrent weights (transposed)
    wih_nxt_ref : (max(L-1,1), Hp, 4Hp) bf16  input weights of layers 1..L-1
    bias_ref    : (L, 1, 4Hp)      f32    fused b_ih+b_hh per layer
    out_ref     : (Tc, Bblk, Hp)   f32    last-layer hidden states (this chunk)
    h_out_ref   : (L, Bblk, Hp)    f32    final hidden state  (carried state)
    c_out_ref   : (L, Bblk, Hp)    f32    final cell   state  (carried state)
    gates_sc    : (Tc, Bblk, 4Hp)  f32 VMEM  current layer's input projection
    """
    Tc, Bblk, _ = x_ref.shape
    L, Hp, G = whh_ref.shape                      # G == 4*Hp
    c_idx = pl.program_id(1)                      # sequence-chunk index
    unroll = min(Tc, 4)                           # capped unroll (no code blowup)

    # h/c carried in the revisited output blocks across chunks ("arbitrary"
    # axis, accumulator pattern): zero them on the first chunk of each batch
    # block.
    @pl.when(c_idx == 0)
    def _():
        h_out_ref[...] = jnp.zeros_like(h_out_ref)
        c_out_ref[...] = jnp.zeros_like(c_out_ref)

    # ---- layer-0 input projection for the whole chunk, off the recurrent
    # critical path: Tc independent (Bblk,Din)x(Din,4Hp) bf16 MXU matmuls.
    wih0 = wih0_ref[...]
    b0 = jnp.broadcast_to(bias_ref[0], (Bblk, G))            # hoisted broadcast

    def proj_step(t, carry):
        gates_sc[t] = (jnp.dot(x_ref[t], wih0,
                               preferred_element_type=jnp.float32) + b0)
        return carry

    jax.lax.fori_loop(0, Tc, proj_step, 0, unroll=unroll)

    def sigmoid_eup(v):                                       # EUP tanh, no divide
        return 0.5 * jnp.tanh(0.5 * v) + 0.5

    # ---- stacked recurrence: layers outer (static), time inner (fori_loop).
    for l in range(L):
        whh_l = whh_ref[l]                                    # (Hp, 4Hp) bf16
        last = l == L - 1
        if not last:
            wih_n = wih_nxt_ref[l]                            # (Hp, 4Hp) bf16
            b_n = jnp.broadcast_to(bias_ref[l + 1], (Bblk, G))  # hoisted

        def step(t, carry):
            h_prev, c_prev = carry
            # per-step critical path: one (Bblk,Hp)x(Hp,4Hp) bf16 matmul + gates
            g = gates_sc[t] + jnp.dot(h_prev.astype(jnp.bfloat16), whh_l,
                                      preferred_element_type=jnp.float32)
            sig = sigmoid_eup(g[:, :3 * Hp])                  # gates [i, f, o]
            i_g = sig[:, 0 * Hp:1 * Hp]
            f_g = sig[:, 1 * Hp:2 * Hp]
            o_g = sig[:, 2 * Hp:3 * Hp]
            g_g = jnp.tanh(g[:, 3 * Hp:4 * Hp])               # gate [g]
            c_t = f_g * c_prev + i_g * g_g
            h_t = o_g * jnp.tanh(c_t)
            if last:
                out_ref[t] = h_t                              # full-vreg store
            else:
                # next layer's input projection, off the recurrent critical
                # path.  In-place is safe: gates_sc[t] was consumed above in
                # this same program-order step (keep this invariant!).
                gates_sc[t] = (jnp.dot(h_t.astype(jnp.bfloat16), wih_n,
                                       preferred_element_type=jnp.float32)
                               + b_n)
            return (h_t, c_t)

        h_f, c_f = jax.lax.fori_loop(0, Tc, step,
                                     (h_out_ref[l], c_out_ref[l]),
                                     unroll=unroll)
        h_out_ref[l] = h_f
        c_out_ref[l] = c_f


# ----------------------------------------------------------------------------
# Weight preparation (gate permutation [i,f,g,o] -> [i,f,o,g], 128-lane pad)
# ----------------------------------------------------------------------------
_GATE_PERM = [0, 1, 3, 2]


def _prep_w(w, H, Hp, pad_in_to=None):
    """(4H, Din) PyTorch weight -> (Din[_p], 4Hp) transposed, permuted, padded."""
    din = w.shape[1]
    w4 = jnp.asarray(w, jnp.float32).reshape(4, H, din)[jnp.array(_GATE_PERM)]
    w4 = jnp.pad(w4, ((0, 0), (0, Hp - H), (0, 0)))           # pad gate width
    wt = w4.reshape(4 * Hp, din).T                            # (din, 4Hp)
    if pad_in_to is not None and pad_in_to > din:
        wt = jnp.pad(wt, ((0, pad_in_to - din), (0, 0)))      # pad input rows
    return wt


def _prep_b(b_ih, b_hh, H, Hp):
    b4 = (jnp.asarray(b_ih, jnp.float32)
          + jnp.asarray(b_hh, jnp.float32)).reshape(4, H)[jnp.array(_GATE_PERM)]
    b4 = jnp.pad(b4, ((0, 0), (0, Hp - H)))
    return b4.reshape(1, 4 * Hp)


# ----------------------------------------------------------------------------
# Wrapper
# ----------------------------------------------------------------------------
def lstm_encoder_forward(src, params, *, time_chunk=None):
    """Pallas equivalent of LSTMEncoder.forward (eval mode).

    src: (S, B, input_dim).  params: per-layer dicts of PyTorch nn.LSTM weights
    (w_ih (4H,Din), w_hh (4H,H), b_ih (4H,), b_hh (4H,)).
    Returns (outputs, hidden, cell) with PyTorch shapes.
    """
    x = jnp.asarray(src, jnp.float32)
    S, B, Din = x.shape
    L = len(params)
    H = params[0]["w_hh"].shape[1]
    Hp = ((H + 127) // 128) * 128                 # lane-dense hidden dim
    G = 4 * Hp

    # batch padding + optional 2-way split across TensorCores (v7x megacore)
    Bp = ((B + 7) // 8) * 8
    if Bp >= 16:
        Bp = ((Bp + 15) // 16) * 16
        n_b = 2
    else:
        n_b = 1
    Bblk = Bp // n_b

    # sequence chunking: largest divisor of S not exceeding the target chunk
    if time_chunk is None:
        time_chunk = 32
    Tc = max(1, min(S, time_chunk))
    while S % Tc:
        Tc -= 1
    n_chunks = S // Tc

    # weights: transpose + gate reorder + 128-lane pad, stored bf16 (MXU-native)
    wih0 = _prep_w(params[0]["w_ih"], H, Hp).astype(jnp.bfloat16)        # (Din,4Hp)
    whh = jnp.stack([_prep_w(p["w_hh"], H, Hp, pad_in_to=Hp)
                     for p in params]).astype(jnp.bfloat16)              # (L,Hp,4Hp)
    if L > 1:
        wih_nxt = jnp.stack([_prep_w(params[l]["w_ih"], H, Hp, pad_in_to=Hp)
                             for l in range(1, L)]).astype(jnp.bfloat16)  # (L-1,Hp,4Hp)
    else:  # dummy, never read
        wih_nxt = jnp.zeros((1, Hp, G), jnp.bfloat16)
    Ln = wih_nxt.shape[0]
    bias = jnp.stack([_prep_b(p["b_ih"], p["b_hh"], H, Hp)
                      for p in params])                                  # (L,1,4Hp) f32

    x_pad = jnp.pad(x, ((0, 0), (0, Bp - B), (0, 0))).astype(jnp.bfloat16)

    # explicit VMEM budget (double-buffered streamed blocks + scratch), clamped
    # to v7x's 64 MiB physical VMEM.
    est = (2 * Tc * Bblk * Din * 2                       # x (bf16, 2-buffered)
           + 2 * (Din * G + L * Hp * G + Ln * Hp * G) * 2  # weights (bf16)
           + 2 * L * G * 4                               # bias
           + 2 * Tc * Bblk * Hp * 4                      # out (2-buffered)
           + 2 * 2 * L * Bblk * Hp * 4                   # h/c state blocks
           + Tc * Bblk * G * 4)                          # gates scratch (f32)
    vmem_limit = int(min(64 * 1024 * 1024, max(2 * est, 16 * 1024 * 1024)))
    # TODO(synk): for very long chunks, store gates_sc in bf16 to cut residency.

    grid_spec = pltpu.PrefetchScalarGridSpec(
        num_scalar_prefetch=0,
        grid=(n_b, n_chunks),                    # (parallel batch, seq chunks)
        in_specs=[
            pl.BlockSpec((Tc, Bblk, Din), lambda b, c: (c, b, 0)),       # x
            pl.BlockSpec((Din, G), lambda b, c: (0, 0)),                 # W_ih0^T
            pl.BlockSpec((L, Hp, G), lambda b, c: (0, 0, 0)),            # W_hh^T
            pl.BlockSpec((Ln, Hp, G), lambda b, c: (0, 0, 0)),           # W_ih^T 1..
            pl.BlockSpec((L, 1, G), lambda b, c: (0, 0, 0)),             # biases
        ],
        out_specs=(
            pl.BlockSpec((Tc, Bblk, Hp), lambda b, c: (c, b, 0)),        # outputs
            pl.BlockSpec((L, Bblk, Hp), lambda b, c: (0, b, 0)),         # h_final
            pl.BlockSpec((L, Bblk, Hp), lambda b, c: (0, b, 0)),         # c_final
        ),
        scratch_shapes=[pltpu.VMEM((Tc, Bblk, G), jnp.float32)],         # gates
    )
    out_shapes = (
        jax.ShapeDtypeStruct((S, Bp, Hp), jnp.float32),
        jax.ShapeDtypeStruct((L, Bp, Hp), jnp.float32),
        jax.ShapeDtypeStruct((L, Bp, Hp), jnp.float32),
    )
    out_p, h_p, c_p = pl.pallas_call(
        _lstm_stack_kernel,
        out_shape=out_shapes,
        grid_spec=grid_spec,
        compiler_params=pltpu.CompilerParams(
            dimension_semantics=("parallel", "arbitrary"),
            vmem_limit_bytes=vmem_limit),
    )(x_pad, wih0, whh, wih_nxt, bias)

    # strip batch + hidden padding
    return out_p[:, :B, :H], h_p[:, :B, :H], c_p[:, :B, :H]


# ----------------------------------------------------------------------------
# Pure-JAX reference (lax.scan), optionally mirroring the bf16 MXU-operand math
# ----------------------------------------------------------------------------
def _reference_lstm(src, params, *, matmul_dtype=jnp.float32):
    x = jnp.asarray(src, jnp.float32)
    S, B, _ = x.shape
    hs, cs = [], []
    for p in params:
        H = p["w_hh"].shape[1]
        wih_t = jnp.asarray(p["w_ih"], jnp.float32).T.astype(matmul_dtype)
        whh_t = jnp.asarray(p["w_hh"], jnp.float32).T.astype(matmul_dtype)
        bias = jnp.asarray(p["b_ih"], jnp.float32) + jnp.asarray(p["b_hh"], jnp.float32)

        def step(carry, x_t):
            h, c = carry
            g = (jnp.dot(x_t.astype(matmul_dtype), wih_t,
                         preferred_element_type=jnp.float32)
                 + jnp.dot(h.astype(matmul_dtype), whh_t,
                           preferred_element_type=jnp.float32) + bias)
            i = jax.nn.sigmoid(g[:, 0 * H:1 * H])
            f = jax.nn.sigmoid(g[:, 1 * H:2 * H])
            gg = jnp.tanh(g[:, 2 * H:3 * H])
            o = jax.nn.sigmoid(g[:, 3 * H:4 * H])
            c_n = f * c + i * gg
            h_n = o * jnp.tanh(c_n)
            return (h_n, c_n), h_n

        init = (jnp.zeros((B, H), jnp.float32), jnp.zeros((B, H), jnp.float32))
        (h_f, c_f), ys = jax.lax.scan(step, init, x)
        x = ys
        hs.append(h_f)
        cs.append(c_f)
    return x, jnp.stack(hs, 0), jnp.stack(cs, 0)


def make_params(key, input_dim, hidden_dim, n_layers):
    """Deterministic parameter init (mimics PyTorch U(-k, k), k=1/sqrt(H))."""
    params = []
    k = 1.0 / jnp.sqrt(jnp.float32(hidden_dim))
    for layer in range(n_layers):
        din = input_dim if layer == 0 else hidden_dim
        key, k1, k2, k3, k4 = jax.random.split(key, 5)
        params.append(dict(
            w_ih=jax.random.uniform(k1, (4 * hidden_dim, din), jnp.float32, -k, k),
            w_hh=jax.random.uniform(k2, (4 * hidden_dim, hidden_dim), jnp.float32, -k, k),
            b_ih=jax.random.uniform(k3, (4 * hidden_dim,), jnp.float32, -k, k),
            b_hh=jax.random.uniform(k4, (4 * hidden_dim,), jnp.float32, -k, k),
        ))
    return params


def _run_and_check(*, seq, batch, din, hid, layers, chunk, key):
    k_src, k_par = jax.random.split(key)
    src = jax.random.normal(k_src, (seq, batch, din), jnp.float32)
    params = make_params(k_par, din, hid, layers)

    out, h, c = lstm_encoder_forward(src, params, time_chunk=chunk)
    jax.block_until_ready((out, h, c))

    assert out.shape == (seq, batch, hid)
    assert h.shape == (layers, batch, hid)
    assert c.shape == (layers, batch, hid)

    # Tight check vs a reference with identical numerics (bf16 MXU operands).
    m_out, m_h, m_c = _reference_lstm(src, params, matmul_dtype=jnp.bfloat16)
    for got, ref in ((out, m_out), (h, m_h), (c, m_c)):
        assert jnp.allclose(got, ref, atol=2e-3, rtol=2e-3)

    # Semantic check vs the pure-f32 (PyTorch-equivalent) reference; tolerance
    # loosened for the bf16 matmul-operand cast.
    f_out, f_h, f_c = _reference_lstm(src, params, matmul_dtype=jnp.float32)
    for got, ref in ((out, f_out), (h, f_h), (c, f_c)):
        assert jnp.allclose(got, ref, atol=5e-2, rtol=5e-2)


if __name__ == "__main__":
    key = jax.random.PRNGKey(0)
    k0, k1, k2 = jax.random.split(key, 3)

    # Primary small-shape config: multi-chunk sequence (exercises the h/c carry).
    _run_and_check(seq=8, batch=2, din=16, hid=32, layers=2, chunk=4, key=k0)
    # L=3 exercises the gates-scratch "consumed before overwrite" invariant.
    _run_and_check(seq=6, batch=3, din=16, hid=32, layers=3, chunk=3, key=k1)
    # batch=16 exercises the 2-way "parallel" batch split (v7x megacore axis).
    _run_and_check(seq=4, batch=16, din=16, hid=32, layers=2, chunk=2, key=k2)

    print("KERNEL_OK")
</pallas_src>

<mosaic_0001>
module attributes {stable_mosaic.version = 11 : i64} {
  func.func @_lstm_stack_kernel(%arg0: i32, %arg1: i32, %arg2: memref<4x8x16xbf16, #tpu.memory_space<vmem>>, %arg3: memref<16x512xbf16, #tpu.memory_space<vmem>>, %arg4: memref<2x128x512xbf16, #tpu.memory_space<vmem>>, %arg5: memref<1x128x512xbf16, #tpu.memory_space<vmem>>, %arg6: memref<2x1x512xf32, #tpu.memory_space<vmem>>, %arg7: memref<4x8x128xf32, #tpu.memory_space<vmem>>, %arg8: memref<2x8x128xf32, #tpu.memory_space<vmem>>, %arg9: memref<2x8x128xf32, #tpu.memory_space<vmem>>, %arg10: memref<4x8x512xf32, #tpu.memory_space<vmem>>) attributes {dimension_semantics = [#tpu.dimension_semantics<parallel>, #tpu.dimension_semantics<arbitrary>], iteration_bounds = array<i64: 1, 2>, scalar_prefetch = 0 : i64, scratch_operands = 1 : i64, tpu.core_type = #tpu.core_type<tc>, window_params = [{transform_indices = @transform_0, window_bounds = array<i64: 4, 8, 16>}, {pipeline_mode = #tpu.pipeline_mode<synchronous>, transform_indices = @transform_1, window_bounds = array<i64: 16, 512>}, {pipeline_mode = #tpu.pipeline_mode<synchronous>, transform_indices = @transform_2, window_bounds = array<i64: 2, 128, 512>}, {pipeline_mode = #tpu.pipeline_mode<synchronous>, transform_indices = @transform_3, window_bounds = array<i64: 1, 128, 512>}, {pipeline_mode = #tpu.pipeline_mode<synchronous>, transform_indices = @transform_4, window_bounds = array<i64: 2, 1, 512>}, {transform_indices = @transform_5, window_bounds = array<i64: 4, 8, 128>}, {transform_indices = @transform_6, window_bounds = array<i64: 2, 8, 128>}, {transform_indices = @transform_7, window_bounds = array<i64: 2, 8, 128>}]} {
    %c0_i32 = arith.constant 0 : i32
    %0 = arith.cmpi eq, %arg1, %c0_i32 : i32
    %1 = arith.extui %0 : i1 to i32
    %c0_i32_0 = arith.constant 0 : i32
    %2 = arith.cmpi ne, %1, %c0_i32_0 : i32
    scf.if %2 {
      %cst_138 = arith.constant 0.000000e+00 : f32
      %310 = vector.broadcast %cst_138 : f32 to vector<2x8x128xf32>
      %c0_139 = arith.constant 0 : index
      %c0_140 = arith.constant 0 : index
      %c0_141 = arith.constant 0 : index
      %311 = vector.load %arg8[%c0_139, %c0_140, %c0_141] : memref<2x8x128xf32, #tpu.memory_space<vmem>>, vector<2x8x128xf32>
      tpu.vector_store %arg8[%c0_139, %c0_140, %c0_141], %310 {strides = array<i32>} : memref<2x8x128xf32, #tpu.memory_space<vmem>>, vector<2x8x128xf32>,
      %cst_142 = arith.constant 0.000000e+00 : f32
      %312 = vector.broadcast %cst_142 : f32 to vector<2x8x128xf32>
      %c0_143 = arith.constant 0 : index
      %c0_144 = arith.constant 0 : index
      %c0_145 = arith.constant 0 : index
      %313 = vector.load %arg9[%c0_143, %c0_144, %c0_145] : memref<2x8x128xf32, #tpu.memory_space<vmem>>, vector<2x8x128xf32>
      tpu.vector_store %arg9[%c0_143, %c0_144, %c0_145], %312 {strides = array<i32>} : memref<2x8x128xf32, #tpu.memory_space<vmem>>, vector<2x8x128xf32>,
    } else {
    }
    %c0 = arith.constant 0 : index
    %c0_1 = arith.constant 0 : index
    %3 = vector.load %arg3[%c0, %c0_1] : memref<16x512xbf16, #tpu.memory_space<vmem>>, vector<16x512xbf16>
    %c0_2 = arith.constant 0 : index
    %c0_3 = arith.constant 0 : index
    %c0_4 = arith.constant 0 : index
    %4 = vector.load %arg6[%c0_2, %c0_3, %c0_4] : memref<2x1x512xf32, #tpu.memory_space<vmem>>, vector<1x1x512xf32>
    %5 = vector.shape_cast %4 : vector<1x1x512xf32> to vector<1x512xf32>
    %6 = vector.shape_cast %5 : vector<1x512xf32> to vector<1x512xf32>
    %7 = vector.broadcast %6 : vector<1x512xf32> to vector<8x512xf32>
    %c0_i32_5 = arith.constant 0 : i32
    %8 = arith.index_cast %c0_i32_5 : i32 to index
    %c0_6 = arith.constant 0 : index
    %c0_7 = arith.constant 0 : index
    %9 = vector.load %arg2[%8, %c0_6, %c0_7] : memref<4x8x16xbf16, #tpu.memory_space<vmem>>, vector<1x8x16xbf16>
    %10 = vector.shape_cast %9 : vector<1x8x16xbf16> to vector<8x16xbf16>
    %cst = arith.constant dense<0.000000e+00> : vector<8x512xf32>
    %11 = tpu.matmul %10, %3, %cst {dimension_numbers = #tpu.dot_dimension_numbers<[1], [0], [0], [1], [0, 0, 1, 1], [], []>} : vector<8x16xbf16>, vector<16x512xbf16>, vector<8x512xf32> -> vector<8x512xf32>
    %12 = arith.addf %11, %7 : vector<8x512xf32>
    %13 = arith.index_cast %c0_i32_5 : i32 to index
    %c0_8 = arith.constant 0 : index
    %c0_9 = arith.constant 0 : index
    %14 = vector.load %arg10[%13, %c0_8, %c0_9] : memref<4x8x512xf32, #tpu.memory_space<vmem>>, vector<1x8x512xf32>
    %15 = vector.shape_cast %14 : vector<1x8x512xf32> to vector<8x512xf32>
    %16 = vector.shape_cast %12 : vector<8x512xf32> to vector<1x8x512xf32>
    tpu.vector_store %arg10[%13, %c0_8, %c0_9], %16 {strides = array<i32>} : memref<4x8x512xf32, #tpu.memory_space<vmem>>, vector<1x8x512xf32>,
    %c1_i32 = arith.constant 1 : i32
    %17 = arith.index_cast %c1_i32 : i32 to index
    %c0_10 = arith.constant 0 : index
    %c0_11 = arith.constant 0 : index
    %18 = vector.load %arg2[%17, %c0_10, %c0_11] : memref<4x8x16xbf16, #tpu.memory_space<vmem>>, vector<1x8x16xbf16>
    %19 = vector.shape_cast %18 : vector<1x8x16xbf16> to vector<8x16xbf16>
    %cst_12 = arith.constant dense<0.000000e+00> : vector<8x512xf32>
    %20 = tpu.matmul %19, %3, %cst_12 {dimension_numbers = #tpu.dot_dimension_numbers<[1], [0], [0], [1], [0, 0, 1, 1], [], []>} : vector<8x16xbf16>, vector<16x512xbf16>, vector<8x512xf32> -> vector<8x512xf32>
    %21 = arith.addf %20, %7 : vector<8x512xf32>
    %22 = arith.index_cast %c1_i32 : i32 to index
    %c0_13 = arith.constant 0 : index
    %c0_14 = arith.constant 0 : index
    %23 = vector.load %arg10[%22, %c0_13, %c0_14] : memref<4x8x512xf32, #tpu.memory_space<vmem>>, vector<1x8x512xf32>
    %24 = vector.shape_cast %23 : vector<1x8x512xf32> to vector<8x512xf32>
    %25 = vector.shape_cast %21 : vector<8x512xf32> to vector<1x8x512xf32>
    tpu.vector_store %arg10[%22, %c0_13, %c0_14], %25 {strides = array<i32>} : memref<4x8x512xf32, #tpu.memory_space<vmem>>, vector<1x8x512xf32>,
    %c2_i32 = arith.constant 2 : i32
    %26 = arith.index_cast %c2_i32 : i32 to index
    %c0_15 = arith.constant 0 : index
    %c0_16 = arith.constant 0 : index
    %27 = vector.load %arg2[%26, %c0_15, %c0_16] : memref<4x8x16xbf16, #tpu.memory_space<vmem>>, vector<1x8x16xbf16>
    %28 = vector.shape_cast %27 : vector<1x8x16xbf16> to vector<8x16xbf16>
    %cst_17 = arith.constant dense<0.000000e+00> : vector<8x512xf32>
    %29 = tpu.matmul %28, %3, %cst_17 {dimension_numbers = #tpu.dot_dimension_numbers<[1], [0], [0], [1], [0, 0, 1, 1], [], []>} : vector<8x16xbf16>, vector<16x512xbf16>, vector<8x512xf32> -> vector<8x512xf32>
    %30 = arith.addf %29, %7 : vector<8x512xf32>
    %31 = arith.index_cast %c2_i32 : i32 to index
    %c0_18 = arith.constant 0 : index
    %c0_19 = arith.constant 0 : index
    %32 = vector.load %arg10[%31, %c0_18, %c0_19] : memref<4x8x512xf32, #tpu.memory_space<vmem>>, vector<1x8x512xf32>
    %33 = vector.shape_cast %32 : vector<1x8x512xf32> to vector<8x512xf32>
    %34 = vector.shape_cast %30 : vector<8x512xf32> to vector<1x8x512xf32>
    tpu.vector_store %arg10[%31, %c0_18, %c0_19], %34 {strides = array<i32>} : memref<4x8x512xf32, #tpu.memory_space<vmem>>, vector<1x8x512xf32>,
    %c3_i32 = arith.constant 3 : i32
    %35 = arith.index_cast %c3_i32 : i32 to index
    %c0_20 = arith.constant 0 : index
    %c0_21 = arith.constant 0 : index
    %36 = vector.load %arg2[%35, %c0_20, %c0_21] : memref<4x8x16xbf16, #tpu.memory_space<vmem>>, vector<1x8x16xbf16>
    %37 = vector.shape_cast %36 : vector<1x8x16xbf16> to vector<8x16xbf16>
    %cst_22 = arith.constant dense<0.000000e+00> : vector<8x512xf32>
    %38 = tpu.matmul %37, %3, %cst_22 {dimension_numbers = #tpu.dot_dimension_numbers<[1], [0], [0], [1], [0, 0, 1, 1], [], []>} : vector<8x16xbf16>, vector<16x512xbf16>, vector<8x512xf32> -> vector<8x512xf32>
    %39 = arith.addf %38, %7 : vector<8x512xf32>
    %40 = arith.index_cast %c3_i32 : i32 to index
    %c0_23 = arith.constant 0 : index
    %c0_24 = arith.constant 0 : index
    %41 = vector.load %arg10[%40, %c0_23, %c0_24] : memref<4x8x512xf32, #tpu.memory_space<vmem>>, vector<1x8x512xf32>
    %42 = vector.shape_cast %41 : vector<1x8x512xf32> to vector<8x512xf32>
    %43 = vector.shape_cast %39 : vector<8x512xf32> to vector<1x8x512xf32>
    tpu.vector_store %arg10[%40, %c0_23, %c0_24], %43 {strides = array<i32>} : memref<4x8x512xf32, #tpu.memory_space<vmem>>, vector<1x8x512xf32>,
    %c4_i32 = arith.constant 4 : i32
    %c0_25 = arith.constant 0 : index
    %c0_26 = arith.constant 0 : index
    %c0_27 = arith.constant 0 : index
    %44 = vector.load %arg4[%c0_25, %c0_26, %c0_27] : memref<2x128x512xbf16, #tpu.memory_space<vmem>>, vector<1x128x512xbf16>
    %45 = vector.shape_cast %44 : vector<1x128x512xbf16> to vector<128x512xbf16>
    %c0_28 = arith.constant 0 : index
    %c0_29 = arith.constant 0 : index
    %c0_30 = arith.constant 0 : index
    %46 = vector.load %arg5[%c0_28, %c0_29, %c0_30] : memref<1x128x512xbf16, #tpu.memory_space<vmem>>, vector<1x128x512xbf16>
    %47 = vector.shape_cast %46 : vector<1x128x512xbf16> to vector<128x512xbf16>
    %c1 = arith.constant 1 : index
    %c0_31 = arith.constant 0 : index
    %c0_32 = arith.constant 0 : index
    %48 = vector.load %arg6[%c1, %c0_31, %c0_32] : memref<2x1x512xf32, #tpu.memory_space<vmem>>, vector<1x1x512xf32>
    %49 = vector.shape_cast %48 : vector<1x1x512xf32> to vector<1x512xf32>
    %50 = vector.shape_cast %49 : vector<1x512xf32> to vector<1x512xf32>
    %51 = vector.broadcast %50 : vector<1x512xf32> to vector<8x512xf32>
    %c0_33 = arith.constant 0 : index
    %c0_34 = arith.constant 0 : index
    %c0_35 = arith.constant 0 : index
    %52 = vector.load %arg8[%c0_33, %c0_34, %c0_35] : memref<2x8x128xf32, #tpu.memory_space<vmem>>, vector<1x8x128xf32>
    %53 = vector.shape_cast %52 : vector<1x8x128xf32> to vector<8x128xf32>
    %c0_36 = arith.constant 0 : index
    %c0_37 = arith.constant 0 : index
    %c0_38 = arith.constant 0 : index
    %54 = vector.load %arg9[%c0_36, %c0_37, %c0_38] : memref<2x8x128xf32, #tpu.memory_space<vmem>>, vector<1x8x128xf32>
    %55 = vector.shape_cast %54 : vector<1x8x128xf32> to vector<8x128xf32>
    %c0_i32_39 = arith.constant 0 : i32
    %56 = arith.index_cast %c0_i32_39 : i32 to index
    %c0_40 = arith.constant 0 : index
    %c0_41 = arith.constant 0 : index
    %57 = vector.load %arg10[%56, %c0_40, %c0_41] : memref<4x8x512xf32, #tpu.memory_space<vmem>>, vector<1x8x512xf32>
    %58 = vector.shape_cast %57 : vector<1x8x512xf32> to vector<8x512xf32>
    %59 = arith.truncf %53 : vector<8x128xf32> to vector<8x128xbf16>
    %cst_42 = arith.constant dense<0.000000e+00> : vector<8x512xf32>
    %60 = tpu.matmul %59, %45, %cst_42 {dimension_numbers = #tpu.dot_dimension_numbers<[1], [0], [0], [1], [0, 0, 1, 1], [], []>} : vector<8x128xbf16>, vector<128x512xbf16>, vector<8x512xf32> -> vector<8x512xf32>
    %61 = arith.addf %58, %60 : vector<8x512xf32>
    %62 = vector.extract_strided_slice %61 {offsets = [0, 0], sizes = [8, 384], strides = [1, 1]} : vector<8x512xf32> to vector<8x384xf32>
    %cst_43 = arith.constant 5.000000e-01 : f32
    %63 = vector.broadcast %cst_43 : f32 to vector<8x384xf32>
    %64 = arith.mulf %63, %62 : vector<8x384xf32>
    %65 = math.tanh %64 : vector<8x384xf32>
    %cst_44 = arith.constant 5.000000e-01 : f32
    %66 = vector.broadcast %cst_44 : f32 to vector<8x384xf32>
    %67 = arith.mulf %66, %65 : vector<8x384xf32>
    %cst_45 = arith.constant 5.000000e-01 : f32
    %68 = vector.broadcast %cst_45 : f32 to vector<8x384xf32>
    %69 = arith.addf %67, %68 : vector<8x384xf32>
    %70 = vector.extract_strided_slice %69 {offsets = [0, 0], sizes = [8, 128], strides = [1, 1]} : vector<8x384xf32> to vector<8x128xf32>
    %71 = vector.extract_strided_slice %69 {offsets = [0, 128], sizes = [8, 128], strides = [1, 1]} : vector<8x384xf32> to vector<8x128xf32>
    %72 = vector.extract_strided_slice %69 {offsets = [0, 256], sizes = [8, 128], strides = [1, 1]} : vector<8x384xf32> to vector<8x128xf32>
    %73 = vector.extract_strided_slice %61 {offsets = [0, 384], sizes = [8, 128], strides = [1, 1]} : vector<8x512xf32> to vector<8x128xf32>
    %74 = math.tanh %73 : vector<8x128xf32>
    %75 = arith.mulf %71, %55 : vector<8x128xf32>
    %76 = arith.mulf %70, %74 : vector<8x128xf32>
    %77 = arith.addf %75, %76 : vector<8x128xf32>
    %78 = math.tanh %77 : vector<8x128xf32>
    %79 = arith.mulf %72, %78 : vector<8x128xf32>
    %80 = arith.truncf %79 : vector<8x128xf32> to vector<8x128xbf16>
    %cst_46 = arith.constant dense<0.000000e+00> : vector<8x512xf32>
    %81 = tpu.matmul %80, %47, %cst_46 {dimension_numbers = #tpu.dot_dimension_numbers<[1], [0], [0], [1], [0, 0, 1, 1], [], []>} : vector<8x128xbf16>, vector<128x512xbf16>, vector<8x512xf32> -> vector<8x512xf32>
    %82 = arith.addf %81, %51 : vector<8x512xf32>
    %83 = arith.index_cast %c0_i32_39 : i32 to index
    %c0_47 = arith.constant 0 : index
    %c0_48 = arith.constant 0 : index
    %84 = vector.load %arg10[%83, %c0_47, %c0_48] : memref<4x8x512xf32, #tpu.memory_space<vmem>>, vector<1x8x512xf32>
    %85 = vector.shape_cast %84 : vector<1x8x512xf32> to vector<8x512xf32>
    %86 = vector.shape_cast %82 : vector<8x512xf32> to vector<1x8x512xf32>
    tpu.vector_store %arg10[%83, %c0_47, %c0_48], %86 {strides = array<i32>} : memref<4x8x512xf32, #tpu.memory_space<vmem>>, vector<1x8x512xf32>,
    %c1_i32_49 = arith.constant 1 : i32
    %87 = arith.index_cast %c1_i32_49 : i32 to index
    %c0_50 = arith.constant 0 : index
    %c0_51 = arith.constant 0 : index
    %88 = vector.load %arg10[%87, %c0_50, %c0_51] : memref<4x8x512xf32, #tpu.memory_space<vmem>>, vector<1x8x512xf32>
    %89 = vector.shape_cast %88 : vector<1x8x512xf32> to vector<8x512xf32>
    %90 = arith.truncf %79 : vector<8x128xf32> to vector<8x128xbf16>
    %cst_52 = arith.constant dense<0.000000e+00> : vector<8x512xf32>
    %91 = tpu.matmul %90, %45, %cst_52 {dimension_numbers = #tpu.dot_dimension_numbers<[1], [0], [0], [1], [0, 0, 1, 1], [], []>} : vector<8x128xbf16>, vector<128x512xbf16>, vector<8x512xf32> -> vector<8x512xf32>
    %92 = arith.addf %89, %91 : vector<8x512xf32>
    %93 = vector.extract_strided_slice %92 {offsets = [0, 0], sizes = [8, 384], strides = [1, 1]} : vector<8x512xf32> to vector<8x384xf32>
    %cst_53 = arith.constant 5.000000e-01 : f32
    %94 = vector.broadcast %cst_53 : f32 to vector<8x384xf32>
    %95 = arith.mulf %94, %93 : vector<8x384xf32>
    %96 = math.tanh %95 : vector<8x384xf32>
    %cst_54 = arith.constant 5.000000e-01 : f32
    %97 = vector.broadcast %cst_54 : f32 to vector<8x384xf32>
    %98 = arith.mulf %97, %96 : vector<8x384xf32>
    %cst_55 = arith.constant 5.000000e-01 : f32
    %99 = vector.broadcast %cst_55 : f32 to vector<8x384xf32>
    %100 = arith.addf %98, %99 : vector<8x384xf32>
    %101 = vector.extract_strided_slice %100 {offsets = [0, 0], sizes = [8, 128], strides = [1, 1]} : vector<8x384xf32> to vector<8x128xf32>
    %102 = vector.extract_strided_slice %100 {offsets = [0, 128], sizes = [8, 128], strides = [1, 1]} : vector<8x384xf32> to vector<8x128xf32>
    %103 = vector.extract_strided_slice %100 {offsets = [0, 256], sizes = [8, 128], strides = [1, 1]} : vector<8x384xf32> to vector<8x128xf32>
    %104 = vector.extract_strided_slice %92 {offsets = [0, 384], sizes = [8, 128], strides = [1, 1]} : vector<8x512xf32> to vector<8x128xf32>
    %105 = math.tanh %104 : vector<8x128xf32>
    %106 = arith.mulf %102, %77 : vector<8x128xf32>
    %107 = arith.mulf %101, %105 : vector<8x128xf32>
    %108 = arith.addf %106, %107 : vector<8x128xf32>
    %109 = math.tanh %108 : vector<8x128xf32>
    %110 = arith.mulf %103, %109 : vector<8x128xf32>
    %111 = arith.truncf %110 : vector<8x128xf32> to vector<8x128xbf16>
    %cst_56 = arith.constant dense<0.000000e+00> : vector<8x512xf32>
    %112 = tpu.matmul %111, %47, %cst_56 {dimension_numbers = #tpu.dot_dimension_numbers<[1], [0], [0], [1], [0, 0, 1, 1], [], []>} : vector<8x128xbf16>, vector<128x512xbf16>, vector<8x512xf32> -> vector<8x512xf32>
    %113 = arith.addf %112, %51 : vector<8x512xf32>
    %114 = arith.index_cast %c1_i32_49 : i32 to index
    %c0_57 = arith.constant 0 : index
    %c0_58 = arith.constant 0 : index
    %115 = vector.load %arg10[%114, %c0_57, %c0_58] : memref<4x8x512xf32, #tpu.memory_space<vmem>>, vector<1x8x512xf32>
    %116 = vector.shape_cast %115 : vector<1x8x512xf32> to vector<8x512xf32>
    %117 = vector.shape_cast %113 : vector<8x512xf32> to vector<1x8x512xf32>
    tpu.vector_store %arg10[%114, %c0_57, %c0_58], %117 {strides = array<i32>} : memref<4x8x512xf32, #tpu.memory_space<vmem>>, vector<1x8x512xf32>,
    %c2_i32_59 = arith.constant 2 : i32
    %118 = arith.index_cast %c2_i32_59 : i32 to index
    %c0_60 = arith.constant 0 : index
    %c0_61 = arith.constant 0 : index
    %119 = vector.load %arg10[%118, %c0_60, %c0_61] : memref<4x8x512xf32, #tpu.memory_space<vmem>>, vector<1x8x512xf32>
    %120 = vector.shape_cast %119 : vector<1x8x512xf32> to vector<8x512xf32>
    %121 = arith.truncf %110 : vector<8x128xf32> to vector<8x128xbf16>
    %cst_62 = arith.constant dense<0.000000e+00> : vector<8x512xf32>
    %122 = tpu.matmul %121, %45, %cst_62 {dimension_numbers = #tpu.dot_dimension_numbers<[1], [0], [0], [1], [0, 0, 1, 1], [], []>} : vector<8x128xbf16>, vector<128x512xbf16>, vector<8x512xf32> -> vector<8x512xf32>
    %123 = arith.addf %120, %122 : vector<8x512xf32>
    %124 = vector.extract_strided_slice %123 {offsets = [0, 0], sizes = [8, 384], strides = [1, 1]} : vector<8x512xf32> to vector<8x384xf32>
    %cst_63 = arith.constant 5.000000e-01 : f32
    %125 = vector.broadcast %cst_63 : f32 to vector<8x384xf32>
    %126 = arith.mulf %125, %124 : vector<8x384xf32>
    %127 = math.tanh %126 : vector<8x384xf32>
    %cst_64 = arith.constant 5.000000e-01 : f32
    %128 = vector.broadcast %cst_64 : f32 to vector<8x384xf32>
    %129 = arith.mulf %128, %127 : vector<8x384xf32>
    %cst_65 = arith.constant 5.000000e-01 : f32
    %130 = vector.broadcast %cst_65 : f32 to vector<8x384xf32>
    %131 = arith.addf %129, %130 : vector<8x384xf32>
    %132 = vector.extract_strided_slice %131 {offsets = [0, 0], sizes = [8, 128], strides = [1, 1]} : vector<8x384xf32> to vector<8x128xf32>
    %133 = vector.extract_strided_slice %131 {offsets = [0, 128], sizes = [8, 128], strides = [1, 1]} : vector<8x384xf32> to vector<8x128xf32>
    %134 = vector.extract_strided_slice %131 {offsets = [0, 256], sizes = [8, 128], strides = [1, 1]} : vector<8x384xf32> to vector<8x128xf32>
    %135 = vector.extract_strided_slice %123 {offsets = [0, 384], sizes = [8, 128], strides = [1, 1]} : vector<8x512xf32> to vector<8x128xf32>
    %136 = math.tanh %135 : vector<8x128xf32>
    %137 = arith.mulf %133, %108 : vector<8x128xf32>
    %138 = arith.mulf %132, %136 : vector<8x128xf32>
    %139 = arith.addf %137, %138 : vector<8x128xf32>
    %140 = math.tanh %139 : vector<8x128xf32>
    %141 = arith.mulf %134, %140 : vector<8x128xf32>
    %142 = arith.truncf %141 : vector<8x128xf32> to vector<8x128xbf16>
    %cst_66 = arith.constant dense<0.000000e+00> : vector<8x512xf32>
    %143 = tpu.matmul %142, %47, %cst_66 {dimension_numbers = #tpu.dot_dimension_numbers<[1], [0], [0], [1], [0, 0, 1, 1], [], []>} : vector<8x128xbf16>, vector<128x512xbf16>, vector<8x512xf32> -> vector<8x512xf32>
    %144 = arith.addf %143, %51 : vector<8x512xf32>
    %145 = arith.index_cast %c2_i32_59 : i32 to index
    %c0_67 = arith.constant 0 : index
    %c0_68 = arith.constant 0 : index
    %146 = vector.load %arg10[%145, %c0_67, %c0_68] : memref<4x8x512xf32, #tpu.memory_space<vmem>>, vector<1x8x512xf32>
    %147 = vector.shape_cast %146 : vector<1x8x512xf32> to vector<8x512xf32>
    %148 = vector.shape_cast %144 : vector<8x512xf32> to vector<1x8x512xf32>
    tpu.vector_store %arg10[%145, %c0_67, %c0_68], %148 {strides = array<i32>} : memref<4x8x512xf32, #tpu.memory_space<vmem>>, vector<1x8x512xf32>,
    %c3_i32_69 = arith.constant 3 : i32
    %149 = arith.index_cast %c3_i32_69 : i32 to index
    %c0_70 = arith.constant 0 : index
    %c0_71 = arith.constant 0 : index
    %150 = vector.load %arg10[%149, %c0_70, %c0_71] : memref<4x8x512xf32, #tpu.memory_space<vmem>>, vector<1x8x512xf32>
    %151 = vector.shape_cast %150 : vector<1x8x512xf32> to vector<8x512xf32>
    %152 = arith.truncf %141 : vector<8x128xf32> to vector<8x128xbf16>
    %cst_72 = arith.constant dense<0.000000e+00> : vector<8x512xf32>
    %153 = tpu.matmul %152, %45, %cst_72 {dimension_numbers = #tpu.dot_dimension_numbers<[1], [0], [0], [1], [0, 0, 1, 1], [], []>} : vector<8x128xbf16>, vector<128x512xbf16>, vector<8x512xf32> -> vector<8x512xf32>
    %154 = arith.addf %151, %153 : vector<8x512xf32>
    %155 = vector.extract_strided_slice %154 {offsets = [0, 0], sizes = [8, 384], strides = [1, 1]} : vector<8x512xf32> to vector<8x384xf32>
    %cst_73 = arith.constant 5.000000e-01 : f32
    %156 = vector.broadcast %cst_73 : f32 to vector<8x384xf32>
    %157 = arith.mulf %156, %155 : vector<8x384xf32>
    %158 = math.tanh %157 : vector<8x384xf32>
    %cst_74 = arith.constant 5.000000e-01 : f32
    %159 = vector.broadcast %cst_74 : f32 to vector<8x384xf32>
    %160 = arith.mulf %159, %158 : vector<8x384xf32>
    %cst_75 = arith.constant 5.000000e-01 : f32
    %161 = vector.broadcast %cst_75 : f32 to vector<8x384xf32>
    %162 = arith.addf %160, %161 : vector<8x384xf32>
    %163 = vector.extract_strided_slice %162 {offsets = [0, 0], sizes = [8, 128], strides = [1, 1]} : vector<8x384xf32> to vector<8x128xf32>
    %164 = vector.extract_strided_slice %162 {offsets = [0, 128], sizes = [8, 128], strides = [1, 1]} : vector<8x384xf32> to vector<8x128xf32>
    %165 = vector.extract_strided_slice %162 {offsets = [0, 256], sizes = [8, 128], strides = [1, 1]} : vector<8x384xf32> to vector<8x128xf32>
    %166 = vector.extract_strided_slice %154 {offsets = [0, 384], sizes = [8, 128], strides = [1, 1]} : vector<8x512xf32> to vector<8x128xf32>
    %167 = math.tanh %166 : vector<8x128xf32>
    %168 = arith.mulf %164, %139 : vector<8x128xf32>
    %169 = arith.mulf %163, %167 : vector<8x128xf32>
    %170 = arith.addf %168, %169 : vector<8x128xf32>
    %171 = math.tanh %170 : vector<8x128xf32>
    %172 = arith.mulf %165, %171 : vector<8x128xf32>
    %173 = arith.truncf %172 : vector<8x128xf32> to vector<8x128xbf16>
    %cst_76 = arith.constant dense<0.000000e+00> : vector<8x512xf32>
    %174 = tpu.matmul %173, %47, %cst_76 {dimension_numbers = #tpu.dot_dimension_numbers<[1], [0], [0], [1], [0, 0, 1, 1], [], []>} : vector<8x128xbf16>, vector<128x512xbf16>, vector<8x512xf32> -> vector<8x512xf32>
    %175 = arith.addf %174, %51 : vector<8x512xf32>
    %176 = arith.index_cast %c3_i32_69 : i32 to index
    %c0_77 = arith.constant 0 : index
    %c0_78 = arith.constant 0 : index
    %177 = vector.load %arg10[%176, %c0_77, %c0_78] : memref<4x8x512xf32, #tpu.memory_space<vmem>>, vector<1x8x512xf32>
    %178 = vector.shape_cast %177 : vector<1x8x512xf32> to vector<8x512xf32>
    %179 = vector.shape_cast %175 : vector<8x512xf32> to vector<1x8x512xf32>
    tpu.vector_store %arg10[%176, %c0_77, %c0_78], %179 {strides = array<i32>} : memref<4x8x512xf32, #tpu.memory_space<vmem>>, vector<1x8x512xf32>,
    %c4_i32_79 = arith.constant 4 : i32
    %c0_80 = arith.constant 0 : index
    %c0_81 = arith.constant 0 : index
    %c0_82 = arith.constant 0 : index
    %180 = vector.load %arg8[%c0_80, %c0_81, %c0_82] : memref<2x8x128xf32, #tpu.memory_space<vmem>>, vector<1x8x128xf32>
    %181 = vector.shape_cast %180 : vector<1x8x128xf32> to vector<8x128xf32>
    %182 = vector.shape_cast %172 : vector<8x128xf32> to vector<1x8x128xf32>
    tpu.vector_store %arg8[%c0_80, %c0_81, %c0_82], %182 {strides = array<i32>} : memref<2x8x128xf32, #tpu.memory_space<vmem>>, vector<1x8x128xf32>,
    %c0_83 = arith.constant 0 : index
    %c0_84 = arith.constant 0 : index
    %c0_85 = arith.constant 0 : index
    %183 = vector.load %arg9[%c0_83, %c0_84, %c0_85] : memref<2x8x128xf32, #tpu.memory_space<vmem>>, vector<1x8x128xf32>
    %184 = vector.shape_cast %183 : vector<1x8x128xf32> to vector<8x128xf32>
    %185 = vector.shape_cast %170 : vector<8x128xf32> to vector<1x8x128xf32>
    tpu.vector_store %arg9[%c0_83, %c0_84, %c0_85], %185 {strides = array<i32>} : memref<2x8x128xf32, #tpu.memory_space<vmem>>, vector<1x8x128xf32>,
    %c1_86 = arith.constant 1 : index
    %c0_87 = arith.constant 0 : index
    %c0_88 = arith.constant 0 : index
    %186 = vector.load %arg4[%c1_86, %c0_87, %c0_88] : memref<2x128x512xbf16, #tpu.memory_space<vmem>>, vector<1x128x512xbf16>
    %187 = vector.shape_cast %186 : vector<1x128x512xbf16> to vector<128x512xbf16>
    %c1_89 = arith.constant 1 : index
    %c0_90 = arith.constant 0 : index
    %c0_91 = arith.constant 0 : index
    %188 = vector.load %arg8[%c1_89, %c0_90, %c0_91] : memref<2x8x128xf32, #tpu.memory_space<vmem>>, vector<1x8x128xf32>
    %189 = vector.shape_cast %188 : vector<1x8x128xf32> to vector<8x128xf32>
    %c1_92 = arith.constant 1 : index
    %c0_93 = arith.constant 0 : index
    %c0_94 = arith.constant 0 : index
    %190 = vector.load %arg9[%c1_92, %c0_93, %c0_94] : memref<2x8x128xf32, #tpu.memory_space<vmem>>, vector<1x8x128xf32>
    %191 = vector.shape_cast %190 : vector<1x8x128xf32> to vector<8x128xf32>
    %c0_i32_95 = arith.constant 0 : i32
    %192 = arith.index_cast %c0_i32_95 : i32 to index
    %c0_96 = arith.constant 0 : index
    %c0_97 = arith.constant 0 : index
    %193 = vector.load %arg10[%192, %c0_96, %c0_97] : memref<4x8x512xf32, #tpu.memory_space<vmem>>, vector<1x8x512xf32>
    %194 = vector.shape_cast %193 : vector<1x8x512xf32> to vector<8x512xf32>
    %195 = arith.truncf %189 : vector<8x128xf32> to vector<8x128xbf16>
    %cst_98 = arith.constant dense<0.000000e+00> : vector<8x512xf32>
    %196 = tpu.matmul %195, %187, %cst_98 {dimension_numbers = #tpu.dot_dimension_numbers<[1], [0], [0], [1], [0, 0, 1, 1], [], []>} : vector<8x128xbf16>, vector<128x512xbf16>, vector<8x512xf32> -> vector<8x512xf32>
    %197 = arith.addf %194, %196 : vector<8x512xf32>
    %198 = vector.extract_strided_slice %197 {offsets = [0, 0], sizes = [8, 384], strides = [1, 1]} : vector<8x512xf32> to vector<8x384xf32>
    %cst_99 = arith.constant 5.000000e-01 : f32
    %199 = vector.broadcast %cst_99 : f32 to vector<8x384xf32>
    %200 = arith.mulf %199, %198 : vector<8x384xf32>
    %201 = math.tanh %200 : vector<8x384xf32>
    %cst_100 = arith.constant 5.000000e-01 : f32
    %202 = vector.broadcast %cst_100 : f32 to vector<8x384xf32>
    %203 = arith.mulf %202, %201 : vector<8x384xf32>
    %cst_101 = arith.constant 5.000000e-01 : f32
    %204 = vector.broadcast %cst_101 : f32 to vector<8x384xf32>
    %205 = arith.addf %203, %204 : vector<8x384xf32>
    %206 = vector.extract_strided_slice %205 {offsets = [0, 0], sizes = [8, 128], strides = [1, 1]} : vector<8x384xf32> to vector<8x128xf32>
    %207 = vector.extract_strided_slice %205 {offsets = [0, 128], sizes = [8, 128], strides = [1, 1]} : vector<8x384xf32> to vector<8x128xf32>
    %208 = vector.extract_strided_slice %205 {offsets = [0, 256], sizes = [8, 128], strides = [1, 1]} : vector<8x384xf32> to vector<8x128xf32>
    %209 = vector.extract_strided_slice %197 {offsets = [0, 384], sizes = [8, 128], strides = [1, 1]} : vector<8x512xf32> to vector<8x128xf32>
    %210 = math.tanh %209 : vector<8x128xf32>
    %211 = arith.mulf %207, %191 : vector<8x128xf32>
    %212 = arith.mulf %206, %210 : vector<8x128xf32>
    %213 = arith.addf %211, %212 : vector<8x128xf32>
    %214 = math.tanh %213 : vector<8x128xf32>
    %215 = arith.mulf %208, %214 : vector<8x128xf32>
    %216 = arith.index_cast %c0_i32_95 : i32 to index
    %c0_102 = arith.constant 0 : index
    %c0_103 = arith.constant 0 : index
    %217 = vector.load %arg7[%216, %c0_102, %c0_103] : memref<4x8x128xf32, #tpu.memory_space<vmem>>, vector<1x8x128xf32>
    %218 = vector.shape_cast %217 : vector<1x8x128xf32> to vector<8x128xf32>
    %219 = vector.shape_cast %215 : vector<8x128xf32> to vector<1x8x128xf32>
    tpu.vector_store %arg7[%216, %c0_102, %c0_103], %219 {strides = array<i32>} : memref<4x8x128xf32, #tpu.memory_space<vmem>>, vector<1x8x128xf32>,
    %c1_i32_104 = arith.constant 1 : i32
    %220 = arith.index_cast %c1_i32_104 : i32 to index
    %c0_105 = arith.constant 0 : index
    %c0_106 = arith.constant 0 : index
    %221 = vector.load %arg10[%220, %c0_105, %c0_106] : memref<4x8x512xf32, #tpu.memory_space<vmem>>, vector<1x8x512xf32>
    %222 = vector.shape_cast %221 : vector<1x8x512xf32> to vector<8x512xf32>
    %223 = arith.truncf %215 : vector<8x128xf32> to vector<8x128xbf16>
    %cst_107 = arith.constant dense<0.000000e+00> : vector<8x512xf32>
    %224 = tpu.matmul %223, %187, %cst_107 {dimension_numbers = #tpu.dot_dimension_numbers<[1], [0], [0], [1], [0, 0, 1, 1], [], []>} : vector<8x128xbf16>, vector<128x512xbf16>, vector<8x512xf32> -> vector<8x512xf32>
    %225 = arith.addf %222, %224 : vector<8x512xf32>
    %226 = vector.extract_strided_slice %225 {offsets = [0, 0], sizes = [8, 384], strides = [1, 1]} : vector<8x512xf32> to vector<8x384xf32>
    %cst_108 = arith.constant 5.000000e-01 : f32
    %227 = vector.broadcast %cst_108 : f32 to vector<8x384xf32>
    %228 = arith.mulf %227, %226 : vector<8x384xf32>
    %229 = math.tanh %228 : vector<8x384xf32>
    %cst_109 = arith.constant 5.000000e-01 : f32
    %230 = vector.broadcast %cst_109 : f32 to vector<8x384xf32>
    %231 = arith.mulf %230, %229 : vector<8x384xf32>
    %cst_110 = arith.constant 5.000000e-01 : f32
    %232 = vector.broadcast %cst_110 : f32 to vector<8x384xf32>
    %233 = arith.addf %231, %232 : vector<8x384xf32>
    %234 = vector.extract_strided_slice %233 {offsets = [0, 0], sizes = [8, 128], strides = [1, 1]} : vector<8x384xf32> to vector<8x128xf32>
    %235 = vector.extract_strided_slice %233 {offsets = [0, 128], sizes = [8, 128], strides = [1, 1]} : vector<8x384xf32> to vector<8x128xf32>
    %236 = vector.extract_strided_slice %233 {offsets = [0, 256], sizes = [8, 128], strides = [1, 1]} : vector<8x384xf32> to vector<8x128xf32>
    %237 = vector.extract_strided_slice %225 {offsets = [0, 384], sizes = [8, 128], strides = [1, 1]} : vector<8x512xf32> to vector<8x128xf32>
    %238 = math.tanh %237 : vector<8x128xf32>
    %239 = arith.mulf %235, %213 : vector<8x128xf32>
    %240 = arith.mulf %234, %238 : vector<8x128xf32>
    %241 = arith.addf %239, %240 : vector<8x128xf32>
    %242 = math.tanh %241 : vector<8x128xf32>
    %243 = arith.mulf %236, %242 : vector<8x128xf32>
    %244 = arith.index_cast %c1_i32_104 : i32 to index
    %c0_111 = arith.constant 0 : index
    %c0_112 = arith.constant 0 : index
    %245 = vector.load %arg7[%244, %c0_111, %c0_112] : memref<4x8x128xf32, #tpu.memory_space<vmem>>, vector<1x8x128xf32>
    %246 = vector.shape_cast %245 : vector<1x8x128xf32> to vector<8x128xf32>
    %247 = vector.shape_cast %243 : vector<8x128xf32> to vector<1x8x128xf32>
    tpu.vector_store %arg7[%244, %c0_111, %c0_112], %247 {strides = array<i32>} : memref<4x8x128xf32, #tpu.memory_space<vmem>>, vector<1x8x128xf32>,
    %c2_i32_113 = arith.constant 2 : i32
    %248 = arith.index_cast %c2_i32_113 : i32 to index
    %c0_114 = arith.constant 0 : index
    %c0_115 = arith.constant 0 : index
    %249 = vector.load %arg10[%248, %c0_114, %c0_115] : memref<4x8x512xf32, #tpu.memory_space<vmem>>, vector<1x8x512xf32>
    %250 = vector.shape_cast %249 : vector<1x8x512xf32> to vector<8x512xf32>
    %251 = arith.truncf %243 : vector<8x128xf32> to vector<8x128xbf16>
    %cst_116 = arith.constant dense<0.000000e+00> : vector<8x512xf32>
    %252 = tpu.matmul %251, %187, %cst_116 {dimension_numbers = #tpu.dot_dimension_numbers<[1], [0], [0], [1], [0, 0, 1, 1], [], []>} : vector<8x128xbf16>, vector<128x512xbf16>, vector<8x512xf32> -> vector<8x512xf32>
    %253 = arith.addf %250, %252 : vector<8x512xf32>
    %254 = vector.extract_strided_slice %253 {offsets = [0, 0], sizes = [8, 384], strides = [1, 1]} : vector<8x512xf32> to vector<8x384xf32>
    %cst_117 = arith.constant 5.000000e-01 : f32
    %255 = vector.broadcast %cst_117 : f32 to vector<8x384xf32>
    %256 = arith.mulf %255, %254 : vector<8x384xf32>
    %257 = math.tanh %256 : vector<8x384xf32>
    %cst_118 = arith.constant 5.000000e-01 : f32
    %258 = vector.broadcast %cst_118 : f32 to vector<8x384xf32>
    %259 = arith.mulf %258, %257 : vector<8x384xf32>
    %cst_119 = arith.constant 5.000000e-01 : f32
    %260 = vector.broadcast %cst_119 : f32 to vector<8x384xf32>
    %261 = arith.addf %259, %260 : vector<8x384xf32>
    %262 = vector.extract_strided_slice %261 {offsets = [0, 0], sizes = [8, 128], strides = [1, 1]} : vector<8x384xf32> to vector<8x128xf32>
    %263 = vector.extract_strided_slice %261 {offsets = [0, 128], sizes = [8, 128], strides = [1, 1]} : vector<8x384xf32> to vector<8x128xf32>
    %264 = vector.extract_strided_slice %261 {offsets = [0, 256], sizes = [8, 128], strides = [1, 1]} : vector<8x384xf32> to vector<8x128xf32>
    %265 = vector.extract_strided_slice %253 {offsets = [0, 384], sizes = [8, 128], strides = [1, 1]} : vector<8x512xf32> to vector<8x128xf32>
    %266 = math.tanh %265 : vector<8x128xf32>
    %267 = arith.mulf %263, %241 : vector<8x128xf32>
    %268 = arith.mulf %262, %266 : vector<8x128xf32>
    %269 = arith.addf %267, %268 : vector<8x128xf32>
    %270 = math.tanh %269 : vector<8x128xf32>
    %271 = arith.mulf %264, %270 : vector<8x128xf32>
    %272 = arith.index_cast %c2_i32_113 : i32 to index
    %c0_120 = arith.constant 0 : index
    %c0_121 = arith.constant 0 : index
    %273 = vector.load %arg7[%272, %c0_120, %c0_121] : memref<4x8x128xf32, #tpu.memory_space<vmem>>, vector<1x8x128xf32>
    %274 = vector.shape_cast %273 : vector<1x8x128xf32> to vector<8x128xf32>
    %275 = vector.shape_cast %271 : vector<8x128xf32> to vector<1x8x128xf32>
    tpu.vector_store %arg7[%272, %c0_120, %c0_121], %275 {strides = array<i32>} : memref<4x8x128xf32, #tpu.memory_space<vmem>>, vector<1x8x128xf32>,
    %c3_i32_122 = arith.constant 3 : i32
    %276 = arith.index_cast %c3_i32_122 : i32 to index
    %c0_123 = arith.constant 0 : index
    %c0_124 = arith.constant 0 : index
    %277 = vector.load %arg10[%276, %c0_123, %c0_124] : memref<4x8x512xf32, #tpu.memory_space<vmem>>, vector<1x8x512xf32>
    %278 = vector.shape_cast %277 : vector<1x8x512xf32> to vector<8x512xf32>
    %279 = arith.truncf %271 : vector<8x128xf32> to vector<8x128xbf16>
    %cst_125 = arith.constant dense<0.000000e+00> : vector<8x512xf32>
    %280 = tpu.matmul %279, %187, %cst_125 {dimension_numbers = #tpu.dot_dimension_numbers<[1], [0], [0], [1], [0, 0, 1, 1], [], []>} : vector<8x128xbf16>, vector<128x512xbf16>, vector<8x512xf32> -> vector<8x512xf32>
    %281 = arith.addf %278, %280 : vector<8x512xf32>
    %282 = vector.extract_strided_slice %281 {offsets = [0, 0], sizes = [8, 384], strides = [1, 1]} : vector<8x512xf32> to vector<8x384xf32>
    %cst_126 = arith.constant 5.000000e-01 : f32
    %283 = vector.broadcast %cst_126 : f32 to vector<8x384xf32>
    %284 = arith.mulf %283, %282 : vector<8x384xf32>
    %285 = math.tanh %284 : vector<8x384xf32>
    %cst_127 = arith.constant 5.000000e-01 : f32
    %286 = vector.broadcast %cst_127 : f32 to vector<8x384xf32>
    %287 = arith.mulf %286, %285 : vector<8x384xf32>
    %cst_128 = arith.constant 5.000000e-01 : f32
    %288 = vector.broadcast %cst_128 : f32 to vector<8x384xf32>
    %289 = arith.addf %287, %288 : vector<8x384xf32>
    %290 = vector.extract_strided_slice %289 {offsets = [0, 0], sizes = [8, 128], strides = [1, 1]} : vector<8x384xf32> to vector<8x128xf32>
    %291 = vector.extract_strided_slice %289 {offsets = [0, 128], sizes = [8, 128], strides = [1, 1]} : vector<8x384xf32> to vector<8x128xf32>
    %292 = vector.extract_strided_slice %289 {offsets = [0, 256], sizes = [8, 128], strides = [1, 1]} : vector<8x384xf32> to vector<8x128xf32>
    %293 = vector.extract_strided_slice %281 {offsets = [0, 384], sizes = [8, 128], strides = [1, 1]} : vector<8x512xf32> to vector<8x128xf32>
    %294 = math.tanh %293 : vector<8x128xf32>
    %295 = arith.mulf %291, %269 : vector<8x128xf32>
    %296 = arith.mulf %290, %294 : vector<8x128xf32>
    %297 = arith.addf %295, %296 : vector<8x128xf32>
    %298 = math.tanh %297 : vector<8x128xf32>
    %299 = arith.mulf %292, %298 : vector<8x128xf32>
    %300 = arith.index_cast %c3_i32_122 : i32 to index
    %c0_129 = arith.constant 0 : index
    %c0_130 = arith.constant 0 : index
    %301 = vector.load %arg7[%300, %c0_129, %c0_130] : memref<4x8x128xf32, #tpu.memory_space<vmem>>, vector<1x8x128xf32>
    %302 = vector.shape_cast %301 : vector<1x8x128xf32> to vector<8x128xf32>
    %303 = vector.shape_cast %299 : vector<8x128xf32> to vector<1x8x128xf32>
    tpu.vector_store %arg7[%300, %c0_129, %c0_130], %303 {strides = array<i32>} : memref<4x8x128xf32, #tpu.memory_space<vmem>>, vector<1x8x128xf32>,
    %c4_i32_131 = arith.constant 4 : i32
    %c1_132 = arith.constant 1 : index
    %c0_133 = arith.constant 0 : index
    %c0_134 = arith.constant 0 : index
    %304 = vector.load %arg8[%c1_132, %c0_133, %c0_134] : memref<2x8x128xf32, #tpu.memory_space<vmem>>, vector<1x8x128xf32>
    %305 = vector.shape_cast %304 : vector<1x8x128xf32> to vector<8x128xf32>
    %306 = vector.shape_cast %299 : vector<8x128xf32> to vector<1x8x128xf32>
    tpu.vector_store %arg8[%c1_132, %c0_133, %c0_134], %306 {strides = array<i32>} : memref<2x8x128xf32, #tpu.memory_space<vmem>>, vector<1x8x128xf32>,
    %c1_135 = arith.constant 1 : index
    %c0_136 = arith.constant 0 : index
    %c0_137 = arith.constant 0 : index
    %307 = vector.load %arg9[%c1_135, %c0_136, %c0_137] : memref<2x8x128xf32, #tpu.memory_space<vmem>>, vector<1x8x128xf32>
    %308 = vector.shape_cast %307 : vector<1x8x128xf32> to vector<8x128xf32>
    %309 = vector.shape_cast %297 : vector<8x128xf32> to vector<1x8x128xf32>
    tpu.vector_store %arg9[%c1_135, %c0_136, %c0_137], %309 {strides = array<i32>} : memref<2x8x128xf32, #tpu.memory_space<vmem>>, vector<1x8x128xf32>,
    return
  }
  func.func @transform_0(%arg0: i32, %arg1: i32) -> (i32, i32, i32) {
    %c0_i32 = arith.constant 0 : i32
    %c0_i32_0 = arith.constant 0 : i32
    return %arg1, %arg0, %c0_i32 : i32, i32, i32
  }
  func.func @transform_1(%arg0: i32, %arg1: i32) -> (i32, i32) {
    %c0_i32 = arith.constant 0 : i32
    %c0_i32_0 = arith.constant 0 : i32
    %c0_i32_1 = arith.constant 0 : i32
    return %c0_i32, %c0_i32_0 : i32, i32
  }
  func.func @transform_2(%arg0: i32, %arg1: i32) -> (i32, i32, i32) {
    %c0_i32 = arith.constant 0 : i32
    %c0_i32_0 = arith.constant 0 : i32
    %c0_i32_1 = arith.constant 0 : i32
    %c0_i32_2 = arith.constant 0 : i32
    return %c0_i32, %c0_i32_0, %c0_i32_1 : i32, i32, i32
  }
  func.func @transform_3(%arg0: i32, %arg1: i32) -> (i32, i32, i32) {
    %c0_i32 = arith.constant 0 : i32
    %c0_i32_0 = arith.constant 0 : i32
    %c0_i32_1 = arith.constant 0 : i32
    %c0_i32_2 = arith.constant 0 : i32
    return %c0_i32, %c0_i32_0, %c0_i32_1 : i32, i32, i32
  }
  func.func @transform_4(%arg0: i32, %arg1: i32) -> (i32, i32, i32) {
    %c0_i32 = arith.constant 0 : i32
    %c0_i32_0 = arith.constant 0 : i32
    %c0_i32_1 = arith.constant 0 : i32
    %c0_i32_2 = arith.constant 0 : i32
    return %c0_i32, %c0_i32_0, %c0_i32_1 : i32, i32, i32
  }
  func.func @transform_5(%arg0: i32, %arg1: i32) -> (i32, i32, i32) {
    %c0_i32 = arith.constant 0 : i32
    %c0_i32_0 = arith.constant 0 : i32
    return %arg1, %arg0, %c0_i32 : i32, i32, i32
  }
  func.func @transform_6(%arg0: i32, %arg1: i32) -> (i32, i32, i32) {
    %c0_i32 = arith.constant 0 : i32
    %c0_i32_0 = arith.constant 0 : i32
    %c0_i32_1 = arith.constant 0 : i32
    return %c0_i32, %arg0, %c0_i32_0 : i32, i32, i32
  }
  func.func @transform_7(%arg0: i32, %arg1: i32) -> (i32, i32, i32) {
    %c0_i32 = arith.constant 0 : i32
    %c0_i32_0 = arith.constant 0 : i32
    %c0_i32_1 = arith.constant 0 : i32
    return %c0_i32, %arg0, %c0_i32_0 : i32, i32, i32
  }
}

</mosaic_0001>

<bundles_post_ra>
// kernel: tpu_custom_call.1
= control target key start
LH: loop header
LB: loop body
LE: loop exit
PB: predicated region body
PF: predicated region fallthrough
CT: control target
= control target key end

     0   :  { %s4419_s0 = inlined_call_operand.hbm [shape: bf16[8,8,16], index: 0, kind: input, shape index: {}]   ;;  %s4420_s1 = inlined_call_operand.hbm [shape: bf16[16,512], index: 1, kind: input, shape index: {}]   ;;  %s4421_s2 = inlined_call_operand.hbm [shape: bf16[2,128,512], index: 2, kind: input, shape index: {}]   ;;  %s4422_s3 = inlined_call_operand.hbm [shape: bf16[1,128,512], index: 3, kind: input, shape index: {}]   ;;  %s4423_s4 = inlined_call_operand.hbm [shape: f32[2,1,512], index: 4, kind: input, shape index: {}]   ;;  %s4424_s5 = inlined_call_operand.hbm [shape: f32[8,8,128], index: 5, kind: output, shape index: {0}]   ;;  %s4425_s6 = inlined_call_operand.hbm [shape: f32[2,8,128], index: 6, kind: output, shape index: {1}]   ;;  %s4426_s7 = inlined_call_operand.hbm [shape: f32[2,8,128], index: 7, kind: output, shape index: {2}]  }
   0x1   :  { %4489 = sst [smem:[#allocation73_spill]] %s4420_s1 }
   0x2   :  { %4490 = sst [smem:[#allocation74_spill]] %s4421_s2 }
   0x3   :  { %4491 = sst [smem:[#allocation75_spill]] %s4422_s3 }
   0x4   :  { %4492 = sst [smem:[#allocation76_spill]] %s4423_s4 }
   0x5   :  { %13 = vsyncpa [#allocation4], 0 }
   0x6   :  { %15 = vsyncpa [#allocation4 + $0x1], 0 }
   0x7   :  { %16 = vsyncpa [#allocation7], 0 }
   0x8   :  { %17 = vsyncpa [#allocation10], 0 }
   0x9   :  { %18 = vsyncpa [#allocation5], 0 }
   0xa   :  { %20 = vsyncpa [#allocation5 + $0x1], 0 }
   0xb   :  { %21 = vsyncpa [#allocation14], 0  ;;  %s3452_s24 = smov 0   ;;  %s3454_s25 = smov 0  }
   0xc   :  { %s3456_s26 = smov 0   ;;  %s3458_s27 = smov 0  }
   0xd   :  { %s3460_s28 = smov 0   ;;  %s3462_s29 = smov 0  }
   0xe LB: > { %s4427_s30 = sadd.s32 4294967295, %s3397_s29   ;;  %s2342_s8 = sadd.s32 4294967294, %s3397_s29   ;;  %s3397_s29 = sphi %s3462_s29, %s27_s29   ;;  %s3393_s28 = sphi %s3460_s28, %s4634_s28   ;;  %s3389_s27 = sphi %s3458_s27, %s4633_s27   ;;  %s3385_s26 = sphi %s3456_s26, %s4632_s26   ;;  %s3381_s25 = sphi %s3454_s25, %s4631_s25   ;;  %s3377_s24 = sphi %s3452_s24, %s4630_s24  }
   0xf   : > { %p61_p0 = scmp.ne.s32.totalorder %s3381_s25, %s3377_s24  ;;  %p3488_p1 = scmp.eq.s32.totalorder %s4427_s30, 0 }
  0x10   : > { %p177_p2 = scmp.eq.s32.totalorder %s2342_s8, 1  ;;  %p2343_p4 = scmp.ge.s32.totalorder %s3397_s29, 1 }
  0x11   : > { %p3494_p3 = por %p3488_p1, %p61_p0  ;;  %p236_p6 = scmp.lt.s32.totalorder %s3397_s29, 3 }
  0x12   : > { %p3499_p5 = por %p177_p2, %p61_p0  ;;  %s4496_s1 = sld [smem:[#allocation73_spill]] }
  0x13   : > { %p3507_p7 = pnand %p2343_p4, %p236_p6  ;;  %s3399_s16 = smov [#allocation6]  }
  0x14   : > { %s249_s17 = sshll.u32 %s3399_s16, 4  ;;  %p2348_p10 = scmp.ge.s32.totalorder %s3397_s29, 2  ;;  %s250_s17 = int_to_ptr.vmem [resolvable:$true] %s249_s17 }
  0x15   : > { %p2921_p8 = pneg %p3507_p7  ;;  %s4499_s3 = sld [smem:[#allocation75_spill]] }
  0x16   : > { %s3400_s22 = smov 256   ;;  %s3401_s23 = smov 16  }
  0x17   : > { %p3515_p9 = pnand %p2921_p8, %p3488_p1  ;;  %s3402_s8 = smov [#allocation9]  }
  0x18   : > { %s247_s14 = sshll.u32 %s4496_s1, 4  ;;  %s277_s12 = sshll.u32 %s3402_s8, 4  ;;  %s248_s14 = int_to_ptr.hbm [resolvable:$true] %s247_s14  ;;  %s278_s12 = int_to_ptr.vmem [resolvable:$true] %s277_s12 }
  0x19   : > { %2924 = dma.hbm_to_vmem [thread:$0]  (!%p3515_p9), %s248_s14, 512, %s250_s17, [#allocation7], %s3400_s22, %s3400_s22, %s3401_s23  }
  0x1a   : > { %s4500_s2 = sld [smem:[#allocation74_spill]]  ;;  %s3403_s14 = smov [#allocation8]  }
  0x1b   : > { %s275_s21 = sshll.u32 %s4499_s3, 4  ;;  %s4501_s4 = sld [smem:[#allocation76_spill]]  ;;  %s276_s21 = int_to_ptr.hbm [resolvable:$true] %s275_s21 }
  0x1c   : > { %2930 = dma.hbm_to_vmem [thread:$0]  (!%p3515_p9), %s276_s21, 4096, %s278_s12, [#allocation10], %s3400_s22, %s3400_s22, %s3401_s23  }
  0x1d   : > { %s263_s17 = sshll.u32 %s3403_s14, 4  ;;  %s3404_s8 = smov [#allocation11]   ;;  %s264_s17 = int_to_ptr.vmem [resolvable:$true] %s263_s17 }
  0x1e   : > { %s291_s13 = sshll.u32 %s3404_s8, 4  ;;  %s4428_s21 = smov 64   ;;  %s292_s13 = int_to_ptr.vmem [resolvable:$true] %s291_s13 }
  0x1f   : > { %s4429_s12 = smov 4   ;;  %s4502_s16 = sadd.s32 4294967295, %s3397_s29  }
  0x20   : > { %s261_s30 = sshll.u32 %s4500_s2, 4  ;;  %p3542_p11 = scmp.eq.s32.totalorder %s4502_s16, 1  ;;  %s262_s30 = int_to_ptr.hbm [resolvable:$true] %s261_s30 }
  0x21   : > { %s289_s1 = sshll.u32 %s4501_s4, 4  ;;  %p55_p13 = scmp.ne.s32.totalorder %s3385_s26, %s3381_s25  ;;  %s290_s1 = int_to_ptr.hbm [resolvable:$true] %s289_s1 }
  0x22   : > { %2927 = dma.hbm_to_vmem [thread:$0]  (!%p3515_p9), %s262_s30, 8192, %s264_s17, [#allocation7], %s3400_s22, %s3400_s22, %s3401_s23  }
  0x23   : > { %2933 = dma.hbm_to_vmem [thread:$0]  (!%p3515_p9), %s290_s1, 128, %s292_s13, [#allocation10], %s4428_s21, %s4428_s21, %s4429_s12  }
  0x24   : > { %s36_s30 = sadd.s32 1, %s3393_s28  ;;  %s48_s22 = sadd.s32 1, %s3385_s26 }
  0x25   : > { %p37_p12 = scmp.ge.s32.totalorder %s36_s30, 2  ;;  %p56_p0 = scmp.eq.s32.totalorder %s3397_s29, 0 }
  0x26   : > { %p3555_p2 = por %p3542_p11, %p55_p13  ;;  %p2946_p4 = scmp.lt.s32.totalorder %s3397_s29, 2 }
  0x27   : > { %s4636_s30 = smov (%p37_p12, %s36_s30), 0  ;;  %s305_s23 = sand.u32 1, %s3385_s26  }
  0x28   : > { %4504 = sst [smem:[#allocation21_spill]] %s4636_s30  ;;  %s43_s1 = ssub.s32 %s3393_s28, %s4636_s30 }
  0x29   : > { %p46_p6 = scmp.eq.s32.totalorder %s43_s1, 0  ;;  %p57_p8 = por %p56_p0, %p55_p13 }
  0x2a   : > { %s2349_s20 = sshll.u32 %s305_s23, 4  ;;  %s2791_s14 = sshll.u32 %s3393_s28, 4 }
  0x2b   : > { %s3565_s17 = scalar_select %p46_p6, %s3385_s26, %s48_s22  }
  0x2c   : > { %s315_s16 = scalar_lea.hbm %s4419_s0, %s2791_s14  ;;  %s309_s12 = scalar_lea.vmem [#allocation3], %s2349_s20 }
  0x2d   : > { %s316_s21 = sshll.u32 %s315_s16, 4  ;;  %s318_s2 = sshll.u32 %s309_s12, 4  ;;  %s317_s21 = int_to_ptr.hbm [resolvable:$true] %s316_s21  ;;  %s319_s2 = int_to_ptr.vmem [resolvable:$true] %s318_s2 }
  0x2e   : > { %p2935_p9 = pnand %p2946_p4, %p57_p8  ;;  %s306_s3 = scalar_lea.sflag [#allocation4], %s305_s23 }
  0x2f   : > { %s4506_s4 = smov 4   ;;  %s4507_s30 = smov 64  }
  0x30   : > { %2937 = dma.hbm_to_vmem [thread:$0]  (!%p2935_p9), %s317_s21, 256, %s319_s2, %s306_s3, %s4507_s30, %s4507_s30, %s4506_s4  }
  0x31   : > { %330 = sbr.rel (%p3507_p7) target bundleno = 1473 (0x5c1), region = 40 }
  0x36   : > { %s3578_s22 = sand.u32 1, %s3381_s25  }
  0x37   : > { %s2353_s1 = sshll.u32 %s3578_s22, 4  ;;  %s333_s12 = scalar_lea.sflag [#allocation4], %s3578_s22 }
  0x38   : > { %s3582_s20 = scalar_lea.vmem [#allocation3], %s2353_s1 }
  0x39   : > { %3356 = dma.done.wait (%p3494_p3), %s333_s12, 256  }
  0x3a   : > { %3358 = vsyncadd (%p3494_p3), %s333_s12, 4294967040 }
  0x3b   : > { %3360 = dma.done.wait (%p3488_p1), [#allocation7], 8704  }
  0x3c   : > { %3362 = vsyncadd (%p3488_p1), [#allocation7], 4294958592 }
  0x3d   : > { %3364 = dma.done.wait (%p3488_p1), [#allocation10], 4224  }
  0x3e   : > { %3366 = vsyncadd (%p3488_p1), [#allocation10], 4294963072  ;;  %s2358_s2 = sshll.u32 %s3578_s22, 5  ;;  %p2359_p7 = scmp.ne.s32.totalorder %s3389_s27, 0 }
  0x3f   : > { %s3597_s3 = scalar_lea.vmem [#allocation12], %s2358_s2 }
  0x40   : > { %394 = sbr.rel (%p2359_p7) target bundleno = 74 (0x4a), region = 64 }
  0x45   : > { %v3407_v0 = vmov 0.0  }
  0x46   : > { %395 = vst [vmem:[#allocation13] sm:$0xff] %v3407_v0 }
  0x47   : > { %396 = vst [vmem:[#allocation13 + $0x8] sm:$0xff] %v3407_v0 }
  0x48   : > { %397 = vst [vmem:[#allocation15] sm:$0xff] %v3407_v0 }
  0x49   : > { %398 = vst [vmem:[#allocation15 + $0x8] sm:$0xff] %v3407_v0 }
  0x4a PF: > { %v2362_v1 = vld [vmem:[#allocation6] sm:$0xf]  ;;  %v2794_v2 = vld [vmem:[#allocation6 + $0xc] sm:$0xf0]  ;;  %v2792_v3 = vld [vmem:[#allocation6 + $0x4] sm:$0xf] }
  0x4b   : > { %v2363_v4 = vor.u32 %v2794_v2, %v2362_v1  ;;  %v2364_v5 = vld [vmem:[#allocation6 + $0x10] sm:$0xf0]  ;;  %v2370_v6 = vld [vmem:[#allocation6 + $0x8] sm:$0xf]  ;;  %v2795_v7 = vld [vmem:[#allocation6 + $0x14] sm:$0xf0] }
  0x4c   : > { %v2367_v8 = vor.u32 %v2792_v3, %v2364_v5  ;;  %v2371_v9 = vor.u32 %v2795_v7, %v2370_v6  ;;  %v2793_v10 = vld [vmem:[#allocation6 + $0xc] sm:$0xf]  ;;  %v2372_v11 = vld [vmem:[#allocation6 + $0x18] sm:$0xf0]  ;;  %v413_v13 = vld [vmem:[%s3582_s20] sm:$0xf] }
  0x4d   : > { %445 = vmatpush.bf16.msra.mxu0 %v2363_v4  ;;  %v2375_v12 = vor.u32 %v2793_v10, %v2372_v11  ;;  %vm434_vm0 = vcmask 130048   ;;  %v2380_v14 = vld [vmem:[%s3582_s20 + $0x4] sm:$0xf]  ;;  %v2509_v15 = vld [vmem:[#allocation8 + $0xe0] sm:$0xf]  ;;  %s2892_s4 = sshll.u32 %s3389_s27, 5 }
  0x4e   : > { %458 = vmatpush.bf16.msra.mxu1 %v2367_v8  ;;  %471 = vmatpush.bf16.msra.mxu2 %v2371_v9  ;;  %v2826_v16 = vld [vmem:[#allocation8 + $0xec] sm:$0xf0]  ;;  %v2824_v17 = vld [vmem:[#allocation8 + $0xe4] sm:$0xf]  ;;  %v2511_v18 = vld [vmem:[#allocation8 + $0xf0] sm:$0xf0]  ;;  %s2155_s15 = scalar_lea.hbm %s4424_s5, %s2892_s4 }
  0x4f   : > { %484 = vmatpush.bf16.msra.mxu3 %v2375_v12  ;;  %v2517_v19 = vld [vmem:[#allocation8 + $0xe8] sm:$0xf]  ;;  %v2827_v20 = vld [vmem:[#allocation8 + $0xf4] sm:$0xf0]  ;;  %v2825_v22 = vld [vmem:[#allocation8 + $0xec] sm:$0xf]  ;;  %v3611_v24 = vor.u32 %v2826_v16, %v2509_v15  ;;  %v3613_v25 = vor.u32 %v2824_v17, %v2511_v18 }
  0x50   : > { %2376 = vmatmul.msk.bf16.vlgmr.msra.gmra.mxu0 %vm434_vm0, %v413_v13  ;;  %v2385_v21 = vld [vmem:[%s3582_s20 + $0x8] sm:$0xf]  ;;  %v2519_v23 = vld [vmem:[#allocation8 + $0xf8] sm:$0xf0]  ;;  %v3615_v26 = vor.u32 %v2827_v20, %v2517_v19  ;;  %v2493_v27 = vld [vmem:[#allocation8 + $0xc0] sm:$0xf] }
  0x51   : > { %506 = vmatpush.bf16.msrb.mxu0 %v2363_v4  ;;  %2377 = vmatmul.msk.bf16.vlgmr.msra.gmra.mxu1 %vm434_vm0, %v413_v13  ;;  %v2822_v28 = vld [vmem:[#allocation8 + $0xcc] sm:$0xf0]  ;;  %v2820_v29 = vld [vmem:[#allocation8 + $0xc4] sm:$0xf]  ;;  %v3618_v30 = vor.u32 %v2825_v22, %v2519_v23  ;;  %v2495_v31 = vld [vmem:[#allocation8 + $0xd0] sm:$0xf0] }
  0x52   : > { %519 = vmatpush.bf16.msrb.mxu1 %v2367_v8  ;;  %2378 = vmatmul.msk.bf16.vlgmr.msra.gmra.mxu2 %vm434_vm0, %v413_v13  ;;  %v2501_v32 = vld [vmem:[#allocation8 + $0xc8] sm:$0xf]  ;;  %v2823_v33 = vld [vmem:[#allocation8 + $0xd4] sm:$0xf0]  ;;  %v2821_v34 = vld [vmem:[#allocation8 + $0xcc] sm:$0xf]  ;;  %v3624_v36 = vor.u32 %v2822_v28, %v2493_v27  ;;  %v3628_v37 = vor.u32 %v2820_v29, %v2495_v31 }
  0x53   : > { %2379 = vmatmul.msk.bf16.vlgmr.msra.gmra.mxu3 %vm434_vm0, %v413_v13  ;;  %532 = vmatpush.bf16.msrb.mxu2 %v2371_v9  ;;  %v2503_v35 = vld [vmem:[#allocation8 + $0xd8] sm:$0xf0]  ;;  %v3630_v38 = vor.u32 %v2823_v33, %v2501_v32  ;;  %v2477_v39 = vld [vmem:[#allocation8 + $0xa0] sm:$0xf]  ;;  %v2818_v40 = vld [vmem:[#allocation8 + $0xac] sm:$0xf0] }
  0x54   : > { %545 = vmatpush.bf16.msrb.mxu3 %v2375_v12  ;;  %v2816_v41 = vld [vmem:[#allocation8 + $0xa4] sm:$0xf]  ;;  %v3633_v42 = vor.u32 %v2821_v34, %v2503_v35  ;;  %v2479_v43 = vld [vmem:[#allocation8 + $0xb0] sm:$0xf0]  ;;  %v2485_v44 = vld [vmem:[#allocation8 + $0xa8] sm:$0xf]  ;;  %v3636_v48 = vor.u32 %v2818_v40, %v2477_v39 }
  0x55   : > { %568 = vmatpush.bf16.msra.mxu0 %v2363_v4  ;;  %v2819_v45 = vld [vmem:[#allocation8 + $0xb4] sm:$0xf0]  ;;  %v2817_v46 = vld [vmem:[#allocation8 + $0xac] sm:$0xf]  ;;  %v2487_v47 = vld [vmem:[#allocation8 + $0xb8] sm:$0xf0]  ;;  %v3640_v49 = vor.u32 %v2816_v41, %v2479_v43 }
  0x56   : > { %581 = vmatpush.bf16.msra.mxu1 %v2367_v8  ;;  %v3642_v50 = vor.u32 %v2819_v45, %v2485_v44  ;;  %v2461_v51 = vld [vmem:[#allocation8 + $0x80] sm:$0xf]  ;;  %v2814_v52 = vld [vmem:[#allocation8 + $0x8c] sm:$0xf0]  ;;  %v2812_v53 = vld [vmem:[#allocation8 + $0x84] sm:$0xf]  ;;  %v3645_v54 = vor.u32 %v2817_v46, %v2487_v47 }
  0x57   : > { %594 = vmatpush.bf16.msra.mxu2 %v2371_v9  ;;  %v2463_v55 = vld [vmem:[#allocation8 + $0x90] sm:$0xf0]  ;;  %v2469_v56 = vld [vmem:[#allocation8 + $0x88] sm:$0xf]  ;;  %v2815_v57 = vld [vmem:[#allocation8 + $0x94] sm:$0xf0]  ;;  %v3648_v60 = vor.u32 %v2814_v52, %v2461_v51 }
  0x58   : > { %607 = vmatpush.bf16.msra.mxu3 %v2375_v12  ;;  %v2813_v58 = vld [vmem:[#allocation8 + $0x8c] sm:$0xf]  ;;  %v2471_v59 = vld [vmem:[#allocation8 + $0x98] sm:$0xf0]  ;;  %v3652_v61 = vor.u32 %v2812_v53, %v2463_v55  ;;  %v3654_v62 = vor.u32 %v2815_v57, %v2469_v56  ;;  %v2445_v63 = vld [vmem:[#allocation8 + $0x60] sm:$0xf] }
  0x59   : > { %4508 = vst [vmem:[#allocation22_spill] sm:$0xff] %v3648_v60  ;;  %v2810_v0 = vld [vmem:[#allocation8 + $0x6c] sm:$0xf0]  ;;  %v2808_v1 = vld [vmem:[#allocation8 + $0x64] sm:$0xf]  ;;  %v3657_v2 = vor.u32 %v2813_v58, %v2471_v59  ;;  %v755_v58 = vld [vmem:[#allocation13] sm:$0xff] }
  0x5a   : > { %4509 = vst [vmem:[#allocation23_spill] sm:$0xff] %v3652_v61  ;;  %v2447_v3 = vld [vmem:[#allocation8 + $0x70] sm:$0xf0]  ;;  %v2811_v5 = vld [vmem:[#allocation8 + $0x74] sm:$0xf0]  ;;  %s3408_s21 = smov [#allocation13]  }
  0x5b   : > { %4510 = vst [vmem:[#allocation24_spill] sm:$0xff] %v3654_v62  ;;  %v2390_v6 = vld [vmem:[%s3582_s20 + $0xc] sm:$0xf]  ;;  %v3665_v10 = vor.u32 %v2808_v1, %v2447_v3  ;;  %v2806_v13 = vld [vmem:[#allocation8 + $0x4c] sm:$0xf0]  ;;  %v761_v1 = vpack.c.bf16 %v755_v58, %v755_v58  ;;  %s4363_s30 = sshll.u32 %s3408_s21, 4  ;;  %s2173_s30 = int_to_ptr.vmem [resolvable:$true] %s4363_s30 }
  0x5c   : > { %4511 = vst [vmem:[#allocation25_spill] sm:$0xff] %v3657_v2  ;;  %v2809_v7 = vld [vmem:[#allocation8 + $0x6c] sm:$0xf]  ;;  %v2431_v16 = vld [vmem:[#allocation8 + $0x50] sm:$0xf0]  ;;  %s2174_s8 = sshll.u32 %s4425_s6, 4  ;;  %s2175_s8 = int_to_ptr.hbm [resolvable:$true] %s2174_s8 }
  0x5d   : > { %4513 = vst [vmem:[#allocation27_spill] sm:$0xff] %v3665_v10  ;;  %v2437_v17 = vld [vmem:[#allocation8 + $0x48] sm:$0xf]  ;;  %v2807_v18 = vld [vmem:[#allocation8 + $0x54] sm:$0xf0]  ;;  %s2156_s13 = sshll.u32 %s3597_s3, 4  ;;  %s2157_s13 = int_to_ptr.vmem [resolvable:$true] %s2156_s13 }
  0x5e   : > { %v2805_v19 = vld [vmem:[#allocation8 + $0x4c] sm:$0xf]  ;;  %v2439_v20 = vld [vmem:[#allocation8 + $0x58] sm:$0xf0]  ;;  %v3683_v23 = vor.u32 %v2807_v18, %v2437_v17  ;;  %v2413_v27 = vld [vmem:[#allocation8 + $0x20] sm:$0xf] }
  0x5f   : > { %v2802_v28 = vld [vmem:[#allocation8 + $0x2c] sm:$0xf0]  ;;  %v2800_v29 = vld [vmem:[#allocation8 + $0x24] sm:$0xf]  ;;  %v3686_v31 = vor.u32 %v2805_v19, %v2439_v20  ;;  %v2415_v32 = vld [vmem:[#allocation8 + $0x30] sm:$0xf0] }
  0x60   : > { %2381 = vmatmul.msk.bf16.vlgmr.msrb.gmra.mxu0 %vm434_vm0, %v2380_v14  ;;  %4518 = vst [vmem:[#allocation32_spill] sm:$0xff] %v3683_v23  ;;  %v2421_v33 = vld [vmem:[#allocation8 + $0x28] sm:$0xf]  ;;  %v2803_v34 = vld [vmem:[#allocation8 + $0x34] sm:$0xf0]  ;;  %v3689_v40 = vor.u32 %v2802_v28, %v2413_v27  ;;  %v3693_v41 = vor.u32 %v2800_v29, %v2415_v32  ;;  %s2158_s16 = sshll.u32 %s2155_s15, 4  ;;  %s2159_s16 = int_to_ptr.hbm [resolvable:$true] %s2158_s16 }
  0x61   : > { %2382 = vmatmul.msk.bf16.vlgmr.msrb.gmra.mxu1 %vm434_vm0, %v2380_v14  ;;  %630 = vmatpush.bf16.msrb.mxu0 %v2363_v4  ;;  %v2453_v4 = vld [vmem:[#allocation8 + $0x68] sm:$0xf]  ;;  %4519 = vst [vmem:[#allocation33_spill] sm:$0xff] %v3686_v31  ;;  %v2801_v35 = vld [vmem:[#allocation8 + $0x2c] sm:$0xf]  ;;  %v3695_v43 = vor.u32 %v2803_v34, %v2421_v33  ;;  %s3409_s27 = smov [#allocation15]  }
  0x62   : > { %2383 = vmatmul.msk.bf16.vlgmr.msrb.gmra.mxu2 %vm434_vm0, %v2380_v14  ;;  %643 = vmatpush.bf16.msrb.mxu1 %v2367_v8  ;;  %v2455_v8 = vld [vmem:[#allocation8 + $0x78] sm:$0xf0]  ;;  %v3667_v11 = vor.u32 %v2811_v5, %v2453_v4  ;;  %4520 = vst [vmem:[#allocation34_spill] sm:$0xff] %v3689_v40  ;;  %v2397_v44 = vld [vmem:[#allocation8] sm:$0xf]  ;;  %s4369_s1 = sshll.u32 %s3409_s27, 4  ;;  %s2189_s1 = int_to_ptr.vmem [resolvable:$true] %s4369_s1 }
  0x63   : > { %2384 = vmatmul.msk.bf16.vlgmr.msrb.gmra.mxu3 %vm434_vm0, %v2380_v14  ;;  %656 = vmatpush.bf16.msrb.mxu2 %v2371_v9  ;;  %v3661_v9 = vor.u32 %v2810_v0, %v2445_v63  ;;  %v2804_v14 = vld [vmem:[#allocation8 + $0x44] sm:$0xf]  ;;  %v3671_v15 = vor.u32 %v2809_v7, %v2455_v8  ;;  %v2423_v39 = vld [vmem:[#allocation8 + $0x38] sm:$0xf0]  ;;  %4521 = vst [vmem:[#allocation35_spill] sm:$0xff] %v3693_v41  ;;  %s2190_s2 = sshll.u32 %s4426_s7, 4  ;;  %s2191_s2 = int_to_ptr.hbm [resolvable:$true] %s2190_s2 }
  0x64   : > { %669 = vmatpush.bf16.msrb.mxu3 %v2375_v12  ;;  %4514 = vst [vmem:[#allocation28_spill] sm:$0xff] %v3667_v11  ;;  %v2429_v12 = vld [vmem:[#allocation8 + $0x40] sm:$0xf]  ;;  %v3681_v22 = vor.u32 %v2804_v14, %v2431_v16  ;;  %v2798_v45 = vld [vmem:[#allocation8 + $0xc] sm:$0xf0]  ;;  %v3698_v47 = vor.u32 %v2801_v35, %v2423_v39  ;;  %s2143_s4 = scalar_lea.sflag [#allocation5], %s3578_s22 }
  0x65   : > { %4512 = vst [vmem:[#allocation26_spill] sm:$0xff] %v3661_v9  ;;  %v2796_v46 = vld [vmem:[#allocation8 + $0x4] sm:$0xf]  ;;  %v2399_v51 = vld [vmem:[#allocation8 + $0x10] sm:$0xf0]  ;;  %v3701_v57 = vor.u32 %v2798_v45, %v2397_v44  ;;  %s3261_s9 = sshra.s32 %s2159_s16, 4  ;;  %s3262_s9 = int_to_ptr.hbm [resolvable:$true] %s3261_s9 }
  0x66   : > { %4515 = vst [vmem:[#allocation29_spill] sm:$0xff] %v3671_v15  ;;  %v2405_v52 = vld [vmem:[#allocation8 + $0x8] sm:$0xf]  ;;  %v2799_v53 = vld [vmem:[#allocation8 + $0x14] sm:$0xf0]  ;;  %v3705_v59 = vor.u32 %v2796_v46, %v2399_v51  ;;  %s3263_s10 = scalar_lea.hbm %s3262_s9, 32  ;;  %p3268_p13 = scmp.lt.s32.totalorder %s3262_s9, %s4424_s5 }
  0x67   : > { %4517 = vst [vmem:[#allocation31_spill] sm:$0xff] %v3681_v22  ;;  %v2797_v55 = vld [vmem:[#allocation8 + $0xc] sm:$0xf]  ;;  %v2407_v56 = vld [vmem:[#allocation8 + $0x18] sm:$0xf0]  ;;  %v3707_v63 = vor.u32 %v2799_v53, %v2405_v52  ;;  %p3264_p1 = scmp.ne.s32.totalorder %s3262_s9, %s3263_s10  ;;  %s3267_s23 = scalar_lea.hbm %s4424_s5, 64 }
  0x68   : > { %4522 = vst [vmem:[#allocation36_spill] sm:$0xff] %v3695_v43  ;;  %v3710_v0 = vor.u32 %v2797_v55, %v2407_v56  ;;  %v2637_v28 = vld [vmem:[#allocation9 + $0xe0] sm:$0xf]  ;;  %v2858_v29 = vld [vmem:[#allocation9 + $0xec] sm:$0xf0]  ;;  %p3269_p0 = scmp.lt.s32.totalorder %s3267_s23, %s3263_s10 }
  0x69   : > { %4523 = vst [vmem:[#allocation37_spill] sm:$0xff] %v3698_v47  ;;  %v2856_v32 = vld [vmem:[#allocation9 + $0xe4] sm:$0xf]  ;;  %v3734_v33 = vor.u32 %v2858_v29, %v2637_v28  ;;  %v2639_v34 = vld [vmem:[#allocation9 + $0xf0] sm:$0xf0]  ;;  %p3265_p3 = pnand %p3264_p1, %p3555_p2 }
  0x6a   : > { %4524 = vst [vmem:[#allocation38_spill] sm:$0xff] %v3701_v57  ;;  %v2645_v35 = vld [vmem:[#allocation9 + $0xe8] sm:$0xf]  ;;  %v2859_v39 = vld [vmem:[#allocation9 + $0xf4] sm:$0xf0]  ;;  %v3736_v44 = vor.u32 %v2856_v32, %v2639_v34  ;;  %p3270_p4 = por %p3269_p0, %p3268_p13 }
  0x6b   : > { %4525 = vst [vmem:[#allocation39_spill] sm:$0xff] %v3705_v59  ;;  %v3738_v45 = vor.u32 %v2859_v39, %v2645_v35  ;;  %v2857_v46 = vld [vmem:[#allocation9 + $0xec] sm:$0xf]  ;;  %v2647_v51 = vld [vmem:[#allocation9 + $0xf8] sm:$0xf0]  ;;  %p3266_p12 = pneg %p3265_p3 }
  0x6c   : > { %4526 = vst [vmem:[#allocation40_spill] sm:$0xff] %v3707_v63  ;;  %v3741_v52 = vor.u32 %v2857_v46, %v2647_v51  ;;  %v2621_v58 = vld [vmem:[#allocation9 + $0xc0] sm:$0xf]  ;;  %v2855_v28 = vld [vmem:[#allocation9 + $0xd4] sm:$0xf0] }
  0x6d   : > { %4527 = vst [vmem:[#allocation41_spill] sm:$0xff] %v3710_v0  ;;  %v2853_v39 = vld [vmem:[#allocation9 + $0xcc] sm:$0xf]  ;;  %v2631_v46 = vld [vmem:[#allocation9 + $0xd8] sm:$0xf0]  ;;  %p3271_p6 = pnand %p3270_p4, %p3266_p12 }
  0x6e   : > { %v2605_v51 = vld [vmem:[#allocation9 + $0xa0] sm:$0xf] }
  0x70   : > { %2386 = vmatmul.msk.bf16.vlgmr.msra.gmra.mxu0 %vm434_vm0, %v2385_v21 }
  0x71   : > { %2387 = vmatmul.msk.bf16.vlgmr.msra.gmra.mxu1 %vm434_vm0, %v2385_v21  ;;  %922 = vmatpush.bf16.msra.mxu0 %v3611_v24 }
  0x72   : > { %2388 = vmatmul.msk.bf16.vlgmr.msra.gmra.mxu2 %vm434_vm0, %v2385_v21  ;;  %935 = vmatpush.bf16.msra.mxu1 %v3613_v25 }
  0x73   : > { %2389 = vmatmul.msk.bf16.vlgmr.msra.gmra.mxu3 %vm434_vm0, %v2385_v21  ;;  %948 = vmatpush.bf16.msra.mxu2 %v3615_v26  ;;  %v3677_v21 = vor.u32 %v2806_v13, %v2429_v12  ;;  %v403_v12 = vld [vmem:[#allocation11] sm:$0xf] }
  0x74   : > { %961 = vmatpush.bf16.msra.mxu3 %v3618_v30  ;;  %v3724_v13 = vperm.slane %v403_v12, 0  ;;  %v3726_v16 = vperm.slane %v403_v12, 1  ;;  %v3743_v53 = vperm.slane %v403_v12, 2  ;;  %v3745_v55 = vperm.slane %v403_v12, 3  ;;  %v2629_v12 = vld [vmem:[#allocation9 + $0xc8] sm:$0xf] }
  0x75   : > { %923 = vmatpush.bf16.msra.mxu0 %v3624_v36  ;;  %4516 = vst [vmem:[#allocation30_spill] sm:$0xff] %v3677_v21  ;;  %v3760_v35 = vor.u32 %v2855_v28, %v2629_v12  ;;  %v2851_v12 = vld [vmem:[#allocation9 + $0xb4] sm:$0xf0]  ;;  %v2849_v28 = vld [vmem:[#allocation9 + $0xac] sm:$0xf] }
  0x76   : > { %936 = vmatpush.bf16.msra.mxu1 %v3628_v37 }
  0x77   : > { %949 = vmatpush.bf16.msra.mxu2 %v3630_v38 }
  0x78   : > { %962 = vmatpush.bf16.msra.mxu3 %v3633_v42 }
  0x79   : > { %924 = vmatpush.bf16.msra.mxu0 %v3636_v48 }
  0x7a   : > { %937 = vmatpush.bf16.msra.mxu1 %v3640_v49 }
  0x7b   : > { %950 = vmatpush.bf16.msra.mxu2 %v3642_v50 }
  0x7c   : > { %963 = vmatpush.bf16.msra.mxu3 %v3645_v54 }
  0x7d   : > { %925 = vmatpush.bf16.msra.mxu0 %v3648_v60 }
  0x7e   : > { %938 = vmatpush.bf16.msra.mxu1 %v3652_v61 }
  0x7f   : > { %951 = vmatpush.bf16.msra.mxu2 %v3654_v62 }
  0x80   : > { %964 = vmatpush.bf16.msra.mxu3 %v3657_v2  ;;  %2391 = vmatmul.msk.bf16.vlgmr.msrb.gmra.mxu0 %vm434_vm0, %v2390_v6 }
  0x81   : > { %2392 = vmatmul.msk.bf16.vlgmr.msrb.gmra.mxu1 %vm434_vm0, %v2390_v6  ;;  %926 = vmatpush.bf16.msra.mxu0 %v3661_v9 }
  0x82   : > { %2393 = vmatmul.msk.bf16.vlgmr.msrb.gmra.mxu2 %vm434_vm0, %v2390_v6  ;;  %939 = vmatpush.bf16.msra.mxu1 %v3665_v10 }
  0x83   : > { %2394 = vmatmul.msk.bf16.vlgmr.msrb.gmra.mxu3 %vm434_vm0, %v2390_v6  ;;  %952 = vmatpush.bf16.msra.mxu2 %v3667_v11 }
  0x84   : > { %965 = vmatpush.bf16.msra.mxu3 %v3671_v15 }
  0x85   : > { %927 = vmatpush.bf16.msra.mxu0 %v3677_v21 }
  0x86   : > { %940 = vmatpush.bf16.msra.mxu1 %v3681_v22 }
  0x87   : > { %953 = vmatpush.bf16.msra.mxu2 %v3683_v23 }
  0x88   : > { %966 = vmatpush.bf16.msra.mxu3 %v3686_v31 }
  0x89   : > { %928 = vmatpush.bf16.msra.mxu0 %v3689_v40 }
  0x8a   : > { %941 = vmatpush.bf16.msra.mxu1 %v3693_v41 }
  0x8b   : > { %954 = vmatpush.bf16.msra.mxu2 %v3695_v43 }
  0x8c   : > { %967 = vmatpush.bf16.msra.mxu3 %v3698_v47 }
  0x8d   : > { %929 = vmatpush.bf16.msra.mxu0 %v3701_v57 }
  0x8e   : > { %942 = vmatpush.bf16.msra.mxu1 %v3705_v59 }
  0x8f   : > { %955 = vmatpush.bf16.msra.mxu2 %v3707_v63 }
  0x90   : > { %968 = vmatpush.bf16.msra.mxu3 %v3710_v0  ;;  %930 = vmatmul.bf16.vlgmr.msra.gmra.mxu0 %v761_v1 }
  0x91   : > { %943 = vmatmul.bf16.vlgmr.msra.gmra.mxu1 %v761_v1  ;;  %1157 = vmatpush.bf16.msrb.mxu0 %v3734_v33 }
  0x92   : > { %956 = vmatmul.bf16.vlgmr.msra.gmra.mxu2 %v761_v1  ;;  %1170 = vmatpush.bf16.msrb.mxu1 %v3736_v44 }
  0x93   : > { %969 = vmatmul.bf16.vlgmr.msra.gmra.mxu3 %v761_v1  ;;  %1183 = vmatpush.bf16.msrb.mxu2 %v3738_v45  ;;  %v2854_v1 = vld [vmem:[#allocation9 + $0xcc] sm:$0xf0] }
  0x94   : > { %1196 = vmatpush.bf16.msrb.mxu3 %v3741_v52 }
  0x97   : > { %1184 = vmatpush.bf16.msrb.mxu2 %v3760_v35 }
  0xcd   : > { %v3716_v3 = vpop.f32.mrf.mxu0 }
  0xce   : > { %v3718_v4 = vpop.f32.mrf.mxu1 }
  0xd5   : > { %v3720_v5 = vpop.f32.mrf.mxu2  ;;  %v449_v7 = vpop.f32.mrf.mxu0 }
  0xd6   : > { %v3722_v6 = vpop.f32.mrf.mxu3  ;;  %v462_v8 = vpop.f32.mrf.mxu1  ;;  %v2852_v7 = vld [vmem:[#allocation9 + $0xc4] sm:$0xf] }
  0xdd   : > { %v475_v14 = vpop.f32.mrf.mxu2  ;;  %v508_v18 = vpop.f32.mrf.mxu0 }
  0xde   : > { %v488_v17 = vpop.f32.mrf.mxu3  ;;  %v3729_v19 = vadd.f32 %v508_v18, %v3724_v13  ;;  %v521_v20 = vpop.f32.mrf.mxu1  ;;  %v3753_v18 = vor.u32 %v2854_v1, %v2621_v58  ;;  %v2850_v58 = vld [vmem:[#allocation9 + $0xac] sm:$0xf0]  ;;  %v2848_v1 = vld [vmem:[#allocation9 + $0xa4] sm:$0xf] }
  0xdf   : > { %v3732_v27 = vadd.f32 %v521_v20, %v3726_v16  ;;  %v2623_v20 = vld [vmem:[#allocation9 + $0xd0] sm:$0xf0] }
  0xe0   : > { %4528 = vst [vmem:[#allocation42_spill] sm:$0xff] %v3729_v19  ;;  %v3758_v34 = vor.u32 %v2852_v7, %v2623_v20  ;;  %1158 = vmatpush.bf16.msrb.mxu0 %v3753_v18  ;;  %v2613_v20 = vld [vmem:[#allocation9 + $0xa8] sm:$0xf] }
  0xe1   : > { %4529 = vst [vmem:[#allocation43_spill] sm:$0xff] %v3732_v27 }
  0xe2   : > { %1171 = vmatpush.bf16.msrb.mxu1 %v3758_v34 }
  0xe5   : > { %v534_v56 = vpop.f32.mrf.mxu2  ;;  %v510_v17 = vpop.f32.mrf.mxu0 }
  0xe6   : > { %v3751_v8 = vadd.f32 %v534_v56, %v3743_v53  ;;  %v547_v14 = vpop.f32.mrf.mxu3  ;;  %v523_v32 = vpop.f32.mrf.mxu1  ;;  %v3763_v56 = vor.u32 %v2853_v39, %v2631_v46  ;;  %v2607_v17 = vld [vmem:[#allocation9 + $0xb0] sm:$0xf0]  ;;  %v2615_v39 = vld [vmem:[#allocation9 + $0xb8] sm:$0xf0] }
  0xe7   : > { %v3756_v29 = vadd.f32 %v547_v14, %v3745_v55  ;;  %v3767_v14 = vor.u32 %v2850_v58, %v2605_v51  ;;  %v3769_v7 = vor.u32 %v2848_v1, %v2607_v17  ;;  %v3772_v32 = vor.u32 %v2851_v12, %v2613_v20  ;;  %v2589_v51 = vld [vmem:[#allocation9 + $0x80] sm:$0xf]  ;;  %v2846_v58 = vld [vmem:[#allocation9 + $0x8c] sm:$0xf0]  ;;  %v2844_v1 = vld [vmem:[#allocation9 + $0x84] sm:$0xf] }
  0xe8   : > { %4530 = vst [vmem:[#allocation44_spill] sm:$0xff] %v3751_v8  ;;  %1197 = vmatpush.bf16.msrb.mxu3 %v3763_v56  ;;  %v3774_v46 = vor.u32 %v2849_v28, %v2615_v39  ;;  %v3780_v27 = vor.u32 %v2846_v58, %v2589_v51  ;;  %v2591_v20 = vld [vmem:[#allocation9 + $0x90] sm:$0xf0]  ;;  %v2597_v12 = vld [vmem:[#allocation9 + $0x88] sm:$0xf] }
  0xe9   : > { %4531 = vst [vmem:[#allocation45_spill] sm:$0xff] %v3756_v29  ;;  %1159 = vmatpush.bf16.msrb.mxu0 %v3767_v14  ;;  %1172 = vmatpush.bf16.msrb.mxu1 %v3769_v7  ;;  %v2847_v28 = vld [vmem:[#allocation9 + $0x94] sm:$0xf0]  ;;  %v3785_v19 = vor.u32 %v2844_v1, %v2591_v20  ;;  %v2842_v58 = vld [vmem:[#allocation9 + $0x6c] sm:$0xf0] }
  0xea   : > { %4532 = vst [vmem:[#allocation46_spill] sm:$0xff] %v3763_v56  ;;  %1185 = vmatpush.bf16.msrb.mxu2 %v3772_v32  ;;  %v2575_v20 = vld [vmem:[#allocation9 + $0x70] sm:$0xf0]  ;;  %v2837_v56 = vld [vmem:[#allocation9 + $0x4c] sm:$0xf] }
  0xeb   : > { %4533 = vst [vmem:[#allocation47_spill] sm:$0xff] %v3767_v14  ;;  %v2599_v14 = vld [vmem:[#allocation9 + $0x98] sm:$0xf0] }
  0xec   : > { %4534 = vst [vmem:[#allocation48_spill] sm:$0xff] %v3769_v7  ;;  %1198 = vmatpush.bf16.msrb.mxu3 %v3774_v46  ;;  %v3787_v7 = vor.u32 %v2847_v28, %v2597_v12  ;;  %v2581_v12 = vld [vmem:[#allocation9 + $0x68] sm:$0xf]  ;;  %v2843_v28 = vld [vmem:[#allocation9 + $0x74] sm:$0xf0] }
  0xed   : > { %4535 = vst [vmem:[#allocation49_spill] sm:$0xff] %v3772_v32  ;;  %v536_v29 = vpop.f32.mrf.mxu2  ;;  %v570_v8 = vpop.f32.mrf.mxu0  ;;  %v2845_v32 = vld [vmem:[#allocation9 + $0x8c] sm:$0xf]  ;;  %1160 = vmatpush.bf16.msrb.mxu0 %v3780_v27  ;;  %1173 = vmatpush.bf16.msrb.mxu1 %v3785_v19 }
  0xee   : > { %4536 = vst [vmem:[#allocation50_spill] sm:$0xff] %v3774_v46  ;;  %v549_v17 = vpop.f32.mrf.mxu3  ;;  %v3783_v39 = vadd.f32 %v570_v8, %v3724_v13  ;;  %v583_v29 = vpop.f32.mrf.mxu1  ;;  %v3793_v51 = vor.u32 %v2845_v32, %v2599_v14  ;;  %1186 = vmatpush.bf16.msrb.mxu2 %v3787_v7  ;;  %v2573_v8 = vld [vmem:[#allocation9 + $0x60] sm:$0xf]  ;;  %v2841_v14 = vld [vmem:[#allocation9 + $0x6c] sm:$0xf] }
  0xef   : > { %4537 = vst [vmem:[#allocation51_spill] sm:$0xff] %v3780_v27  ;;  %v3790_v17 = vadd.f32 %v583_v29, %v3726_v16  ;;  %v3798_v1 = vor.u32 %v2842_v58, %v2573_v8  ;;  %v2583_v32 = vld [vmem:[#allocation9 + $0x78] sm:$0xf0]  ;;  %v2557_v8 = vld [vmem:[#allocation9 + $0x40] sm:$0xf] }
  0xf0   : > { %4538 = vst [vmem:[#allocation52_spill] sm:$0xff] %v3783_v39  ;;  %v2840_v39 = vld [vmem:[#allocation9 + $0x64] sm:$0xf]  ;;  %1199 = vmatpush.bf16.msrb.mxu3 %v3793_v51  ;;  %v2838_v58 = vld [vmem:[#allocation9 + $0x4c] sm:$0xf0] }
  0xf1   : > { %4539 = vst [vmem:[#allocation53_spill] sm:$0xff] %v3785_v19  ;;  %v3800_v29 = vor.u32 %v2840_v39, %v2575_v20  ;;  %1161 = vmatpush.bf16.msrb.mxu0 %v3798_v1  ;;  %v3805_v19 = vor.u32 %v2841_v14, %v2583_v32  ;;  %v2565_v14 = vld [vmem:[#allocation9 + $0x48] sm:$0xf]  ;;  %v2839_v32 = vld [vmem:[#allocation9 + $0x54] sm:$0xf0] }
  0xf2   : > { %4540 = vst [vmem:[#allocation54_spill] sm:$0xff] %v3787_v7  ;;  %v3820_v46 = vor.u32 %v2839_v32, %v2565_v14 }
  0xf3   : > { %4541 = vst [vmem:[#allocation55_spill] sm:$0xff] %v3790_v17  ;;  %v3802_v17 = vor.u32 %v2843_v28, %v2581_v12  ;;  %1174 = vmatpush.bf16.msrb.mxu1 %v3800_v29  ;;  %v3813_v12 = vor.u32 %v2838_v58, %v2557_v8  ;;  %v2559_v28 = vld [vmem:[#allocation9 + $0x50] sm:$0xf0]  ;;  %v2541_v8 = vld [vmem:[#allocation9 + $0x20] sm:$0xf] }
  0xf4   : > { %4542 = vst [vmem:[#allocation56_spill] sm:$0xff] %v3793_v51  ;;  %v2836_v51 = vld [vmem:[#allocation9 + $0x44] sm:$0xf]  ;;  %1200 = vmatpush.bf16.msrb.mxu3 %v3805_v19  ;;  %v2834_v58 = vld [vmem:[#allocation9 + $0x2c] sm:$0xf0] }
  0xf5   : > { %4543 = vst [vmem:[#allocation57_spill] sm:$0xff] %v3798_v1  ;;  %v596_v7 = vpop.f32.mrf.mxu2  ;;  %1187 = vmatpush.bf16.msrb.mxu2 %v3802_v17  ;;  %v572_v20 = vpop.f32.mrf.mxu0  ;;  %1162 = vmatpush.bf16.msrb.mxu0 %v3813_v12 }
  0xf6   : > { %4544 = vst [vmem:[#allocation58_spill] sm:$0xff] %v3800_v29  ;;  %v3810_v27 = vadd.f32 %v596_v7, %v3743_v53  ;;  %v609_v39 = vpop.f32.mrf.mxu3  ;;  %v585_v29 = vpop.f32.mrf.mxu1  ;;  %v2567_v7 = vld [vmem:[#allocation9 + $0x58] sm:$0xf0] }
  0xf7   : > { %4545 = vst [vmem:[#allocation59_spill] sm:$0xff] %v3802_v17  ;;  %v3816_v1 = vadd.f32 %v609_v39, %v3745_v55  ;;  %v3818_v17 = vor.u32 %v2836_v51, %v2559_v28  ;;  %v3823_v20 = vor.u32 %v2837_v56, %v2567_v7  ;;  %v3828_v29 = vor.u32 %v2834_v58, %v2541_v8  ;;  %v2543_v51 = vld [vmem:[#allocation9 + $0x30] sm:$0xf0]  ;;  %v2549_v39 = vld [vmem:[#allocation9 + $0x28] sm:$0xf] }
  0xf8   : > { %4546 = vst [vmem:[#allocation60_spill] sm:$0xff] %v3810_v27  ;;  %v2832_v27 = vld [vmem:[#allocation9 + $0x24] sm:$0xf]  ;;  %v2835_v28 = vld [vmem:[#allocation9 + $0x34] sm:$0xf0] }
  0xf9   : > { %4547 = vst [vmem:[#allocation61_spill] sm:$0xff] %v3813_v12  ;;  %1175 = vmatpush.bf16.msrb.mxu1 %v3818_v17  ;;  %1188 = vmatpush.bf16.msrb.mxu2 %v3820_v46  ;;  %v3830_v14 = vor.u32 %v2832_v27, %v2543_v51  ;;  %v3832_v32 = vor.u32 %v2835_v28, %v2549_v39  ;;  %v2833_v56 = vld [vmem:[#allocation9 + $0x2c] sm:$0xf]  ;;  %v2551_v7 = vld [vmem:[#allocation9 + $0x38] sm:$0xf0] }
  0xfa   : > { %4548 = vst [vmem:[#allocation62_spill] sm:$0xff] %v3816_v1  ;;  %1201 = vmatpush.bf16.msrb.mxu3 %v3823_v20  ;;  %1163 = vmatpush.bf16.msrb.mxu0 %v3828_v29  ;;  %v3835_v1 = vor.u32 %v2833_v56, %v2551_v7  ;;  %v2525_v8 = vld [vmem:[#allocation9] sm:$0xf]  ;;  %v2830_v58 = vld [vmem:[#allocation9 + $0xc] sm:$0xf0] }
  0xfb   : > { %4549 = vst [vmem:[#allocation63_spill] sm:$0xff] %v3818_v17  ;;  %v3840_v27 = vor.u32 %v2830_v58, %v2525_v8  ;;  %v2828_v51 = vld [vmem:[#allocation9 + $0x4] sm:$0xf]  ;;  %v2527_v39 = vld [vmem:[#allocation9 + $0x10] sm:$0xf0] }
  0xfc   : > { %4550 = vst [vmem:[#allocation64_spill] sm:$0xff] %v3820_v46  ;;  %v2533_v28 = vld [vmem:[#allocation9 + $0x8] sm:$0xf]  ;;  %v2831_v7 = vld [vmem:[#allocation9 + $0x14] sm:$0xf0] }
  0xfd   : > { %4551 = vst [vmem:[#allocation65_spill] sm:$0xff] %v3823_v20  ;;  %v598_v46 = vpop.f32.mrf.mxu2  ;;  %1176 = vmatpush.bf16.msrb.mxu1 %v3830_v14  ;;  %1189 = vmatpush.bf16.msrb.mxu2 %v3832_v32  ;;  %v632_v17 = vpop.f32.mrf.mxu0 }
  0xfe   : > { %4552 = vst [vmem:[#allocation66_spill] sm:$0xff] %v3828_v29  ;;  %v611_v20 = vpop.f32.mrf.mxu3  ;;  %1202 = vmatpush.bf16.msrb.mxu3 %v3835_v1  ;;  %v3843_v29 = vadd.f32 %v632_v17, %v3724_v13  ;;  %v645_v56 = vpop.f32.mrf.mxu1  ;;  %v3845_v46 = vor.u32 %v2828_v51, %v2527_v39  ;;  %1164 = vmatpush.bf16.msrb.mxu0 %v3840_v27 }
  0xff   : > { %4553 = vst [vmem:[#allocation67_spill] sm:$0xff] %v3830_v14  ;;  %v2829_v14 = vld [vmem:[#allocation9 + $0xc] sm:$0xf]  ;;  %v3848_v12 = vadd.f32 %v645_v56, %v3726_v16  ;;  %v3851_v20 = vor.u32 %v2831_v7, %v2533_v28  ;;  %v448_v56 = vadd.f32 %v3716_v3, %v3724_v13  ;;  %v474_v3 = vadd.f32 %v3720_v5, %v3743_v53 }
 0x100   : > { %4554 = vst [vmem:[#allocation68_spill] sm:$0xff] %v3832_v32  ;;  %v2535_v32 = vld [vmem:[#allocation9 + $0x18] sm:$0xf0] }
 0x101   : > { %4555 = vst [vmem:[#allocation69_spill] sm:$0xff] %v3843_v29  ;;  %v3853_v8 = vor.u32 %v2829_v14, %v2535_v32  ;;  %1177 = vmatpush.bf16.msrb.mxu1 %v3845_v46  ;;  %1190 = vmatpush.bf16.msrb.mxu2 %v3851_v20 }
 0x102   : > { %4556 = vst [vmem:[#allocation70_spill] sm:$0xff] %v3848_v12  ;;  %1217 = vmatpush.bf16.msra.mxu0 %v3611_v24 }
 0x103   : > { %1203 = vmatpush.bf16.msrb.mxu3 %v3853_v8 }
 0x104   : > { %v4574_v12 = vld [vmem:[#allocation65_spill] sm:$0xff] }
 0x105   : > { %1230 = vmatpush.bf16.msra.mxu1 %v3613_v25  ;;  %1243 = vmatpush.bf16.msra.mxu2 %v3615_v26  ;;  %v658_v17 = vpop.f32.mrf.mxu2  ;;  %v634_v58 = vpop.f32.mrf.mxu0  ;;  %v4575_v29 = vld [vmem:[#allocation66_spill] sm:$0xff] }
 0x106   : > { %1218 = vmatpush.bf16.msra.mxu0 %v3624_v36  ;;  %v3864_v14 = vadd.f32 %v658_v17, %v3743_v53  ;;  %v671_v32 = vpop.f32.mrf.mxu3  ;;  %v647_v39 = vpop.f32.mrf.mxu1  ;;  %v461_v17 = vadd.f32 %v3718_v4, %v3726_v16  ;;  %v487_v4 = vadd.f32 %v3722_v6, %v3745_v55 }
 0x107   : > { %1256 = vmatpush.bf16.msra.mxu3 %v3618_v30  ;;  %v3867_v51 = vadd.f32 %v671_v32, %v3745_v55 }
 0x108   : > { %4557 = vst [vmem:[#allocation71_spill] sm:$0xff] %v3864_v14 }
 0x109   : > { %4558 = vst [vmem:[#allocation72_spill] sm:$0xff] %v3867_v51  ;;  %1231 = vmatpush.bf16.msra.mxu1 %v3628_v37  ;;  %1244 = vmatpush.bf16.msra.mxu2 %v3630_v38 }
 0x10a   : > { %1219 = vmatpush.bf16.msra.mxu0 %v3636_v48 }
 0x10b   : > { %1257 = vmatpush.bf16.msra.mxu3 %v3633_v42 }
 0x10d   : > { %1232 = vmatpush.bf16.msra.mxu1 %v3640_v49  ;;  %1245 = vmatpush.bf16.msra.mxu2 %v3642_v50  ;;  %v660_v28 = vpop.f32.mrf.mxu2  ;;  %v931_v32 = vpop.f32.mrf.mxu0 }
 0x10e   : > { %1220 = vmatpush.bf16.msra.mxu0 %v3648_v60  ;;  %v673_v7 = vpop.f32.mrf.mxu3  ;;  %v974_v58 = vadd.f32 %v931_v32, %v448_v56  ;;  %v944_v39 = vpop.f32.mrf.mxu1 }
 0x10f   : > { %1258 = vmatpush.bf16.msra.mxu3 %v3645_v54  ;;  %v975_v51 = vadd.f32 %v944_v39, %v461_v17 }
 0x110   : > { %v978_v28 = vmul.f32 0.5, %v974_v58  ;;  %v756_v58 = vld [vmem:[#allocation15] sm:$0xff] }
 0x111   : > { %1233 = vmatpush.bf16.msra.mxu1 %v3652_v61  ;;  %1246 = vmatpush.bf16.msra.mxu2 %v3654_v62  ;;  %v979_v14 = vmul.f32 0.5, %v975_v51 }
 0x112   : > { %1221 = vmatpush.bf16.msra.mxu0 %v3661_v9  ;;  %3017 = vtanh.f32 %v978_v28 }
 0x113   : > { %1259 = vmatpush.bf16.msra.mxu3 %v3657_v2  ;;  %3019 = vtanh.f32 %v979_v14 }
 0x115   : > { %1234 = vmatpush.bf16.msra.mxu1 %v3665_v10  ;;  %1247 = vmatpush.bf16.msra.mxu2 %v3667_v11  ;;  %v957_v13 = vpop.f32.mrf.mxu2  ;;  %v933_v51 = vpop.f32.mrf.mxu0 }
 0x116   : > { %1222 = vmatpush.bf16.msra.mxu0 %v3677_v21  ;;  %v976_v16 = vadd.f32 %v957_v13, %v474_v3  ;;  %v970_v56 = vpop.f32.mrf.mxu3  ;;  %v946_v17 = vpop.f32.mrf.mxu1 }
 0x117   : > { %1260 = vmatpush.bf16.msra.mxu3 %v3671_v15  ;;  %v977_v7 = vadd.f32 %v970_v56, %v487_v4 }
 0x118   : > { %v980_v32 = vmul.f32 0.5, %v976_v16  ;;  %v3018_v5 = vpop.eup %3017 }
 0x119   : > { %1235 = vmatpush.bf16.msra.mxu1 %v3681_v22  ;;  %1248 = vmatpush.bf16.msra.mxu2 %v3683_v23  ;;  %3021 = vtanh.f32 %v977_v7  ;;  %v3020_v53 = vpop.eup %3019  ;;  %v984_v14 = vmul.f32 0.5, %v3018_v5 }
 0x11a   : > { %1223 = vmatpush.bf16.msra.mxu0 %v3689_v40  ;;  %v985_v6 = vmul.f32 0.5, %v3020_v53  ;;  %3023 = vtanh.f32 %v980_v32 }
 0x11b   : > { %1261 = vmatpush.bf16.msra.mxu3 %v3686_v31  ;;  %v987_v55 = vadd.f32 0.5, %v984_v14  ;;  %v4559_v14 = vld [vmem:[#allocation46_spill] sm:$0xff] }
 0x11c   : > { %v988_v39 = vadd.f32 0.5, %v985_v6  ;;  %v4560_v6 = vld [vmem:[#allocation47_spill] sm:$0xff] }
 0x11d   : > { %1236 = vmatpush.bf16.msra.mxu1 %v3693_v41  ;;  %1249 = vmatpush.bf16.msra.mxu2 %v3695_v43  ;;  %v959_v28 = vpop.f32.mrf.mxu2 }
 0x11e   : > { %1224 = vmatpush.bf16.msra.mxu0 %v3701_v57  ;;  %v972_v3 = vpop.f32.mrf.mxu3  ;;  %v991_v13 = vmul.f32 %v988_v39, %v756_v58  ;;  %v4562_v58 = vld [vmem:[#allocation49_spill] sm:$0xff]  ;;  %v4563_v39 = vld [vmem:[#allocation50_spill] sm:$0xff]  ;;  %v4564_v28 = vld [vmem:[#allocation51_spill] sm:$0xff] }
 0x11f   : > { %1262 = vmatpush.bf16.msra.mxu3 %v3698_v47  ;;  %v3022_v4 = vpop.eup %3021  ;;  %v4565_v3 = vld [vmem:[#allocation53_spill] sm:$0xff] }
 0x120   : > { %v992_v16 = vmul.f32 %v3022_v4, %v987_v55  ;;  %v3024_v56 = vpop.eup %3023  ;;  %v4561_v55 = vld [vmem:[#allocation48_spill] sm:$0xff]  ;;  %v4566_v4 = vld [vmem:[#allocation54_spill] sm:$0xff] }
 0x121   : > { %1237 = vmatpush.bf16.msra.mxu1 %v3705_v59  ;;  %1250 = vmatpush.bf16.msra.mxu2 %v3707_v63  ;;  %v986_v7 = vmul.f32 0.5, %v3024_v56  ;;  %v4569_v56 = vld [vmem:[#allocation58_spill] sm:$0xff] }
 0x122   : > { %v3904_v51 = vadd.f32 %v992_v16, %v991_v13  ;;  %v4567_v13 = vld [vmem:[#allocation56_spill] sm:$0xff]  ;;  %v4568_v16 = vld [vmem:[#allocation57_spill] sm:$0xff] }
 0x123   : > { %1263 = vmatpush.bf16.msra.mxu3 %v3710_v0  ;;  %v989_v17 = vadd.f32 0.5, %v986_v7  ;;  %v4570_v7 = vld [vmem:[#allocation59_spill] sm:$0xff] }
 0x124   : > { %3025 = vtanh.f32 %v3904_v51 }
 0x12a   : > { %v3026_v32 = vpop.eup %3025 }
 0x12b   : > { %v995_v5 = vmul.f32 %v3026_v32, %v989_v17  ;;  %v4571_v17 = vld [vmem:[#allocation61_spill] sm:$0xff]  ;;  %v4572_v32 = vld [vmem:[#allocation63_spill] sm:$0xff] }
 0x12d   : > { %v996_v53 = vpack.c.bf16 %v995_v5, %v995_v5  ;;  %v4573_v5 = vld [vmem:[#allocation64_spill] sm:$0xff] }
 0x12f   : > { %1165 = vmatmul.bf16.vlgmr.msrb.gmra.mxu0 %v996_v53  ;;  %1178 = vmatmul.bf16.vlgmr.msrb.gmra.mxu1 %v996_v53 }
 0x130   : > { %1191 = vmatmul.bf16.vlgmr.msrb.gmra.mxu2 %v996_v53  ;;  %1204 = vmatmul.bf16.vlgmr.msrb.gmra.mxu3 %v996_v53 }
 0x131   : > { %1292 = vmatpush.bf16.msrb.mxu0 %v3734_v33  ;;  %1305 = vmatpush.bf16.msrb.mxu1 %v3736_v44 }
 0x132   : > { %1318 = vmatpush.bf16.msrb.mxu2 %v3738_v45  ;;  %1331 = vmatpush.bf16.msrb.mxu3 %v3741_v52 }
 0x135   : > { %1293 = vmatpush.bf16.msrb.mxu0 %v3753_v18  ;;  %1306 = vmatpush.bf16.msrb.mxu1 %v3758_v34 }
 0x136   : > { %1319 = vmatpush.bf16.msrb.mxu2 %v3760_v35  ;;  %1332 = vmatpush.bf16.msrb.mxu3 %v4559_v14 }
 0x139   : > { %1294 = vmatpush.bf16.msrb.mxu0 %v4560_v6  ;;  %1307 = vmatpush.bf16.msrb.mxu1 %v4561_v55 }
 0x13a   : > { %1320 = vmatpush.bf16.msrb.mxu2 %v4562_v58  ;;  %1333 = vmatpush.bf16.msrb.mxu3 %v4563_v39 }
 0x13d   : > { %1295 = vmatpush.bf16.msrb.mxu0 %v4564_v28  ;;  %1308 = vmatpush.bf16.msrb.mxu1 %v4565_v3 }
 0x13e   : > { %1321 = vmatpush.bf16.msrb.mxu2 %v4566_v4  ;;  %1334 = vmatpush.bf16.msrb.mxu3 %v4567_v13  ;;  %v4576_v13 = vld [vmem:[#allocation67_spill] sm:$0xff] }
 0x13f   : > { %1225 = vmatmul.bf16.vlgmr.msra.gmra.mxu0 %v996_v53  ;;  %1238 = vmatmul.bf16.vlgmr.msra.gmra.mxu1 %v996_v53 }
 0x140   : > { %1251 = vmatmul.bf16.vlgmr.msra.gmra.mxu2 %v996_v53  ;;  %1264 = vmatmul.bf16.vlgmr.msra.gmra.mxu3 %v996_v53  ;;  %v4577_v53 = vld [vmem:[#allocation68_spill] sm:$0xff] }
 0x141   : > { %1296 = vmatpush.bf16.msrb.mxu0 %v4568_v16  ;;  %1309 = vmatpush.bf16.msrb.mxu1 %v4569_v56 }
 0x142   : > { %1322 = vmatpush.bf16.msrb.mxu2 %v4570_v7  ;;  %1335 = vmatpush.bf16.msrb.mxu3 %v3805_v19 }
 0x145   : > { %1297 = vmatpush.bf16.msrb.mxu0 %v4571_v17  ;;  %1310 = vmatpush.bf16.msrb.mxu1 %v4572_v32 }
 0x146   : > { %1323 = vmatpush.bf16.msrb.mxu2 %v4573_v5  ;;  %1336 = vmatpush.bf16.msrb.mxu3 %v4574_v12 }
 0x149   : > { %1298 = vmatpush.bf16.msrb.mxu0 %v4575_v29  ;;  %1311 = vmatpush.bf16.msrb.mxu1 %v4576_v13 }
 0x14a   : > { %1324 = vmatpush.bf16.msrb.mxu2 %v4577_v53  ;;  %1337 = vmatpush.bf16.msrb.mxu3 %v3835_v1 }
 0x14d   : > { %1299 = vmatpush.bf16.msrb.mxu0 %v3840_v27  ;;  %1312 = vmatpush.bf16.msrb.mxu1 %v3845_v46 }
 0x14e   : > { %1325 = vmatpush.bf16.msrb.mxu2 %v3851_v20  ;;  %1338 = vmatpush.bf16.msrb.mxu3 %v3853_v8 }
 0x151   : > { %1352 = vmatpush.bf16.msra.mxu0 %v3611_v24  ;;  %1365 = vmatpush.bf16.msra.mxu1 %v3613_v25 }
 0x152   : > { %1378 = vmatpush.bf16.msra.mxu2 %v3615_v26  ;;  %1391 = vmatpush.bf16.msra.mxu3 %v3618_v30 }
 0x155   : > { %1353 = vmatpush.bf16.msra.mxu0 %v3624_v36  ;;  %1366 = vmatpush.bf16.msra.mxu1 %v3628_v37 }
 0x156   : > { %1379 = vmatpush.bf16.msra.mxu2 %v3630_v38  ;;  %1392 = vmatpush.bf16.msra.mxu3 %v3633_v42 }
 0x159   : > { %1354 = vmatpush.bf16.msra.mxu0 %v3636_v48  ;;  %1367 = vmatpush.bf16.msra.mxu1 %v3640_v49 }
 0x15a   : > { %1380 = vmatpush.bf16.msra.mxu2 %v3642_v50  ;;  %1393 = vmatpush.bf16.msra.mxu3 %v3645_v54 }
 0x15d   : > { %1355 = vmatpush.bf16.msra.mxu0 %v3648_v60  ;;  %1368 = vmatpush.bf16.msra.mxu1 %v3652_v61 }
 0x15e   : > { %1381 = vmatpush.bf16.msra.mxu2 %v3654_v62  ;;  %1394 = vmatpush.bf16.msra.mxu3 %v3657_v2  ;;  %v4584_v2 = vld [vmem:[#allocation44_spill] sm:$0xff]  ;;  %v4585_v62 = vld [vmem:[#allocation45_spill] sm:$0xff] }
 0x161   : > { %1356 = vmatpush.bf16.msra.mxu0 %v3661_v9  ;;  %1369 = vmatpush.bf16.msra.mxu1 %v3665_v10  ;;  %v4583_v10 = vld [vmem:[#allocation43_spill] sm:$0xff] }
 0x162   : > { %1382 = vmatpush.bf16.msra.mxu2 %v3667_v11  ;;  %1395 = vmatpush.bf16.msra.mxu3 %v3671_v15  ;;  %v4582_v11 = vld [vmem:[#allocation42_spill] sm:$0xff] }
 0x165   : > { %1357 = vmatpush.bf16.msra.mxu0 %v3677_v21  ;;  %1370 = vmatpush.bf16.msra.mxu1 %v3681_v22 }
 0x166   : > { %1383 = vmatpush.bf16.msra.mxu2 %v3683_v23  ;;  %1396 = vmatpush.bf16.msra.mxu3 %v3686_v31 }
 0x169   : > { %1358 = vmatpush.bf16.msra.mxu0 %v3689_v40  ;;  %1371 = vmatpush.bf16.msra.mxu1 %v3693_v41 }
 0x16a   : > { %1384 = vmatpush.bf16.msra.mxu2 %v3695_v43  ;;  %1397 = vmatpush.bf16.msra.mxu3 %v3698_v47 }
 0x16d   : > { %1359 = vmatpush.bf16.msra.mxu0 %v3701_v57  ;;  %1372 = vmatpush.bf16.msra.mxu1 %v3705_v59 }
 0x16e   : > { %1385 = vmatpush.bf16.msra.mxu2 %v3707_v63  ;;  %1398 = vmatpush.bf16.msra.mxu3 %v3710_v0 }
 0x1ac   : > { %v3971_v22 = vpop.f32.mrf.mxu0  ;;  %v3973_v23 = vpop.f32.mrf.mxu1 }
 0x1ad   : > { %4578 = vst [vmem:[#allocation46_spill] sm:$0xff] %v3971_v22 }
 0x1ae   : > { %4579 = vst [vmem:[#allocation47_spill] sm:$0xff] %v3973_v23 }
 0x1b3   : > { %v3975_v31 = vpop.f32.mrf.mxu2  ;;  %v3977_v40 = vpop.f32.mrf.mxu3 }
 0x1b4   : > { %4580 = vst [vmem:[#allocation48_spill] sm:$0xff] %v3975_v31  ;;  %v1168_v41 = vpop.f32.mrf.mxu0  ;;  %v1181_v43 = vpop.f32.mrf.mxu1 }
 0x1b5   : > { %4581 = vst [vmem:[#allocation49_spill] sm:$0xff] %v3977_v40 }
 0x1bb   : > { %v1194_v21 = vpop.f32.mrf.mxu2  ;;  %v1207_v47 = vpop.f32.mrf.mxu3 }
 0x1bc   : > { %v1226_v15 = vpop.f32.mrf.mxu0  ;;  %v1239_v57 = vpop.f32.mrf.mxu1 }
 0x1bd   : > { %v1269_v59 = vadd.f32 %v1226_v15, %v4582_v11  ;;  %v1270_v63 = vadd.f32 %v1239_v57, %v4583_v10 }
 0x1bf   : > { %v1273_v9 = vmul.f32 0.5, %v1269_v59  ;;  %v1274_v0 = vmul.f32 0.5, %v1270_v63 }
 0x1c1   : > { %3027 = vtanh.f32 %v1273_v9 }
 0x1c2   : > { %3029 = vtanh.f32 %v1274_v0 }
 0x1c3   : > { %v1252_v22 = vpop.f32.mrf.mxu2  ;;  %v1265_v23 = vpop.f32.mrf.mxu3 }
 0x1c4   : > { %v1271_v31 = vadd.f32 %v1252_v22, %v4584_v2  ;;  %v1272_v40 = vadd.f32 %v1265_v23, %v4585_v62  ;;  %v1228_v41 = vpop.f32.mrf.mxu0  ;;  %v1241_v43 = vpop.f32.mrf.mxu1 }
 0x1c5   : > { %v4601_v43 = vld [vmem:[#allocation36_spill] sm:$0xff] }
 0x1c6   : > { %v1275_v21 = vmul.f32 0.5, %v1271_v31  ;;  %3031 = vtanh.f32 %v1272_v40 }
 0x1c7   : > { %v3028_v47 = vpop.eup %3027 }
 0x1c8   : > { %v3030_v61 = vpop.eup %3029  ;;  %v1279_v60 = vmul.f32 0.5, %v3028_v47  ;;  %3033 = vtanh.f32 %v1275_v21  ;;  %v4602_v21 = vld [vmem:[#allocation37_spill] sm:$0xff]  ;;  %v4603_v47 = vld [vmem:[#allocation38_spill] sm:$0xff] }
 0x1c9   : > { %v1280_v11 = vmul.f32 0.5, %v3030_v61  ;;  %v4599_v61 = vld [vmem:[#allocation34_spill] sm:$0xff] }
 0x1ca   : > { %v1282_v10 = vadd.f32 0.5, %v1279_v60  ;;  %v4586_v60 = vld [vmem:[#allocation56_spill] sm:$0xff] }
 0x1cb   : > { %v1283_v15 = vadd.f32 0.5, %v1280_v11  ;;  %v1254_v57 = vpop.f32.mrf.mxu2  ;;  %v1267_v9 = vpop.f32.mrf.mxu3  ;;  %v4604_v11 = vld [vmem:[#allocation39_spill] sm:$0xff] }
 0x1cc   : > { %v3032_v59 = vpop.eup %3031 }
 0x1cd   : > { %v1286_v63 = vmul.f32 %v1283_v15, %v3904_v51  ;;  %v1287_v0 = vmul.f32 %v3032_v59, %v1282_v10  ;;  %v4600_v51 = vld [vmem:[#allocation35_spill] sm:$0xff]  ;;  %v4605_v10 = vld [vmem:[#allocation40_spill] sm:$0xff]  ;;  %v4606_v15 = vld [vmem:[#allocation41_spill] sm:$0xff] }
 0x1ce   : > { %v3034_v2 = vpop.eup %3033 }
 0x1cf   : > { %v3984_v22 = vadd.f32 %v1287_v0, %v1286_v63  ;;  %v1281_v62 = vmul.f32 0.5, %v3034_v2 }
 0x1d1   : > { %3035 = vtanh.f32 %v3984_v22  ;;  %v1284_v23 = vadd.f32 0.5, %v1281_v62 }
 0x1d7   : > { %v3036_v31 = vpop.eup %3035 }
 0x1d8   : > { %v1290_v40 = vmul.f32 %v3036_v31, %v1284_v23 }
 0x1da   : > { %v1291_v41 = vpack.c.bf16 %v1290_v40, %v1290_v40 }
 0x1dc   : > { %1300 = vmatmul.bf16.vlgmr.msrb.gmra.mxu0 %v1291_v41  ;;  %1313 = vmatmul.bf16.vlgmr.msrb.gmra.mxu1 %v1291_v41 }
 0x1dd   : > { %1326 = vmatmul.bf16.vlgmr.msrb.gmra.mxu2 %v1291_v41  ;;  %1339 = vmatmul.bf16.vlgmr.msrb.gmra.mxu3 %v1291_v41 }
 0x1de   : > { %1427 = vmatpush.bf16.msrb.mxu0 %v3734_v33  ;;  %1440 = vmatpush.bf16.msrb.mxu1 %v3736_v44 }
 0x1df   : > { %1453 = vmatpush.bf16.msrb.mxu2 %v3738_v45  ;;  %1466 = vmatpush.bf16.msrb.mxu3 %v3741_v52 }
 0x1e2   : > { %1428 = vmatpush.bf16.msrb.mxu0 %v3753_v18  ;;  %1441 = vmatpush.bf16.msrb.mxu1 %v3758_v34 }
 0x1e3   : > { %1454 = vmatpush.bf16.msrb.mxu2 %v3760_v35  ;;  %1467 = vmatpush.bf16.msrb.mxu3 %v4559_v14 }
 0x1e6   : > { %1429 = vmatpush.bf16.msrb.mxu0 %v4560_v6  ;;  %1442 = vmatpush.bf16.msrb.mxu1 %v4561_v55 }
 0x1e7   : > { %1455 = vmatpush.bf16.msrb.mxu2 %v4562_v58  ;;  %1468 = vmatpush.bf16.msrb.mxu3 %v4563_v39 }
 0x1ea   : > { %1430 = vmatpush.bf16.msrb.mxu0 %v4564_v28  ;;  %1443 = vmatpush.bf16.msrb.mxu1 %v4565_v3 }
 0x1eb   : > { %1456 = vmatpush.bf16.msrb.mxu2 %v4566_v4  ;;  %1469 = vmatpush.bf16.msrb.mxu3 %v4586_v60 }
 0x1ec   : > { %1360 = vmatmul.bf16.vlgmr.msra.gmra.mxu0 %v1291_v41  ;;  %1373 = vmatmul.bf16.vlgmr.msra.gmra.mxu1 %v1291_v41 }
 0x1ed   : > { %1386 = vmatmul.bf16.vlgmr.msra.gmra.mxu2 %v1291_v41  ;;  %1399 = vmatmul.bf16.vlgmr.msra.gmra.mxu3 %v1291_v41  ;;  %v4607_v41 = vld [vmem:[#allocation52_spill] sm:$0xff] }
 0x1ee   : > { %1431 = vmatpush.bf16.msrb.mxu0 %v4568_v16  ;;  %1444 = vmatpush.bf16.msrb.mxu1 %v4569_v56 }
 0x1ef   : > { %1457 = vmatpush.bf16.msrb.mxu2 %v4570_v7  ;;  %1470 = vmatpush.bf16.msrb.mxu3 %v3805_v19 }
 0x1f2   : > { %1432 = vmatpush.bf16.msrb.mxu0 %v4571_v17  ;;  %1445 = vmatpush.bf16.msrb.mxu1 %v4572_v32 }
 0x1f3   : > { %1458 = vmatpush.bf16.msrb.mxu2 %v4573_v5  ;;  %1471 = vmatpush.bf16.msrb.mxu3 %v4574_v12 }
 0x1f6   : > { %1433 = vmatpush.bf16.msrb.mxu0 %v4575_v29  ;;  %1446 = vmatpush.bf16.msrb.mxu1 %v4576_v13 }
 0x1f7   : > { %1459 = vmatpush.bf16.msrb.mxu2 %v4577_v53  ;;  %1472 = vmatpush.bf16.msrb.mxu3 %v3835_v1 }
 0x1fa   : > { %1434 = vmatpush.bf16.msrb.mxu0 %v3840_v27  ;;  %1447 = vmatpush.bf16.msrb.mxu1 %v3845_v46 }
 0x1fb   : > { %1460 = vmatpush.bf16.msrb.mxu2 %v3851_v20  ;;  %1473 = vmatpush.bf16.msrb.mxu3 %v3853_v8 }
 0x1fe   : > { %1487 = vmatpush.bf16.msra.mxu0 %v3611_v24  ;;  %1500 = vmatpush.bf16.msra.mxu1 %v3613_v25  ;;  %v4587_v24 = vld [vmem:[#allocation22_spill] sm:$0xff]  ;;  %v4588_v25 = vld [vmem:[#allocation23_spill] sm:$0xff] }
 0x1ff   : > { %1513 = vmatpush.bf16.msra.mxu2 %v3615_v26  ;;  %1526 = vmatpush.bf16.msra.mxu3 %v3618_v30  ;;  %v4589_v26 = vld [vmem:[#allocation24_spill] sm:$0xff]  ;;  %v4590_v30 = vld [vmem:[#allocation25_spill] sm:$0xff] }
 0x202   : > { %1488 = vmatpush.bf16.msra.mxu0 %v3624_v36  ;;  %1501 = vmatpush.bf16.msra.mxu1 %v3628_v37  ;;  %v4591_v36 = vld [vmem:[#allocation26_spill] sm:$0xff]  ;;  %v4592_v37 = vld [vmem:[#allocation27_spill] sm:$0xff] }
 0x203   : > { %1514 = vmatpush.bf16.msra.mxu2 %v3630_v38  ;;  %1527 = vmatpush.bf16.msra.mxu3 %v3633_v42  ;;  %v4593_v38 = vld [vmem:[#allocation28_spill] sm:$0xff]  ;;  %v4594_v42 = vld [vmem:[#allocation29_spill] sm:$0xff] }
 0x206   : > { %1489 = vmatpush.bf16.msra.mxu0 %v3636_v48  ;;  %1502 = vmatpush.bf16.msra.mxu1 %v3640_v49  ;;  %v4595_v48 = vld [vmem:[#allocation30_spill] sm:$0xff]  ;;  %v4596_v49 = vld [vmem:[#allocation31_spill] sm:$0xff] }
 0x207   : > { %1515 = vmatpush.bf16.msra.mxu2 %v3642_v50  ;;  %1528 = vmatpush.bf16.msra.mxu3 %v3645_v54  ;;  %v4597_v50 = vld [vmem:[#allocation32_spill] sm:$0xff]  ;;  %v4598_v54 = vld [vmem:[#allocation33_spill] sm:$0xff] }
 0x20a   : > { %1490 = vmatpush.bf16.msra.mxu0 %v4587_v24  ;;  %1503 = vmatpush.bf16.msra.mxu1 %v4588_v25  ;;  %v4608_v25 = vld [vmem:[#allocation55_spill] sm:$0xff] }
 0x20b   : > { %1516 = vmatpush.bf16.msra.mxu2 %v4589_v26  ;;  %1529 = vmatpush.bf16.msra.mxu3 %v4590_v30 }
 0x20e   : > { %1491 = vmatpush.bf16.msra.mxu0 %v4591_v36  ;;  %1504 = vmatpush.bf16.msra.mxu1 %v4592_v37 }
 0x20f   : > { %1517 = vmatpush.bf16.msra.mxu2 %v4593_v38  ;;  %1530 = vmatpush.bf16.msra.mxu3 %v4594_v42  ;;  %v4609_v42 = vld [vmem:[#allocation60_spill] sm:$0xff] }
 0x212   : > { %1492 = vmatpush.bf16.msra.mxu0 %v4595_v48  ;;  %1505 = vmatpush.bf16.msra.mxu1 %v4596_v49  ;;  %v4610_v49 = vld [vmem:[#allocation62_spill] sm:$0xff] }
 0x213   : > { %1518 = vmatpush.bf16.msra.mxu2 %v4597_v50  ;;  %1531 = vmatpush.bf16.msra.mxu3 %v4598_v54 }
 0x216   : > { %1493 = vmatpush.bf16.msra.mxu0 %v4599_v61  ;;  %1506 = vmatpush.bf16.msra.mxu1 %v4600_v51 }
 0x217   : > { %1519 = vmatpush.bf16.msra.mxu2 %v4601_v43  ;;  %1532 = vmatpush.bf16.msra.mxu3 %v4602_v21 }
 0x21a   : > { %1494 = vmatpush.bf16.msra.mxu0 %v4603_v47  ;;  %1507 = vmatpush.bf16.msra.mxu1 %v4604_v11 }
 0x21b   : > { %1520 = vmatpush.bf16.msra.mxu2 %v4605_v10  ;;  %1533 = vmatpush.bf16.msra.mxu3 %v4606_v15 }
 0x259   : > { %v4051_v57 = vpop.f32.mrf.mxu0  ;;  %v4053_v9 = vpop.f32.mrf.mxu1 }
 0x260   : > { %v4055_v59 = vpop.f32.mrf.mxu2  ;;  %v4057_v63 = vpop.f32.mrf.mxu3 }
 0x261   : > { %v1303_v0 = vpop.f32.mrf.mxu0  ;;  %v1316_v2 = vpop.f32.mrf.mxu1 }
 0x268   : > { %v1329_v62 = vpop.f32.mrf.mxu2  ;;  %v1342_v23 = vpop.f32.mrf.mxu3 }
 0x269   : > { %v1361_v31 = vpop.f32.mrf.mxu0  ;;  %v1374_v40 = vpop.f32.mrf.mxu1 }
 0x26a   : > { %v1404_v24 = vadd.f32 %v1361_v31, %v4607_v41  ;;  %v1405_v26 = vadd.f32 %v1374_v40, %v4608_v25 }
 0x26c   : > { %v1408_v30 = vmul.f32 0.5, %v1404_v24  ;;  %v1409_v36 = vmul.f32 0.5, %v1405_v26 }
 0x26e   : > { %3037 = vtanh.f32 %v1408_v30 }
 0x26f   : > { %3039 = vtanh.f32 %v1409_v36 }
 0x270   : > { %v1387_v37 = vpop.f32.mrf.mxu2  ;;  %v1400_v38 = vpop.f32.mrf.mxu3 }
 0x271   : > { %v1406_v48 = vadd.f32 %v1387_v37, %v4609_v42  ;;  %v1407_v50 = vadd.f32 %v1400_v38, %v4610_v49  ;;  %v1363_v54 = vpop.f32.mrf.mxu0  ;;  %v1376_v61 = vpop.f32.mrf.mxu1  ;;  %v2881_v49 = vld [vmem:[#allocation8 + $0x1ac] sm:$0xf] }
 0x272   : > { %v2717_v54 = vld [vmem:[#allocation8 + $0x180] sm:$0xf] }
 0x273   : > { %v1410_v51 = vmul.f32 0.5, %v1406_v48  ;;  %3041 = vtanh.f32 %v1407_v50  ;;  %v2743_v50 = vld [vmem:[#allocation8 + $0x1b8] sm:$0xf0] }
 0x274   : > { %v3038_v43 = vpop.eup %3037 }
 0x275   : > { %v3040_v21 = vpop.eup %3039  ;;  %v1414_v47 = vmul.f32 0.5, %v3038_v43  ;;  %3043 = vtanh.f32 %v1410_v51  ;;  %v4137_v43 = vor.u32 %v2881_v49, %v2743_v50  ;;  %v2693_v50 = vld [vmem:[#allocation8 + $0x148] sm:$0xf] }
 0x276   : > { %v1415_v11 = vmul.f32 0.5, %v3040_v21  ;;  %v2878_v21 = vld [vmem:[#allocation8 + $0x18c] sm:$0xf0] }
 0x277   : > { %v1417_v10 = vadd.f32 0.5, %v1414_v47  ;;  %v2876_v47 = vld [vmem:[#allocation8 + $0x184] sm:$0xf] }
 0x278   : > { %v1418_v15 = vadd.f32 0.5, %v1415_v11  ;;  %v1389_v0 = vpop.f32.mrf.mxu2  ;;  %v1402_v2 = vpop.f32.mrf.mxu3  ;;  %v2719_v11 = vld [vmem:[#allocation8 + $0x190] sm:$0xf0] }
 0x279   : > { %v3042_v62 = vpop.eup %3041  ;;  %v2879_v0 = vld [vmem:[#allocation8 + $0x194] sm:$0xf0]  ;;  %v2877_v2 = vld [vmem:[#allocation8 + $0x18c] sm:$0xf] }
 0x27a   : > { %v1421_v23 = vmul.f32 %v1418_v15, %v3984_v22  ;;  %v1422_v31 = vmul.f32 %v3042_v62, %v1417_v10  ;;  %v2741_v22 = vld [vmem:[#allocation8 + $0x1a8] sm:$0xf]  ;;  %v4140_v10 = vor.u32 %v2878_v21, %v2717_v54  ;;  %v4144_v62 = vor.u32 %v2876_v47, %v2719_v11  ;;  %v2871_v54 = vld [vmem:[#allocation8 + $0x154] sm:$0xf0]  ;;  %v2695_v21 = vld [vmem:[#allocation8 + $0x158] sm:$0xf0] }
 0x27b   : > { %v3044_v40 = vpop.eup %3043  ;;  %v2725_v15 = vld [vmem:[#allocation8 + $0x188] sm:$0xf]  ;;  %v2669_v47 = vld [vmem:[#allocation8 + $0x120] sm:$0xf] }
 0x27c   : > { %v4064_v41 = vadd.f32 %v1422_v31, %v1421_v23  ;;  %v1416_v24 = vmul.f32 0.5, %v3044_v40  ;;  %v4146_v23 = vor.u32 %v2879_v0, %v2725_v15  ;;  %v2727_v31 = vld [vmem:[#allocation8 + $0x198] sm:$0xf0]  ;;  %v2866_v15 = vld [vmem:[#allocation8 + $0x12c] sm:$0xf0] }
 0x27d   : > { %v4149_v40 = vor.u32 %v2877_v2, %v2727_v31  ;;  %v2864_v0 = vld [vmem:[#allocation8 + $0x124] sm:$0xf]  ;;  %v2671_v2 = vld [vmem:[#allocation8 + $0x130] sm:$0xf0]  ;;  %v4178_v31 = vor.u32 %v2866_v15, %v2669_v47 }
 0x27e   : > { %3045 = vtanh.f32 %v4064_v41  ;;  %v1419_v25 = vadd.f32 0.5, %v1416_v24 }
 0x284   : > { %v3046_v26 = vpop.eup %3045 }
 0x285   : > { %v1425_v30 = vmul.f32 %v3046_v26, %v1419_v25  ;;  %v2701_v26 = vld [vmem:[#allocation8 + $0x160] sm:$0xf] }
 0x287   : > { %v1426_v36 = vpack.c.bf16 %v1425_v30, %v1425_v30  ;;  %v2874_v30 = vld [vmem:[#allocation8 + $0x16c] sm:$0xf0] }
 0x289   : > { %1435 = vmatmul.bf16.vlgmr.msrb.gmra.mxu0 %v1426_v36  ;;  %1448 = vmatmul.bf16.vlgmr.msrb.gmra.mxu1 %v1426_v36 }
 0x28a   : > { %1461 = vmatmul.bf16.vlgmr.msrb.gmra.mxu2 %v1426_v36  ;;  %1474 = vmatmul.bf16.vlgmr.msrb.gmra.mxu3 %v1426_v36 }
 0x28b   : > { %1562 = vmatpush.bf16.msrb.mxu0 %v3734_v33  ;;  %1575 = vmatpush.bf16.msrb.mxu1 %v3736_v44  ;;  %v2890_v33 = vld [vmem:[#allocation8 + $0x1ec] sm:$0xf0]  ;;  %v2888_v44 = vld [vmem:[#allocation8 + $0x1e4] sm:$0xf] }
 0x28c   : > { %1588 = vmatpush.bf16.msrb.mxu2 %v3738_v45  ;;  %1601 = vmatpush.bf16.msrb.mxu3 %v3741_v52  ;;  %v2767_v52 = vld [vmem:[#allocation8 + $0x1f0] sm:$0xf0] }
 0x28f   : > { %1563 = vmatpush.bf16.msrb.mxu0 %v3753_v18  ;;  %1576 = vmatpush.bf16.msrb.mxu1 %v3758_v34  ;;  %v2773_v18 = vld [vmem:[#allocation8 + $0x1e8] sm:$0xf]  ;;  %v2891_v34 = vld [vmem:[#allocation8 + $0x1f4] sm:$0xf0] }
 0x290   : > { %1589 = vmatpush.bf16.msrb.mxu2 %v3760_v35  ;;  %1602 = vmatpush.bf16.msrb.mxu3 %v4559_v14  ;;  %v2886_v14 = vld [vmem:[#allocation8 + $0x1cc] sm:$0xf0] }
 0x293   : > { %1564 = vmatpush.bf16.msrb.mxu0 %v4560_v6  ;;  %1577 = vmatpush.bf16.msrb.mxu1 %v4561_v55  ;;  %v2884_v6 = vld [vmem:[#allocation8 + $0x1c4] sm:$0xf] }
 0x294   : > { %1590 = vmatpush.bf16.msrb.mxu2 %v4562_v58  ;;  %1603 = vmatpush.bf16.msrb.mxu3 %v4563_v39  ;;  %v2751_v58 = vld [vmem:[#allocation8 + $0x1d0] sm:$0xf0]  ;;  %v2757_v39 = vld [vmem:[#allocation8 + $0x1c8] sm:$0xf] }
 0x297   : > { %1565 = vmatpush.bf16.msrb.mxu0 %v4564_v28  ;;  %1578 = vmatpush.bf16.msrb.mxu1 %v4565_v3  ;;  %v2887_v28 = vld [vmem:[#allocation8 + $0x1d4] sm:$0xf0]  ;;  %v4117_v3 = vor.u32 %v2884_v6, %v2751_v58 }
 0x298   : > { %1591 = vmatpush.bf16.msrb.mxu2 %v4566_v4  ;;  %1604 = vmatpush.bf16.msrb.mxu3 %v4586_v60  ;;  %v4119_v4 = vor.u32 %v2887_v28, %v2757_v39  ;;  %v2883_v60 = vld [vmem:[#allocation8 + $0x1b4] sm:$0xf0]  ;;  %v2873_v39 = vld [vmem:[#allocation8 + $0x16c] sm:$0xf]  ;;  %v2711_v28 = vld [vmem:[#allocation8 + $0x178] sm:$0xf0] }
 0x299   : > { %1495 = vmatmul.bf16.vlgmr.msra.gmra.mxu0 %v1426_v36  ;;  %1508 = vmatmul.bf16.vlgmr.msra.gmra.mxu1 %v1426_v36  ;;  %v4135_v48 = vor.u32 %v2883_v60, %v2741_v22 }
 0x29a   : > { %1521 = vmatmul.bf16.vlgmr.msra.gmra.mxu2 %v1426_v36  ;;  %1534 = vmatmul.bf16.vlgmr.msra.gmra.mxu3 %v1426_v36  ;;  %v2872_v36 = vld [vmem:[#allocation8 + $0x164] sm:$0xf] }
 0x29b   : > { %1566 = vmatpush.bf16.msrb.mxu0 %v4568_v16  ;;  %1579 = vmatpush.bf16.msrb.mxu1 %v4569_v56  ;;  %v2759_v16 = vld [vmem:[#allocation8 + $0x1d8] sm:$0xf0] }
 0x29c   : > { %1592 = vmatpush.bf16.msrb.mxu2 %v4570_v7  ;;  %1605 = vmatpush.bf16.msrb.mxu3 %v3805_v19  ;;  %v2765_v19 = vld [vmem:[#allocation8 + $0x1e0] sm:$0xf] }
 0x29d   : > { %v4099_v45 = vor.u32 %v2890_v33, %v2765_v19  ;;  %v2733_v7 = vld [vmem:[#allocation8 + $0x1a0] sm:$0xf] }
 0x29f   : > { %1567 = vmatpush.bf16.msrb.mxu0 %v4571_v17  ;;  %1580 = vmatpush.bf16.msrb.mxu1 %v4572_v32  ;;  %v2882_v17 = vld [vmem:[#allocation8 + $0x1ac] sm:$0xf0]  ;;  %v2880_v32 = vld [vmem:[#allocation8 + $0x1a4] sm:$0xf] }
 0x2a0   : > { %1593 = vmatpush.bf16.msrb.mxu2 %v4573_v5  ;;  %1606 = vmatpush.bf16.msrb.mxu3 %v4574_v12  ;;  %v4126_v5 = vor.u32 %v2882_v17, %v2733_v7  ;;  %v2870_v7 = vld [vmem:[#allocation8 + $0x14c] sm:$0xf0]  ;;  %v2868_v17 = vld [vmem:[#allocation8 + $0x144] sm:$0xf] }
 0x2a3   : > { %1568 = vmatpush.bf16.msrb.mxu0 %v4575_v29  ;;  %1581 = vmatpush.bf16.msrb.mxu1 %v4576_v13  ;;  %v4107_v29 = vor.u32 %v2891_v34, %v2773_v18  ;;  %v2885_v13 = vld [vmem:[#allocation8 + $0x1cc] sm:$0xf]  ;;  %v2709_v18 = vld [vmem:[#allocation8 + $0x168] sm:$0xf]  ;;  %v2875_v34 = vld [vmem:[#allocation8 + $0x174] sm:$0xf0] }
 0x2a4   : > { %1594 = vmatpush.bf16.msrb.mxu2 %v4577_v53  ;;  %1607 = vmatpush.bf16.msrb.mxu3 %v3835_v1  ;;  %v4105_v1 = vor.u32 %v2888_v44, %v2767_v52  ;;  %v4122_v56 = vor.u32 %v2885_v13, %v2759_v16  ;;  %v2735_v53 = vld [vmem:[#allocation8 + $0x1b0] sm:$0xf0]  ;;  %v4155_v44 = vor.u32 %v2874_v30, %v2701_v26  ;;  %v2685_v13 = vld [vmem:[#allocation8 + $0x140] sm:$0xf]  ;;  %v2865_v26 = vld [vmem:[#allocation8 + $0x12c] sm:$0xf] }
 0x2a5   : > { %v4133_v42 = vor.u32 %v2880_v32, %v2735_v53  ;;  %v2703_v52 = vld [vmem:[#allocation8 + $0x170] sm:$0xf0]  ;;  %v4161_v58 = vor.u32 %v2875_v34, %v2709_v18  ;;  %v4164_v16 = vor.u32 %v2873_v39, %v2711_v28  ;;  %v4168_v60 = vor.u32 %v2870_v7, %v2685_v13  ;;  %v2653_v18 = vld [vmem:[#allocation8 + $0x100] sm:$0xf]  ;;  %v2862_v34 = vld [vmem:[#allocation8 + $0x10c] sm:$0xf0] }
 0x2a6   : > { %v4159_v6 = vor.u32 %v2872_v36, %v2703_v52  ;;  %v2687_v32 = vld [vmem:[#allocation8 + $0x150] sm:$0xf0]  ;;  %v2679_v52 = vld [vmem:[#allocation8 + $0x138] sm:$0xf0]  ;;  %v2860_v7 = vld [vmem:[#allocation8 + $0x104] sm:$0xf] }
 0x2a7   : > { %1569 = vmatpush.bf16.msrb.mxu0 %v3840_v27  ;;  %1582 = vmatpush.bf16.msrb.mxu1 %v3845_v46  ;;  %v2889_v27 = vld [vmem:[#allocation8 + $0x1ec] sm:$0xf]  ;;  %v2775_v46 = vld [vmem:[#allocation8 + $0x1f8] sm:$0xf0]  ;;  %v4170_v49 = vor.u32 %v2868_v17, %v2687_v32  ;;  %v4189_v13 = vor.u32 %v2865_v26, %v2679_v52  ;;  %v2655_v17 = vld [vmem:[#allocation8 + $0x110] sm:$0xf0] }
 0x2a8   : > { %1595 = vmatpush.bf16.msrb.mxu2 %v3851_v20  ;;  %1608 = vmatpush.bf16.msrb.mxu3 %v3853_v8  ;;  %v4110_v20 = vor.u32 %v2889_v27, %v2775_v46  ;;  %v2749_v8 = vld [vmem:[#allocation8 + $0x1c0] sm:$0xf]  ;;  %v2661_v32 = vld [vmem:[#allocation8 + $0x108] sm:$0xf]  ;;  %v4196_v47 = vor.u32 %v2860_v7, %v2655_v17 }
 0x2a9   : > { %v4115_v55 = vor.u32 %v2886_v14, %v2749_v8  ;;  %v4612_v27 = vld [vmem:[#allocation69_spill] sm:$0xff]  ;;  %v4613_v8 = vld [vmem:[#allocation70_spill] sm:$0xff] }
 0x2ab   : > { %1822 = vmatpush.bf16.msra.mxu0 %v4099_v45  ;;  %1835 = vmatpush.bf16.msra.mxu1 %v4105_v1 }
 0x2ac   : > { %1848 = vmatpush.bf16.msra.mxu2 %v4107_v29  ;;  %1861 = vmatpush.bf16.msra.mxu3 %v4110_v20 }
 0x2af   : > { %1823 = vmatpush.bf16.msra.mxu0 %v4115_v55  ;;  %1836 = vmatpush.bf16.msra.mxu1 %v4117_v3 }
 0x2b0   : > { %1849 = vmatpush.bf16.msra.mxu2 %v4119_v4  ;;  %1862 = vmatpush.bf16.msra.mxu3 %v4122_v56 }
 0x2b3   : > { %1824 = vmatpush.bf16.msra.mxu0 %v4126_v5  ;;  %1837 = vmatpush.bf16.msra.mxu1 %v4133_v42 }
 0x2b4   : > { %1850 = vmatpush.bf16.msra.mxu2 %v4135_v48  ;;  %1863 = vmatpush.bf16.msra.mxu3 %v4137_v43 }
 0x2b7   : > { %1825 = vmatpush.bf16.msra.mxu0 %v4140_v10  ;;  %1838 = vmatpush.bf16.msra.mxu1 %v4144_v62 }
 0x2b8   : > { %1851 = vmatpush.bf16.msra.mxu2 %v4146_v23  ;;  %1864 = vmatpush.bf16.msra.mxu3 %v4149_v40 }
 0x2bb   : > { %1826 = vmatpush.bf16.msra.mxu0 %v4155_v44  ;;  %1839 = vmatpush.bf16.msra.mxu1 %v4159_v6 }
 0x2bc   : > { %1852 = vmatpush.bf16.msra.mxu2 %v4161_v58  ;;  %1865 = vmatpush.bf16.msra.mxu3 %v4164_v16 }
 0x2bf   : > { %1827 = vmatpush.bf16.msra.mxu0 %v4168_v60  ;;  %1840 = vmatpush.bf16.msra.mxu1 %v4170_v49 }
 0x2c3   : > { %1828 = vmatpush.bf16.msra.mxu0 %v4178_v31 }
 0x306   : > { %v4101_v35 = vpop.f32.mrf.mxu0  ;;  %v4103_v12 = vpop.f32.mrf.mxu1 }
 0x30d   : > { %v4128_v37 = vpop.f32.mrf.mxu2  ;;  %v4130_v38 = vpop.f32.mrf.mxu3 }
 0x30e   : > { %4611 = vst [vmem:[#allocation50_spill] sm:$0xff] %v4130_v38  ;;  %v1438_v61 = vpop.f32.mrf.mxu0  ;;  %v1451_v51 = vpop.f32.mrf.mxu1 }
 0x30f   : > { %v4173_v61 = vor.u32 %v2871_v54, %v2693_v50  ;;  %v2869_v51 = vld [vmem:[#allocation8 + $0x14c] sm:$0xf]  ;;  %v2663_v50 = vld [vmem:[#allocation8 + $0x118] sm:$0xf0] }
 0x310   : > { %v4175_v11 = vor.u32 %v2869_v51, %v2695_v21  ;;  %v4192_v51 = vor.u32 %v2862_v34, %v2653_v18 }
 0x311   : > { %1853 = vmatpush.bf16.msra.mxu2 %v4173_v61 }
 0x312   : > { %1866 = vmatpush.bf16.msra.mxu3 %v4175_v11  ;;  %1829 = vmatpush.bf16.msra.mxu0 %v4192_v51 }
 0x315   : > { %v1464_v24 = vpop.f32.mrf.mxu2  ;;  %v1477_v25 = vpop.f32.mrf.mxu3 }
 0x316   : > { %v1496_v19 = vpop.f32.mrf.mxu0  ;;  %v1509_v33 = vpop.f32.mrf.mxu1  ;;  %v2677_v24 = vld [vmem:[#allocation8 + $0x128] sm:$0xf]  ;;  %v2867_v25 = vld [vmem:[#allocation8 + $0x134] sm:$0xf0]  ;;  %1867 = vmatpush.bf16.msra.mxu3 %v4189_v13 }
 0x317   : > { %v1539_v46 = vadd.f32 %v1496_v19, %v4612_v27  ;;  %v1540_v14 = vadd.f32 %v1509_v33, %v4613_v8  ;;  %v4182_v19 = vor.u32 %v2864_v0, %v2671_v2  ;;  %v4184_v33 = vor.u32 %v2867_v25, %v2677_v24  ;;  %v4614_v27 = vld [vmem:[#allocation71_spill] sm:$0xff]  ;;  %v4615_v8 = vld [vmem:[#allocation72_spill] sm:$0xff] }
 0x319   : > { %v1543_v53 = vmul.f32 0.5, %v1539_v46  ;;  %v1544_v22 = vmul.f32 0.5, %v1540_v14  ;;  %1841 = vmatpush.bf16.msra.mxu1 %v4182_v19  ;;  %1854 = vmatpush.bf16.msra.mxu2 %v4184_v33 }
 0x31b   : > { %3047 = vtanh.f32 %v1543_v53  ;;  %v2863_v53 = vld [vmem:[#allocation8 + $0x114] sm:$0xf0] }
 0x31c   : > { %3049 = vtanh.f32 %v1544_v22  ;;  %v2861_v22 = vld [vmem:[#allocation8 + $0x10c] sm:$0xf]  ;;  %v4198_v15 = vor.u32 %v2863_v53, %v2661_v32 }
 0x31d   : > { %v1522_v30 = vpop.f32.mrf.mxu2  ;;  %v1535_v36 = vpop.f32.mrf.mxu3  ;;  %v4201_v24 = vor.u32 %v2861_v22, %v2663_v50  ;;  %1842 = vmatpush.bf16.msra.mxu1 %v4196_v47 }
 0x31e   : > { %v1541_v46 = vadd.f32 %v1522_v30, %v4614_v27  ;;  %v1542_v14 = vadd.f32 %v1535_v36, %v4615_v8  ;;  %v1498_v39 = vpop.f32.mrf.mxu0  ;;  %v1511_v28 = vpop.f32.mrf.mxu1  ;;  %1855 = vmatpush.bf16.msra.mxu2 %v4198_v15 }
 0x31f   : > { %1868 = vmatpush.bf16.msra.mxu3 %v4201_v24 }
 0x320   : > { %v1545_v54 = vmul.f32 0.5, %v1541_v46  ;;  %3051 = vtanh.f32 %v1542_v14 }
 0x321   : > { %v3048_v21 = vpop.eup %3047 }
 0x322   : > { %v3050_v0 = vpop.eup %3049  ;;  %v1549_v2 = vmul.f32 0.5, %v3048_v21  ;;  %3053 = vtanh.f32 %v1545_v54  ;;  %v745_v21 = vld [vmem:[#allocation11 + $0x4] sm:$0xf] }
 0x323   : > { %v1550_v25 = vmul.f32 0.5, %v3050_v0 }
 0x324   : > { %v1552_v26 = vadd.f32 0.5, %v1549_v2 }
 0x325   : > { %v1553_v30 = vadd.f32 0.5, %v1550_v25  ;;  %v1524_v36 = vpop.f32.mrf.mxu2  ;;  %v1537_v52 = vpop.f32.mrf.mxu3  ;;  %v4280_v25 = vperm.slane %v745_v21, 0 }
 0x326   : > { %v3052_v18 = vpop.eup %3051  ;;  %v4621_v52 = vld [vmem:[#allocation47_spill] sm:$0xff] }
 0x327   : > { %v1556_v34 = vmul.f32 %v1553_v30, %v4064_v41  ;;  %v1557_v27 = vmul.f32 %v3052_v18, %v1552_v26  ;;  %v1654_v41 = vld [vmem:[#allocation13 + $0x8] sm:$0xff]  ;;  %v4282_v26 = vperm.slane %v745_v21, 1  ;;  %v4620_v30 = vld [vmem:[#allocation46_spill] sm:$0xff] }
 0x328   : > { %v3054_v46 = vpop.eup %3053  ;;  %v1661_v32 = vpack.c.bf16 %v1654_v41, %v1654_v41  ;;  %v1167_v36 = vadd.f32 %v4620_v30, %v4280_v25 }
 0x329   : > { %v1558_v8 = vadd.f32 %v1557_v27, %v1556_v34  ;;  %v1551_v14 = vmul.f32 0.5, %v3054_v46  ;;  %v1180_v18 = vadd.f32 %v4621_v52, %v4282_v26 }
 0x32b   : > { %3055 = vtanh.f32 %v1558_v8  ;;  %1619 = vst [vmem:[#allocation15] sm:$0xff] %v1558_v8  ;;  %v1554_v39 = vadd.f32 0.5, %v1551_v14 }
 0x331   : > { %v3056_v28 = vpop.eup %3055 }
 0x332   : > { %v1560_v7 = vmul.f32 %v3056_v28, %v1554_v39  ;;  %v4288_v28 = vperm.slane %v745_v21, 2 }
 0x334   : > { %v1561_v17 = vpack.c.bf16 %v1560_v7, %v1560_v7  ;;  %1618 = vst [vmem:[#allocation13] sm:$0xff] %v1560_v7  ;;  %v4290_v7 = vperm.slane %v745_v21, 3 }
 0x336   : > { %1570 = vmatmul.bf16.vlgmr.msrb.gmra.mxu0 %v1561_v17  ;;  %1583 = vmatmul.bf16.vlgmr.msrb.gmra.mxu1 %v1561_v17 }
 0x337   : > { %1596 = vmatmul.bf16.vlgmr.msrb.gmra.mxu2 %v1561_v17  ;;  %1609 = vmatmul.bf16.vlgmr.msrb.gmra.mxu3 %v1561_v17 }
 0x338   : > { %1902 = vmatpush.bf16.msrb.mxu0 %v4099_v45  ;;  %1915 = vmatpush.bf16.msrb.mxu1 %v4105_v1 }
 0x339   : > { %1928 = vmatpush.bf16.msrb.mxu2 %v4107_v29  ;;  %1941 = vmatpush.bf16.msrb.mxu3 %v4110_v20 }
 0x33c   : > { %1903 = vmatpush.bf16.msrb.mxu0 %v4115_v55  ;;  %1916 = vmatpush.bf16.msrb.mxu1 %v4117_v3 }
 0x33d   : > { %1929 = vmatpush.bf16.msrb.mxu2 %v4119_v4  ;;  %1942 = vmatpush.bf16.msrb.mxu3 %v4122_v56 }
 0x340   : > { %1904 = vmatpush.bf16.msrb.mxu0 %v4126_v5  ;;  %1917 = vmatpush.bf16.msrb.mxu1 %v4133_v42 }
 0x341   : > { %1930 = vmatpush.bf16.msrb.mxu2 %v4135_v48  ;;  %1943 = vmatpush.bf16.msrb.mxu3 %v4137_v43 }
 0x344   : > { %1905 = vmatpush.bf16.msrb.mxu0 %v4140_v10  ;;  %1918 = vmatpush.bf16.msrb.mxu1 %v4144_v62 }
 0x345   : > { %1931 = vmatpush.bf16.msrb.mxu2 %v4146_v23  ;;  %1944 = vmatpush.bf16.msrb.mxu3 %v4149_v40 }
 0x346   : > { %1830 = vmatmul.bf16.vlgmr.msra.gmra.mxu0 %v1661_v32  ;;  %1843 = vmatmul.bf16.vlgmr.msra.gmra.mxu1 %v1661_v32 }
 0x347   : > { %1856 = vmatmul.bf16.vlgmr.msra.gmra.mxu2 %v1661_v32  ;;  %1869 = vmatmul.bf16.vlgmr.msra.gmra.mxu3 %v1661_v32  ;;  %v4622_v32 = vld [vmem:[#allocation48_spill] sm:$0xff] }
 0x348   : > { %1906 = vmatpush.bf16.msrb.mxu0 %v4155_v44  ;;  %1919 = vmatpush.bf16.msrb.mxu1 %v4159_v6 }
 0x349   : > { %1932 = vmatpush.bf16.msrb.mxu2 %v4161_v58  ;;  %1945 = vmatpush.bf16.msrb.mxu3 %v4164_v16 }
 0x34c   : > { %1907 = vmatpush.bf16.msrb.mxu0 %v4168_v60  ;;  %1920 = vmatpush.bf16.msrb.mxu1 %v4170_v49 }
 0x34d   : > { %1933 = vmatpush.bf16.msrb.mxu2 %v4173_v61  ;;  %1946 = vmatpush.bf16.msrb.mxu3 %v4175_v11 }
 0x350   : > { %1908 = vmatpush.bf16.msrb.mxu0 %v4178_v31  ;;  %1921 = vmatpush.bf16.msrb.mxu1 %v4182_v19 }
 0x351   : > { %1934 = vmatpush.bf16.msrb.mxu2 %v4184_v33  ;;  %1947 = vmatpush.bf16.msrb.mxu3 %v4189_v13 }
 0x354   : > { %1909 = vmatpush.bf16.msrb.mxu0 %v4192_v51  ;;  %1922 = vmatpush.bf16.msrb.mxu1 %v4196_v47 }
 0x355   : > { %1935 = vmatpush.bf16.msrb.mxu2 %v4198_v15  ;;  %1948 = vmatpush.bf16.msrb.mxu3 %v4201_v24 }
 0x358   : > { %1983 = vmatpush.bf16.msra.mxu0 %v4099_v45  ;;  %1996 = vmatpush.bf16.msra.mxu1 %v4105_v1 }
 0x359   : > { %2009 = vmatpush.bf16.msra.mxu2 %v4107_v29  ;;  %2022 = vmatpush.bf16.msra.mxu3 %v4110_v20 }
 0x35c   : > { %1984 = vmatpush.bf16.msra.mxu0 %v4115_v55  ;;  %1997 = vmatpush.bf16.msra.mxu1 %v4117_v3 }
 0x35d   : > { %2010 = vmatpush.bf16.msra.mxu2 %v4119_v4  ;;  %2023 = vmatpush.bf16.msra.mxu3 %v4122_v56 }
 0x360   : > { %1985 = vmatpush.bf16.msra.mxu0 %v4126_v5  ;;  %1998 = vmatpush.bf16.msra.mxu1 %v4133_v42 }
 0x361   : > { %2011 = vmatpush.bf16.msra.mxu2 %v4135_v48  ;;  %2024 = vmatpush.bf16.msra.mxu3 %v4137_v43 }
 0x364   : > { %1986 = vmatpush.bf16.msra.mxu0 %v4140_v10  ;;  %1999 = vmatpush.bf16.msra.mxu1 %v4144_v62 }
 0x365   : > { %2012 = vmatpush.bf16.msra.mxu2 %v4146_v23  ;;  %2025 = vmatpush.bf16.msra.mxu3 %v4149_v40 }
 0x368   : > { %1987 = vmatpush.bf16.msra.mxu0 %v4155_v44  ;;  %2000 = vmatpush.bf16.msra.mxu1 %v4159_v6 }
 0x369   : > { %2013 = vmatpush.bf16.msra.mxu2 %v4161_v58  ;;  %2026 = vmatpush.bf16.msra.mxu3 %v4164_v16 }
 0x36c   : > { %1988 = vmatpush.bf16.msra.mxu0 %v4168_v60  ;;  %2001 = vmatpush.bf16.msra.mxu1 %v4170_v49 }
 0x36d   : > { %2014 = vmatpush.bf16.msra.mxu2 %v4173_v61  ;;  %2027 = vmatpush.bf16.msra.mxu3 %v4175_v11 }
 0x370   : > { %1989 = vmatpush.bf16.msra.mxu0 %v4178_v31  ;;  %2002 = vmatpush.bf16.msra.mxu1 %v4182_v19 }
 0x371   : > { %2015 = vmatpush.bf16.msra.mxu2 %v4184_v33  ;;  %2028 = vmatpush.bf16.msra.mxu3 %v4189_v13 }
 0x374   : > { %1990 = vmatpush.bf16.msra.mxu0 %v4192_v51  ;;  %2003 = vmatpush.bf16.msra.mxu1 %v4196_v47 }
 0x375   : > { %2016 = vmatpush.bf16.msra.mxu2 %v4198_v15  ;;  %2029 = vmatpush.bf16.msra.mxu3 %v4201_v24 }
 0x3b3   : > { %v4272_v53 = vpop.f32.mrf.mxu0  ;;  %v4274_v22 = vpop.f32.mrf.mxu1 }
 0x3b4   : > { %4616 = vst [vmem:[#allocation51_spill] sm:$0xff] %v4272_v53 }
 0x3b5   : > { %4617 = vst [vmem:[#allocation53_spill] sm:$0xff] %v4274_v22 }
 0x3ba   : > { %v4276_v50 = vpop.f32.mrf.mxu2  ;;  %v4278_v54 = vpop.f32.mrf.mxu3 }
 0x3bb   : > { %4618 = vst [vmem:[#allocation54_spill] sm:$0xff] %v4276_v50  ;;  %v1573_v0 = vpop.f32.mrf.mxu0  ;;  %v1586_v2 = vpop.f32.mrf.mxu1 }
 0x3bc   : > { %4619 = vst [vmem:[#allocation57_spill] sm:$0xff] %v4278_v54  ;;  %v1193_v0 = vadd.f32 %v4622_v32, %v4288_v28  ;;  %v4623_v2 = vld [vmem:[#allocation49_spill] sm:$0xff] }
 0x3bd   : > { %v1206_v30 = vadd.f32 %v4623_v2, %v4290_v7  ;;  %v1656_v32 = vld [vmem:[#allocation15 + $0x8] sm:$0xff] }
 0x3c2   : > { %v1599_v34 = vpop.f32.mrf.mxu2  ;;  %v1612_v27 = vpop.f32.mrf.mxu3 }
 0x3c3   : > { %v1831_v46 = vpop.f32.mrf.mxu0  ;;  %v1844_v8 = vpop.f32.mrf.mxu1 }
 0x3c4   : > { %v1874_v14 = vadd.f32 %v1831_v46, %v1167_v36  ;;  %v1875_v39 = vadd.f32 %v1844_v8, %v1180_v18 }
 0x3c6   : > { %v1878_v17 = vmul.f32 0.5, %v1874_v14  ;;  %v1879_v41 = vmul.f32 0.5, %v1875_v39 }
 0x3c8   : > { %3057 = vtanh.f32 %v1878_v17 }
 0x3c9   : > { %3059 = vtanh.f32 %v1879_v41 }
 0x3ca   : > { %v1857_v52 = vpop.f32.mrf.mxu2  ;;  %v1870_v34 = vpop.f32.mrf.mxu3 }
 0x3cb   : > { %v1876_v27 = vadd.f32 %v1857_v52, %v1193_v0  ;;  %v1877_v54 = vadd.f32 %v1870_v34, %v1206_v30  ;;  %v1833_v36 = vpop.f32.mrf.mxu0  ;;  %v1846_v18 = vpop.f32.mrf.mxu1 }
 0x3cd   : > { %v1880_v46 = vmul.f32 0.5, %v1876_v27  ;;  %3061 = vtanh.f32 %v1877_v54 }
 0x3ce   : > { %v3058_v21 = vpop.eup %3057 }
 0x3cf   : > { %v3060_v8 = vpop.eup %3059  ;;  %v1884_v14 = vmul.f32 0.5, %v3058_v21  ;;  %3063 = vtanh.f32 %v1880_v46 }
 0x3d0   : > { %v1885_v39 = vmul.f32 0.5, %v3060_v8  ;;  %v1463_v8 = vadd.f32 %v4128_v37, %v4288_v28 }
 0x3d1   : > { %v1887_v17 = vadd.f32 0.5, %v1884_v14  ;;  %v4624_v14 = vld [vmem:[#allocation50_spill] sm:$0xff] }
 0x3d2   : > { %v1888_v50 = vadd.f32 0.5, %v1885_v39  ;;  %v1859_v22 = vpop.f32.mrf.mxu2  ;;  %v1872_v2 = vpop.f32.mrf.mxu3  ;;  %v1476_v39 = vadd.f32 %v4624_v14, %v4290_v7 }
 0x3d3   : > { %v3062_v41 = vpop.eup %3061 }
 0x3d4   : > { %v1891_v53 = vmul.f32 %v1888_v50, %v1656_v32  ;;  %v1892_v38 = vmul.f32 %v3062_v41, %v1887_v17 }
 0x3d5   : > { %v3064_v0 = vpop.eup %3063 }
 0x3d6   : > { %v4296_v30 = vadd.f32 %v1892_v38, %v1891_v53  ;;  %v1886_v54 = vmul.f32 0.5, %v3064_v0  ;;  %v1341_v38 = vadd.f32 %v4057_v63, %v4290_v7 }
 0x3d8   : > { %3065 = vtanh.f32 %v4296_v30  ;;  %v1889_v52 = vadd.f32 0.5, %v1886_v54 }
 0x3de   : > { %v3066_v34 = vpop.eup %3065 }
 0x3df   : > { %v1895_v27 = vmul.f32 %v3066_v34, %v1889_v52 }
 0x3e1   : > { %1896 = vst [vmem:[%s3597_s3] sm:$0xff] %v1895_v27  ;;  %v1901_v36 = vpack.c.bf16 %v1895_v27, %v1895_v27 }
 0x3e3   : > { %1910 = vmatmul.bf16.vlgmr.msrb.gmra.mxu0 %v1901_v36  ;;  %1923 = vmatmul.bf16.vlgmr.msrb.gmra.mxu1 %v1901_v36 }
 0x3e4   : > { %1936 = vmatmul.bf16.vlgmr.msrb.gmra.mxu2 %v1901_v36  ;;  %1949 = vmatmul.bf16.vlgmr.msrb.gmra.mxu3 %v1901_v36 }
 0x3e5   : > { %2064 = vmatpush.bf16.msrb.mxu0 %v4099_v45  ;;  %2077 = vmatpush.bf16.msrb.mxu1 %v4105_v1  ;;  %v1302_v45 = vadd.f32 %v4051_v57, %v4280_v25  ;;  %v1315_v1 = vadd.f32 %v4053_v9, %v4282_v26 }
 0x3e6   : > { %2090 = vmatpush.bf16.msrb.mxu2 %v4107_v29  ;;  %2103 = vmatpush.bf16.msrb.mxu3 %v4110_v20 }
 0x3e9   : > { %2065 = vmatpush.bf16.msrb.mxu0 %v4115_v55  ;;  %2078 = vmatpush.bf16.msrb.mxu1 %v4117_v3 }
 0x3ea   : > { %2091 = vmatpush.bf16.msrb.mxu2 %v4119_v4  ;;  %2104 = vmatpush.bf16.msrb.mxu3 %v4122_v56 }
 0x3ed   : > { %2066 = vmatpush.bf16.msrb.mxu0 %v4126_v5  ;;  %2079 = vmatpush.bf16.msrb.mxu1 %v4133_v42  ;;  %v1328_v5 = vadd.f32 %v4055_v59, %v4288_v28 }
 0x3ee   : > { %2092 = vmatpush.bf16.msrb.mxu2 %v4135_v48  ;;  %2105 = vmatpush.bf16.msrb.mxu3 %v4137_v43 }
 0x3f1   : > { %2067 = vmatpush.bf16.msrb.mxu0 %v4140_v10  ;;  %2080 = vmatpush.bf16.msrb.mxu1 %v4144_v62 }
 0x3f2   : > { %2093 = vmatpush.bf16.msrb.mxu2 %v4146_v23  ;;  %2106 = vmatpush.bf16.msrb.mxu3 %v4149_v40 }
 0x3f5   : > { %2068 = vmatpush.bf16.msrb.mxu0 %v4155_v44  ;;  %2081 = vmatpush.bf16.msrb.mxu1 %v4159_v6 }
 0x3f6   : > { %2094 = vmatpush.bf16.msrb.mxu2 %v4161_v58  ;;  %2107 = vmatpush.bf16.msrb.mxu3 %v4164_v16 }
 0x3f9   : > { %2069 = vmatpush.bf16.msrb.mxu0 %v4168_v60  ;;  %2082 = vmatpush.bf16.msrb.mxu1 %v4170_v49 }
 0x3fa   : > { %2095 = vmatpush.bf16.msrb.mxu2 %v4173_v61  ;;  %2108 = vmatpush.bf16.msrb.mxu3 %v4175_v11 }
 0x3fd   : > { %2070 = vmatpush.bf16.msrb.mxu0 %v4178_v31  ;;  %2083 = vmatpush.bf16.msrb.mxu1 %v4182_v19 }
 0x3fe   : > { %2096 = vmatpush.bf16.msrb.mxu2 %v4184_v33  ;;  %2109 = vmatpush.bf16.msrb.mxu3 %v4189_v13 }
 0x401   : > { %2071 = vmatpush.bf16.msrb.mxu0 %v4192_v51  ;;  %2084 = vmatpush.bf16.msrb.mxu1 %v4196_v47 }
 0x402   : > { %2097 = vmatpush.bf16.msrb.mxu2 %v4198_v15  ;;  %2110 = vmatpush.bf16.msrb.mxu3 %v4201_v24  ;;  %v1437_v15 = vadd.f32 %v4101_v35, %v4280_v25  ;;  %v1450_v24 = vadd.f32 %v4103_v12, %v4282_v26 }
 0x460   : > { %v1911_v29 = vpop.f32.mrf.mxu0  ;;  %v1924_v20 = vpop.f32.mrf.mxu1 }
 0x461   : > { %v1954_v55 = vadd.f32 %v1911_v29, %v1302_v45  ;;  %v1955_v3 = vadd.f32 %v1924_v20, %v1315_v1 }
 0x463   : > { %v1958_v4 = vmul.f32 0.5, %v1954_v55  ;;  %v1959_v56 = vmul.f32 0.5, %v1955_v3 }
 0x465   : > { %3067 = vtanh.f32 %v1958_v4 }
 0x466   : > { %3069 = vtanh.f32 %v1959_v56 }
 0x467   : > { %v1937_v42 = vpop.f32.mrf.mxu2  ;;  %v1950_v48 = vpop.f32.mrf.mxu3 }
 0x468   : > { %v1956_v57 = vadd.f32 %v1937_v42, %v1328_v5  ;;  %v1957_v43 = vadd.f32 %v1950_v48, %v1341_v38  ;;  %v1913_v10 = vpop.f32.mrf.mxu0  ;;  %v1926_v9 = vpop.f32.mrf.mxu1  ;;  %v4625_v48 = vld [vmem:[#allocation51_spill] sm:$0xff] }
 0x46a   : > { %v1960_v62 = vmul.f32 0.5, %v1956_v57  ;;  %3071 = vtanh.f32 %v1957_v43  ;;  %v1572_v57 = vadd.f32 %v4625_v48, %v4280_v25  ;;  %v4626_v43 = vld [vmem:[#allocation53_spill] sm:$0xff] }
 0x46b   : > { %v3068_v23 = vpop.eup %3067  ;;  %v1585_v10 = vadd.f32 %v4626_v43, %v4282_v26 }
 0x46c   : > { %v3070_v40 = vpop.eup %3069  ;;  %v1964_v44 = vmul.f32 0.5, %v3068_v23  ;;  %3073 = vtanh.f32 %v1960_v62 }
 0x46d   : > { %v1965_v6 = vmul.f32 0.5, %v3070_v40 }
 0x46e   : > { %v1967_v58 = vadd.f32 0.5, %v1964_v44 }
 0x46f   : > { %v1968_v59 = vadd.f32 0.5, %v1965_v6  ;;  %v1939_v16 = vpop.f32.mrf.mxu2  ;;  %v1952_v60 = vpop.f32.mrf.mxu3 }
 0x470   : > { %v3072_v63 = vpop.eup %3071  ;;  %v4628_v16 = vld [vmem:[#allocation57_spill] sm:$0xff] }
 0x471   : > { %v1971_v49 = vmul.f32 %v1968_v59, %v4296_v30  ;;  %v1972_v61 = vmul.f32 %v3072_v63, %v1967_v58  ;;  %v4627_v58 = vld [vmem:[#allocation54_spill] sm:$0xff]  ;;  %v1611_v60 = vadd.f32 %v4628_v16, %v4290_v7 }
 0x472   : > { %v3074_v11 = vpop.eup %3073  ;;  %v1598_v59 = vadd.f32 %v4627_v58, %v4288_v28 }
 0x473   : > { %v1973_v31 = vadd.f32 %v1972_v61, %v1971_v49  ;;  %v1966_v19 = vmul.f32 0.5, %v3074_v11 }
 0x475   : > { %3075 = vtanh.f32 %v1973_v31  ;;  %v1969_v33 = vadd.f32 0.5, %v1966_v19 }
 0x47b   : > { %v3076_v13 = vpop.eup %3075 }
 0x47c   : > { %v1975_v51 = vmul.f32 %v3076_v13, %v1969_v33 }
 0x47e   : > { %2779 = vst [vmem:[%s3597_s3 + $0x8] sm:$0xff] %v1975_v51  ;;  %v1982_v47 = vpack.c.bf16 %v1975_v51, %v1975_v51 }
 0x480   : > { %1991 = vmatmul.bf16.vlgmr.msra.gmra.mxu0 %v1982_v47  ;;  %2004 = vmatmul.bf16.vlgmr.msra.gmra.mxu1 %v1982_v47 }
 0x481   : > { %2017 = vmatmul.bf16.vlgmr.msra.gmra.mxu2 %v1982_v47  ;;  %2030 = vmatmul.bf16.vlgmr.msra.gmra.mxu3 %v1982_v47 }
 0x4fd   : > { %v1992_v53 = vpop.f32.mrf.mxu0  ;;  %v2005_v22 = vpop.f32.mrf.mxu1 }
 0x4fe   : > { %v2035_v50 = vadd.f32 %v1992_v53, %v1437_v15  ;;  %v2036_v18 = vadd.f32 %v2005_v22, %v1450_v24 }
 0x500   : > { %v2039_v46 = vmul.f32 0.5, %v2035_v50  ;;  %v2040_v21 = vmul.f32 0.5, %v2036_v18 }
 0x502   : > { %3077 = vtanh.f32 %v2039_v46 }
 0x503   : > { %3079 = vtanh.f32 %v2040_v21 }
 0x504   : > { %v2018_v17 = vpop.f32.mrf.mxu2  ;;  %v2031_v32 = vpop.f32.mrf.mxu3 }
 0x505   : > { %v2037_v35 = vadd.f32 %v2018_v17, %v1463_v8  ;;  %v2038_v2 = vadd.f32 %v2031_v32, %v1476_v39  ;;  %v1994_v41 = vpop.f32.mrf.mxu0  ;;  %v2007_v12 = vpop.f32.mrf.mxu1 }
 0x507   : > { %v2041_v0 = vmul.f32 0.5, %v2037_v35  ;;  %3081 = vtanh.f32 %v2038_v2 }
 0x508   : > { %v3078_v30 = vpop.eup %3077 }
 0x509   : > { %v3080_v54 = vpop.eup %3079  ;;  %v2045_v52 = vmul.f32 0.5, %v3078_v30  ;;  %3083 = vtanh.f32 %v2041_v0 }
 0x50a   : > { %v2046_v34 = vmul.f32 0.5, %v3080_v54 }
 0x50b   : > { %v2048_v27 = vadd.f32 0.5, %v2045_v52 }
 0x50c   : > { %v2049_v37 = vadd.f32 0.5, %v2046_v34  ;;  %v2020_v36 = vpop.f32.mrf.mxu2  ;;  %v2033_v45 = vpop.f32.mrf.mxu3 }
 0x50d   : > { %v3082_v1 = vpop.eup %3081 }
 0x50e   : > { %v2052_v29 = vmul.f32 %v2049_v37, %v1973_v31  ;;  %v2053_v20 = vmul.f32 %v3082_v1, %v2048_v27 }
 0x50f   : > { %v3084_v55 = vpop.eup %3083 }
 0x510   : > { %v2054_v3 = vadd.f32 %v2053_v20, %v2052_v29  ;;  %v2047_v4 = vmul.f32 0.5, %v3084_v55 }
 0x512   : > { %3085 = vtanh.f32 %v2054_v3  ;;  %v2050_v56 = vadd.f32 0.5, %v2047_v4 }
 0x518   : > { %v3086_v5 = vpop.eup %3085 }
 0x519   : > { %v2056_v38 = vmul.f32 %v3086_v5, %v2050_v56 }
 0x51b   : > { %2780 = vst [vmem:[%s3597_s3 + $0x10] sm:$0xff] %v2056_v38  ;;  %v2063_v42 = vpack.c.bf16 %v2056_v38, %v2056_v38 }
 0x51d   : > { %2072 = vmatmul.bf16.vlgmr.msrb.gmra.mxu0 %v2063_v42  ;;  %2085 = vmatmul.bf16.vlgmr.msrb.gmra.mxu1 %v2063_v42 }
 0x51e   : > { %2098 = vmatmul.bf16.vlgmr.msrb.gmra.mxu2 %v2063_v42  ;;  %2111 = vmatmul.bf16.vlgmr.msrb.gmra.mxu3 %v2063_v42 }
 0x59a   : > { %v2073_v9 = vpop.f32.mrf.mxu0  ;;  %v2086_v62 = vpop.f32.mrf.mxu1 }
 0x59b   : > { %v2116_v23 = vadd.f32 %v2073_v9, %v1572_v57  ;;  %v2117_v40 = vadd.f32 %v2086_v62, %v1585_v10 }
 0x59d   : > { %v2120_v44 = vmul.f32 0.5, %v2116_v23  ;;  %v2121_v6 = vmul.f32 0.5, %v2117_v40 }
 0x59f   : > { %3087 = vtanh.f32 %v2120_v44 }
 0x5a0   : > { %3089 = vtanh.f32 %v2121_v6 }
 0x5a1   : > { %v2099_v63 = vpop.f32.mrf.mxu2  ;;  %v2112_v49 = vpop.f32.mrf.mxu3 }
 0x5a2   : > { %v2118_v25 = vadd.f32 %v2099_v63, %v1598_v59  ;;  %v2119_v61 = vadd.f32 %v2112_v49, %v1611_v60  ;;  %v2075_v11 = vpop.f32.mrf.mxu0  ;;  %v2088_v26 = vpop.f32.mrf.mxu1 }
 0x5a4   : > { %v2122_v31 = vmul.f32 0.5, %v2118_v25  ;;  %3091 = vtanh.f32 %v2119_v61 }
 0x5a5   : > { %v3088_v19 = vpop.eup %3087 }
 0x5a6   : > { %v3090_v33 = vpop.eup %3089  ;;  %v2126_v13 = vmul.f32 0.5, %v3088_v19  ;;  %3093 = vtanh.f32 %v2122_v31 }
 0x5a7   : > { %v2127_v51 = vmul.f32 0.5, %v3090_v33 }
 0x5a8   : > { %v2129_v47 = vadd.f32 0.5, %v2126_v13 }
 0x5a9   : > { %v2130_v28 = vadd.f32 0.5, %v2127_v51  ;;  %v2101_v15 = vpop.f32.mrf.mxu2  ;;  %v2114_v7 = vpop.f32.mrf.mxu3 }
 0x5aa   : > { %v3092_v24 = vpop.eup %3091 }
 0x5ab   : > { %v2133_v53 = vmul.f32 %v2130_v28, %v2054_v3  ;;  %v2134_v22 = vmul.f32 %v3092_v24, %v2129_v47 }
 0x5ac   : > { %v3094_v50 = vpop.eup %3093 }
 0x5ad   : > { %v2135_v18 = vadd.f32 %v2134_v22, %v2133_v53  ;;  %v2128_v46 = vmul.f32 0.5, %v3094_v50 }
 0x5af   : > { %3095 = vtanh.f32 %v2135_v18  ;;  %2141 = vst [vmem:[#allocation15 + $0x8] sm:$0xff] %v2135_v18  ;;  %v2131_v21 = vadd.f32 0.5, %v2128_v46 }
 0x5b5   : > { %v3096_v8 = vpop.eup %3095 }
 0x5b6   : > { %v2137_v14 = vmul.f32 %v3096_v8, %v2131_v21 }
 0x5b8   : > { %2781 = vst [vmem:[%s3597_s3 + $0x18] sm:$0xff] %v2137_v14 }
 0x5b9   : > { %2140 = vst [vmem:[#allocation13 + $0x8] sm:$0xff] %v2137_v14 }
 0x5ba   : > { %3274 = shalt.err (!%p3271_p6)
}
 0x5bb   : > { %s3410_s22 = smov 128   ;;  %s3411_s3 = smov 8  }
 0x5bc   : > { %2911 = dma.vmem_to_hbm [thread:$0]  (%p3555_p2), %s2157_s13, 512, %s2159_s16, %s2143_s4, %s3410_s22, %s3410_s22, %s3411_s3  }
 0x5bd   : > { %2913 = dma.vmem_to_hbm [thread:$0]  (%p3542_p11), %s2173_s30, 256, %s2175_s8, [#allocation14], %s3410_s22, %s3410_s22, %s3411_s3  }
 0x5be   : > { %2915 = dma.vmem_to_hbm [thread:$0]  (%p3542_p11), %s2189_s1, 256, %s2191_s2, [#allocation14], %s3410_s22, %s3410_s22, %s3411_s3  }
 0x5bf   : > { %3368 = dma.done.wait (%p3542_p11), [#allocation14], 512  }
 0x5c0   : > { %3370 = vsyncadd (%p3542_p11), [#allocation14], 4294966784 }
 0x5c1 PF: > { %s2215_s12 = sand.u32 1, %s3377_s24   ;;  %p2939_p8 = pnand %p2348_p10, %p3499_p5 }
 0x5c2   : > { %s2216_s18 = scalar_lea.sflag [#allocation5], %s2215_s12 }
 0x5c3   : > { %p2940_p9 = pneg %p2939_p8 }
 0x5c5   : > { %3372 = dma.done.wait (%p2940_p9), %s2216_s18, 512  }
 0x5c6   : > { %3374 = vsyncadd (%p2940_p9), %s2216_s18, 4294966784  ;;  %s27_s29 = sadd.s32 1, %s3397_s29   ;;  %s4629_s19 = sld [smem:[#allocation21_spill]] }
 0x5c7   : > { %p24_p2 = scmp.ge.s32.totalorder %s27_s29, 4   ;;  %s4630_s24 = smov %s3381_s25 }
 0x5c8   : > { %s4631_s25 = smov %s3385_s26  ;;  %s4632_s26 = smov %s3565_s17 }
 0x5c9   : > { %s4633_s27 = smov %s3393_s28  ;;  %26 = sbr.rel (!%p24_p2) target bundleno = 14 (0xe), region = 136 }
 0x5cc   : > { %s4634_s28 = smov %s4629_s19 }
 0x5ce   :  { %2222 = vsyncpa [#allocation4], 1 }
 0x5cf   :  { %2224 = vsyncpa [#allocation4 + $0x1], 1 }
 0x5d0   :  { %2225 = vsyncpa [#allocation7], 1 }
 0x5d1   :  { %2226 = vsyncpa [#allocation10], 1 }
 0x5d2   :  { %2227 = vsyncpa [#allocation5], 1 }
 0x5d3   :  { %2229 = vsyncpa [#allocation5 + $0x1], 1 }
 0x5d4   :  { %2230 = vsyncpa [#allocation14], 1 }

</bundles_post_ra>
